<compile_context>
chip_gen: v6e
topology: v6e:2x2x1
jax: 0.10.0
libtpu: 0.0.40
codegen_flags: <defaults>
</compile_context>

<pallas_src>
import math

import jax
import jax.numpy as jnp
from jax import lax
from jax.experimental import pallas as pl
from jax.experimental.pallas import tpu as pltpu


def _round_up(x, m):
    return ((x + m - 1) // m) * m


# ---------------------------------------------------------------------------
# Fused Pallas kernel: all GRU layers + hid2lat linear
# ---------------------------------------------------------------------------
def _make_encoder_kernel(num_layers, T, BP, HP):
    """Builds the fused kernel.

    ref layout (positional):
      inputs : seq2d (T*BP, D0),
               then per layer: wih (Din, 3HP), whh (HP, 3HP),
                               bih (1, 3HP),  bhh (1, 3HP),
               then wlat (HP, LP), blat (1, LP)
      outputs: z0 (BP, LP)
      scratch: gx_buf (T*BP, 3HP), y_a (T*BP, HP), y_b (T*BP, HP)
    """

    def kernel(*refs):
        seq_ref = refs[0]
        pos = 1
        layer_refs = []
        for _ in range(num_layers):
            layer_refs.append(tuple(refs[pos:pos + 4]))
            pos += 4
        wlat_ref, blat_ref = refs[pos], refs[pos + 1]
        z0_ref = refs[pos + 2]
        gx_buf = refs[pos + 3]
        y_bufs = (refs[pos + 4], refs[pos + 5])

        cur_src = seq_ref                       # (T*BP, D_layer)
        h = jnp.zeros((BP, HP), jnp.float32)

        for li, (wih_ref, whh_ref, bih_ref, bhh_ref) in enumerate(layer_refs):
            # Hoisted input projection: one MXU matmul for ALL timesteps.
            gx_buf[...] = (
                jnp.dot(cur_src[...], wih_ref[...],
                        preferred_element_type=jnp.float32)
                + bih_ref[...]
            )

            dst = y_bufs[li % 2]
            bhh = bhh_ref[...]                  # small, hoisted
            h = jnp.zeros((BP, HP), jnp.float32)

            # Fully unrolled sequential recurrence (T small & static).
            for tt in range(T):
                gx = gx_buf[tt * BP:(tt + 1) * BP, :]          # (BP, 3HP)
                gh = jnp.dot(h, whh_ref[...],
                             preferred_element_type=jnp.float32) + bhh
                # PyTorch gate order: r, z, n (128-aligned slices).
                r = jax.nn.sigmoid(gx[:, 0:HP] + gh[:, 0:HP])
                z = jax.nn.sigmoid(gx[:, HP:2 * HP] + gh[:, HP:2 * HP])
                n = jnp.tanh(gx[:, 2 * HP:3 * HP] + r * gh[:, 2 * HP:3 * HP])
                h = (1.0 - z) * n + z * h
                if li + 1 < num_layers:
                    # lane-dense (HP=multiple of 128) aligned store
                    dst[tt * BP:(tt + 1) * BP, :] = h
            cur_src = dst

        # hid2lat on the final hidden state of the last layer.
        z0_ref[...] = (
            jnp.dot(h, wlat_ref[...], preferred_element_type=jnp.float32)
            + blat_ref[...]
        )

    return kernel


# ---------------------------------------------------------------------------
# Parameter preparation (transpose + lane padding, done ONCE)
# ---------------------------------------------------------------------------
def _pad_gate_cols(m, H, HP):
    """(K, 3H) -> (K, 3HP) placing each gate block at a 128-aligned offset."""
    K = m.shape[0]
    out = jnp.zeros((K, 3 * HP), m.dtype)
    for g in range(3):
        out = out.at[:, g * HP:g * HP + H].set(m[:, g * H:(g + 1) * H])
    return out


def prepare_params(params, hidden_dim, latent_dim):
    """Convert PyTorch-layout params to padded, pre-transposed kernel layout."""
    H = hidden_dim
    HP = _round_up(H, 128)
    L = latent_dim
    LP = _round_up(L, 128)

    layers = []
    for li, (w_ih, w_hh, b_ih, b_hh) in enumerate(params["gru_layers"]):
        d_in = w_ih.shape[1]
        wih_p = _pad_gate_cols(jnp.transpose(w_ih), H, HP)       # (d_in, 3HP)
        if li > 0:                                               # d_in == H
            wih_p = jnp.pad(wih_p, ((0, HP - d_in), (0, 0)))     # (HP, 3HP)
        whh_p = _pad_gate_cols(jnp.transpose(w_hh), H, HP)       # (H, 3HP)
        whh_p = jnp.pad(whh_p, ((0, HP - H), (0, 0)))            # (HP, 3HP)
        bih_p = _pad_gate_cols(b_ih.reshape(1, 3 * H), H, HP)
        bhh_p = _pad_gate_cols(b_hh.reshape(1, 3 * H), H, HP)
        layers.append((wih_p, whh_p, bih_p, bhh_p))

    wlat_p = jnp.pad(jnp.transpose(params["w_lat"]),
                     ((0, HP - H), (0, LP - L)))                  # (HP, LP)
    blat_p = jnp.pad(params["b_lat"].reshape(1, L), ((0, 0), (0, LP - L)))

    return {"layers": layers, "w_lat": wlat_p, "b_lat": blat_p,
            "H": H, "HP": HP, "L": L, "LP": LP}


# ---------------------------------------------------------------------------
# Encoder (non-variational) forward
# ---------------------------------------------------------------------------
def encoder_forward(prep, x, t, *, encode_with_time_dim=True, reverse=False):
    """Reproduces Encoder.forward with variational=False.

    Returns z0_means of shape (B, latent_dim).
    """
    B, T, _ = x.shape
    if encode_with_time_dim:
        t_diff = jnp.concatenate(
            [jnp.zeros((B, 1), x.dtype), t[:, 1:] - t[:, :-1]], axis=1)
        xt = jnp.concatenate([x, t_diff[..., None]], axis=-1)
    else:
        xt = x

    # NOTE: x.mean/x.std are only consumed by the variational branch, which
    # references `self.sigmoid_scale` (undefined in the source module).
    # TODO(synk): variational branch not implemented; non-variational path only.

    if reverse:
        xt = xt[:, ::-1, :]

    # time-major + batch padding to a sublane multiple, then flatten to 2D
    seq = jnp.transpose(xt, (1, 0, 2)).astype(jnp.float32)       # (T, B, D0)
    BP = _round_up(max(B, 1), 8)
    if BP != B:
        seq = jnp.pad(seq, ((0, 0), (0, BP - B), (0, 0)))
    D0 = seq.shape[-1]
    seq2d = seq.reshape(T * BP, D0)

    HP, LP = prep["HP"], prep["LP"]
    num_layers = len(prep["layers"])

    args = [seq2d]
    for layer in prep["layers"]:
        args.extend(layer)
    args.extend([prep["w_lat"], prep["b_lat"]])

    # bf16 operands with f32 accumulation would halve VMEM / double MXU rate
    # on v6e/v7x once H >= 128; at H=32 it is not worth the converts.
    vmem_spec = pl.BlockSpec(memory_space=pltpu.MemorySpace.VMEM)
    scratch = [
        pltpu.VMEM((T * BP, 3 * HP), jnp.float32),   # gx (hoisted input proj)
        pltpu.VMEM((T * BP, HP), jnp.float32),       # inter-layer seq (ping)
        pltpu.VMEM((T * BP, HP), jnp.float32),       # inter-layer seq (pong)
    ]

    io_bytes = sum(int(a.size) * 4 for a in args) + BP * LP * 4
    scratch_bytes = (T * BP * 3 * HP + 2 * T * BP * HP) * 4
    vmem_limit = int(min(max(4 << 20, 3 * (io_bytes + scratch_bytes)), 48 << 20))

    kernel = _make_encoder_kernel(num_layers, T, BP, HP)
    z0_pad = pl.pallas_call(
        kernel,
        out_shape=jax.ShapeDtypeStruct((BP, LP), jnp.float32),
        in_specs=[vmem_spec] * len(args),
        out_specs=vmem_spec,
        scratch_shapes=scratch,
        compiler_params=pltpu.CompilerParams(vmem_limit_bytes=vmem_limit),
    )(*args)

    # non-variational: z0_means = cat(z0[:, :expert], z0[:, expert:]) == z0
    return z0_pad[:B, :prep["L"]]


# ---------------------------------------------------------------------------
# Deterministic parameter init (matches nn.GRU / nn.Linear shapes & layout)
# ---------------------------------------------------------------------------
def init_params(key, input_dim, hidden_dim, latent_dim, num_layers,
                encode_with_time_dim):
    d_in0 = input_dim + 1 if encode_with_time_dim else input_dim
    stdv = 1.0 / math.sqrt(hidden_dim)
    gru_layers = []
    for layer in range(num_layers):
        d_in = d_in0 if layer == 0 else hidden_dim
        key, k1, k2, k3, k4 = jax.random.split(key, 5)
        w_ih = jax.random.uniform(k1, (3 * hidden_dim, d_in),
                                  minval=-stdv, maxval=stdv, dtype=jnp.float32)
        w_hh = jax.random.uniform(k2, (3 * hidden_dim, hidden_dim),
                                  minval=-stdv, maxval=stdv, dtype=jnp.float32)
        b_ih = jax.random.uniform(k3, (3 * hidden_dim,),
                                  minval=-stdv, maxval=stdv, dtype=jnp.float32)
        b_hh = jax.random.uniform(k4, (3 * hidden_dim,),
                                  minval=-stdv, maxval=stdv, dtype=jnp.float32)
        gru_layers.append((w_ih, w_hh, b_ih, b_hh))
    key, k5, k6 = jax.random.split(key, 3)
    bound = 1.0 / math.sqrt(hidden_dim)
    w_lat = jax.random.uniform(k5, (latent_dim, hidden_dim),
                               minval=-bound, maxval=bound, dtype=jnp.float32)
    b_lat = jax.random.uniform(k6, (latent_dim,),
                               minval=-bound, maxval=bound, dtype=jnp.float32)
    return {"gru_layers": gru_layers, "w_lat": w_lat, "b_lat": b_lat}


# ---------------------------------------------------------------------------
# Pure-JAX reference (correctness spot-check)
# ---------------------------------------------------------------------------
def _ref_forward(params, x, t, *, encode_with_time_dim=True, reverse=False):
    B, T, _ = x.shape
    if encode_with_time_dim:
        t_diff = jnp.concatenate(
            [jnp.zeros((B, 1), x.dtype), t[:, 1:] - t[:, :-1]], axis=1)
        xt = jnp.concatenate([x, t_diff[..., None]], axis=-1)
    else:
        xt = x
    if reverse:
        xt = xt[:, ::-1, :]
    seq = jnp.transpose(xt, (1, 0, 2)).astype(jnp.float32)

    h_final = None
    for (w_ih, w_hh, b_ih, b_hh) in params["gru_layers"]:
        H = w_hh.shape[1]

        def cell(h, x_t, w_ih=w_ih, w_hh=w_hh, b_ih=b_ih, b_hh=b_hh, H=H):
            gx = x_t @ w_ih.T + b_ih
            gh = h @ w_hh.T + b_hh
            r = jax.nn.sigmoid(gx[:, :H] + gh[:, :H])
            z = jax.nn.sigmoid(gx[:, H:2 * H] + gh[:, H:2 * H])
            n = jnp.tanh(gx[:, 2 * H:] + r * gh[:, 2 * H:])
            h_new = (1.0 - z) * n + z * h
            return h_new, h_new

        h0 = jnp.zeros((seq.shape[1], H), jnp.float32)
        h_final, seq = lax.scan(cell, h0, seq)
    return h_final @ params["w_lat"].T + params["b_lat"]


# ---------------------------------------------------------------------------
if __name__ == "__main__":
    # Small shapes consistent with the module's forward.
    B, T = 2, 8
    input_dim, hidden_dim, latent_dim = 4, 32, 8
    expert_latent_dims = 3          # only changes slicing; output == z0 anyway
    encoder_num_layers = 2
    encode_with_time_dim = True
    reverse = False

    key = jax.random.PRNGKey(0)
    k_param, k_x, k_t = jax.random.split(key, 3)

    params = init_params(k_param, input_dim, hidden_dim, latent_dim,
                         encoder_num_layers, encode_with_time_dim)
    prep = prepare_params(params, hidden_dim, latent_dim)  # pad/transpose once

    x = jax.random.normal(k_x, (B, T, input_dim), dtype=jnp.float32)
    t = jnp.cumsum(
        jax.random.uniform(k_t, (B, T), minval=0.1, maxval=1.0,
                           dtype=jnp.float32), axis=1)

    z0 = encoder_forward(prep, x, t,
                         encode_with_time_dim=encode_with_time_dim,
                         reverse=reverse)
    z0 = jax.block_until_ready(z0)

    z0_ref = jax.block_until_ready(
        _ref_forward(params, x, t,
                     encode_with_time_dim=encode_with_time_dim,
                     reverse=reverse))

    assert z0.shape == (B, latent_dim)
    # Tolerance covers XLA-default (bf16-pass) matmul in the reference vs the
    # MXU path inside the kernel; all-f32 storage on both sides.
    assert jnp.allclose(z0, z0_ref, atol=2e-2, rtol=2e-2)
    print("KERNEL_OK")
</pallas_src>

<mosaic_0001>
module attributes {stable_mosaic.version = 11 : i64} {
  func.func @kernel(%arg0: memref<64x5xf32, #tpu.memory_space<vmem>>, %arg1: memref<5x384xf32, #tpu.memory_space<vmem>>, %arg2: memref<128x384xf32, #tpu.memory_space<vmem>>, %arg3: memref<1x384xf32, #tpu.memory_space<vmem>>, %arg4: memref<1x384xf32, #tpu.memory_space<vmem>>, %arg5: memref<128x384xf32, #tpu.memory_space<vmem>>, %arg6: memref<128x384xf32, #tpu.memory_space<vmem>>, %arg7: memref<1x384xf32, #tpu.memory_space<vmem>>, %arg8: memref<1x384xf32, #tpu.memory_space<vmem>>, %arg9: memref<128x128xf32, #tpu.memory_space<vmem>>, %arg10: memref<1x128xf32, #tpu.memory_space<vmem>>, %arg11: memref<8x128xf32, #tpu.memory_space<vmem>>, %arg12: memref<64x384xf32, #tpu.memory_space<vmem>>, %arg13: memref<64x128xf32, #tpu.memory_space<vmem>>, %arg14: memref<64x128xf32, #tpu.memory_space<vmem>>) attributes {dimension_semantics = [], scalar_prefetch = 0 : i64, scratch_operands = 3 : i64, tpu.core_type = #tpu.core_type<tc>} {
    %c0 = arith.constant 0 : index
    %c0_0 = arith.constant 0 : index
    %0 = vector.load %arg0[%c0, %c0_0] : memref<64x5xf32, #tpu.memory_space<vmem>>, vector<64x5xf32>
    %c0_1 = arith.constant 0 : index
    %c0_2 = arith.constant 0 : index
    %1 = vector.load %arg1[%c0_1, %c0_2] : memref<5x384xf32, #tpu.memory_space<vmem>>, vector<5x384xf32>
    %cst = arith.constant dense<0.000000e+00> : vector<64x384xf32>
    %2 = tpu.matmul %0, %1, %cst {dimension_numbers = #tpu.dot_dimension_numbers<[1], [0], [0], [1], [0, 0, 1, 1], [], []>} : vector<64x5xf32>, vector<5x384xf32>, vector<64x384xf32> -> vector<64x384xf32>
    %c0_3 = arith.constant 0 : index
    %c0_4 = arith.constant 0 : index
    %3 = vector.load %arg3[%c0_3, %c0_4] : memref<1x384xf32, #tpu.memory_space<vmem>>, vector<1x384xf32>
    %4 = vector.broadcast %3 : vector<1x384xf32> to vector<64x384xf32>
    %5 = arith.addf %2, %4 : vector<64x384xf32>
    %c0_5 = arith.constant 0 : index
    %c0_6 = arith.constant 0 : index
    %6 = vector.load %arg12[%c0_5, %c0_6] : memref<64x384xf32, #tpu.memory_space<vmem>>, vector<64x384xf32>
    tpu.vector_store %arg12[%c0_5, %c0_6], %5 {strides = array<i32>} : memref<64x384xf32, #tpu.memory_space<vmem>>, vector<64x384xf32>,
    %c0_7 = arith.constant 0 : index
    %c0_8 = arith.constant 0 : index
    %7 = vector.load %arg4[%c0_7, %c0_8] : memref<1x384xf32, #tpu.memory_space<vmem>>, vector<1x384xf32>
    %cst_9 = arith.constant 0.000000e+00 : f32
    %8 = vector.broadcast %cst_9 : f32 to vector<8x128xf32>
    %c0_10 = arith.constant 0 : index
    %c0_11 = arith.constant 0 : index
    %9 = vector.load %arg12[%c0_10, %c0_11] : memref<64x384xf32, #tpu.memory_space<vmem>>, vector<8x384xf32>
    %c0_12 = arith.constant 0 : index
    %c0_13 = arith.constant 0 : index
    %10 = vector.load %arg2[%c0_12, %c0_13] : memref<128x384xf32, #tpu.memory_space<vmem>>, vector<128x384xf32>
    %cst_14 = arith.constant dense<0.000000e+00> : vector<8x384xf32>
    %11 = tpu.matmul %8, %10, %cst_14 {dimension_numbers = #tpu.dot_dimension_numbers<[1], [0], [0], [1], [0, 0, 1, 1], [], []>} : vector<8x128xf32>, vector<128x384xf32>, vector<8x384xf32> -> vector<8x384xf32>
    %12 = vector.broadcast %7 : vector<1x384xf32> to vector<8x384xf32>
    %13 = arith.addf %11, %12 : vector<8x384xf32>
    %14 = vector.extract_strided_slice %9 {offsets = [0, 0], sizes = [8, 128], strides = [1, 1]} : vector<8x384xf32> to vector<8x128xf32>
    %15 = vector.extract_strided_slice %13 {offsets = [0, 0], sizes = [8, 128], strides = [1, 1]} : vector<8x384xf32> to vector<8x128xf32>
    %16 = arith.addf %14, %15 : vector<8x128xf32>
    %17 = arith.negf %16 : vector<8x128xf32>
    %18 = math.exp %17 : vector<8x128xf32>
    %cst_15 = arith.constant 1.000000e+00 : f32
    %19 = vector.broadcast %cst_15 : f32 to vector<8x128xf32>
    %20 = arith.addf %19, %18 : vector<8x128xf32>
    %21 = arith.divf %19, %20 : vector<8x128xf32>
    %22 = vector.extract_strided_slice %9 {offsets = [0, 128], sizes = [8, 128], strides = [1, 1]} : vector<8x384xf32> to vector<8x128xf32>
    %23 = vector.extract_strided_slice %13 {offsets = [0, 128], sizes = [8, 128], strides = [1, 1]} : vector<8x384xf32> to vector<8x128xf32>
    %24 = arith.addf %22, %23 : vector<8x128xf32>
    %25 = arith.negf %24 : vector<8x128xf32>
    %26 = math.exp %25 : vector<8x128xf32>
    %cst_16 = arith.constant 1.000000e+00 : f32
    %27 = vector.broadcast %cst_16 : f32 to vector<8x128xf32>
    %28 = arith.addf %27, %26 : vector<8x128xf32>
    %29 = arith.divf %27, %28 : vector<8x128xf32>
    %30 = vector.extract_strided_slice %9 {offsets = [0, 256], sizes = [8, 128], strides = [1, 1]} : vector<8x384xf32> to vector<8x128xf32>
    %31 = vector.extract_strided_slice %13 {offsets = [0, 256], sizes = [8, 128], strides = [1, 1]} : vector<8x384xf32> to vector<8x128xf32>
    %32 = arith.mulf %21, %31 : vector<8x128xf32>
    %33 = arith.addf %30, %32 : vector<8x128xf32>
    %34 = math.tanh %33 : vector<8x128xf32>
    %cst_17 = arith.constant 1.000000e+00 : f32
    %35 = vector.broadcast %cst_17 : f32 to vector<8x128xf32>
    %36 = arith.subf %35, %29 : vector<8x128xf32>
    %37 = arith.mulf %36, %34 : vector<8x128xf32>
    %38 = arith.mulf %29, %8 : vector<8x128xf32>
    %39 = arith.addf %37, %38 : vector<8x128xf32>
    %c0_18 = arith.constant 0 : index
    %c0_19 = arith.constant 0 : index
    %40 = vector.load %arg13[%c0_18, %c0_19] : memref<64x128xf32, #tpu.memory_space<vmem>>, vector<8x128xf32>
    tpu.vector_store %arg13[%c0_18, %c0_19], %39 {strides = array<i32>} : memref<64x128xf32, #tpu.memory_space<vmem>>, vector<8x128xf32>,
    %c8 = arith.constant 8 : index
    %c0_20 = arith.constant 0 : index
    %41 = vector.load %arg12[%c8, %c0_20] : memref<64x384xf32, #tpu.memory_space<vmem>>, vector<8x384xf32>
    %c0_21 = arith.constant 0 : index
    %c0_22 = arith.constant 0 : index
    %42 = vector.load %arg2[%c0_21, %c0_22] : memref<128x384xf32, #tpu.memory_space<vmem>>, vector<128x384xf32>
    %cst_23 = arith.constant dense<0.000000e+00> : vector<8x384xf32>
    %43 = tpu.matmul %39, %42, %cst_23 {dimension_numbers = #tpu.dot_dimension_numbers<[1], [0], [0], [1], [0, 0, 1, 1], [], []>} : vector<8x128xf32>, vector<128x384xf32>, vector<8x384xf32> -> vector<8x384xf32>
    %44 = vector.broadcast %7 : vector<1x384xf32> to vector<8x384xf32>
    %45 = arith.addf %43, %44 : vector<8x384xf32>
    %46 = vector.extract_strided_slice %41 {offsets = [0, 0], sizes = [8, 128], strides = [1, 1]} : vector<8x384xf32> to vector<8x128xf32>
    %47 = vector.extract_strided_slice %45 {offsets = [0, 0], sizes = [8, 128], strides = [1, 1]} : vector<8x384xf32> to vector<8x128xf32>
    %48 = arith.addf %46, %47 : vector<8x128xf32>
    %49 = arith.negf %48 : vector<8x128xf32>
    %50 = math.exp %49 : vector<8x128xf32>
    %cst_24 = arith.constant 1.000000e+00 : f32
    %51 = vector.broadcast %cst_24 : f32 to vector<8x128xf32>
    %52 = arith.addf %51, %50 : vector<8x128xf32>
    %53 = arith.divf %51, %52 : vector<8x128xf32>
    %54 = vector.extract_strided_slice %41 {offsets = [0, 128], sizes = [8, 128], strides = [1, 1]} : vector<8x384xf32> to vector<8x128xf32>
    %55 = vector.extract_strided_slice %45 {offsets = [0, 128], sizes = [8, 128], strides = [1, 1]} : vector<8x384xf32> to vector<8x128xf32>
    %56 = arith.addf %54, %55 : vector<8x128xf32>
    %57 = arith.negf %56 : vector<8x128xf32>
    %58 = math.exp %57 : vector<8x128xf32>
    %cst_25 = arith.constant 1.000000e+00 : f32
    %59 = vector.broadcast %cst_25 : f32 to vector<8x128xf32>
    %60 = arith.addf %59, %58 : vector<8x128xf32>
    %61 = arith.divf %59, %60 : vector<8x128xf32>
    %62 = vector.extract_strided_slice %41 {offsets = [0, 256], sizes = [8, 128], strides = [1, 1]} : vector<8x384xf32> to vector<8x128xf32>
    %63 = vector.extract_strided_slice %45 {offsets = [0, 256], sizes = [8, 128], strides = [1, 1]} : vector<8x384xf32> to vector<8x128xf32>
    %64 = arith.mulf %53, %63 : vector<8x128xf32>
    %65 = arith.addf %62, %64 : vector<8x128xf32>
    %66 = math.tanh %65 : vector<8x128xf32>
    %cst_26 = arith.constant 1.000000e+00 : f32
    %67 = vector.broadcast %cst_26 : f32 to vector<8x128xf32>
    %68 = arith.subf %67, %61 : vector<8x128xf32>
    %69 = arith.mulf %68, %66 : vector<8x128xf32>
    %70 = arith.mulf %61, %39 : vector<8x128xf32>
    %71 = arith.addf %69, %70 : vector<8x128xf32>
    %c8_27 = arith.constant 8 : index
    %c0_28 = arith.constant 0 : index
    %72 = vector.load %arg13[%c8_27, %c0_28] : memref<64x128xf32, #tpu.memory_space<vmem>>, vector<8x128xf32>
    tpu.vector_store %arg13[%c8_27, %c0_28], %71 {strides = array<i32>} : memref<64x128xf32, #tpu.memory_space<vmem>>, vector<8x128xf32>,
    %c16 = arith.constant 16 : index
    %c0_29 = arith.constant 0 : index
    %73 = vector.load %arg12[%c16, %c0_29] : memref<64x384xf32, #tpu.memory_space<vmem>>, vector<8x384xf32>
    %c0_30 = arith.constant 0 : index
    %c0_31 = arith.constant 0 : index
    %74 = vector.load %arg2[%c0_30, %c0_31] : memref<128x384xf32, #tpu.memory_space<vmem>>, vector<128x384xf32>
    %cst_32 = arith.constant dense<0.000000e+00> : vector<8x384xf32>
    %75 = tpu.matmul %71, %74, %cst_32 {dimension_numbers = #tpu.dot_dimension_numbers<[1], [0], [0], [1], [0, 0, 1, 1], [], []>} : vector<8x128xf32>, vector<128x384xf32>, vector<8x384xf32> -> vector<8x384xf32>
    %76 = vector.broadcast %7 : vector<1x384xf32> to vector<8x384xf32>
    %77 = arith.addf %75, %76 : vector<8x384xf32>
    %78 = vector.extract_strided_slice %73 {offsets = [0, 0], sizes = [8, 128], strides = [1, 1]} : vector<8x384xf32> to vector<8x128xf32>
    %79 = vector.extract_strided_slice %77 {offsets = [0, 0], sizes = [8, 128], strides = [1, 1]} : vector<8x384xf32> to vector<8x128xf32>
    %80 = arith.addf %78, %79 : vector<8x128xf32>
    %81 = arith.negf %80 : vector<8x128xf32>
    %82 = math.exp %81 : vector<8x128xf32>
    %cst_33 = arith.constant 1.000000e+00 : f32
    %83 = vector.broadcast %cst_33 : f32 to vector<8x128xf32>
    %84 = arith.addf %83, %82 : vector<8x128xf32>
    %85 = arith.divf %83, %84 : vector<8x128xf32>
    %86 = vector.extract_strided_slice %73 {offsets = [0, 128], sizes = [8, 128], strides = [1, 1]} : vector<8x384xf32> to vector<8x128xf32>
    %87 = vector.extract_strided_slice %77 {offsets = [0, 128], sizes = [8, 128], strides = [1, 1]} : vector<8x384xf32> to vector<8x128xf32>
    %88 = arith.addf %86, %87 : vector<8x128xf32>
    %89 = arith.negf %88 : vector<8x128xf32>
    %90 = math.exp %89 : vector<8x128xf32>
    %cst_34 = arith.constant 1.000000e+00 : f32
    %91 = vector.broadcast %cst_34 : f32 to vector<8x128xf32>
    %92 = arith.addf %91, %90 : vector<8x128xf32>
    %93 = arith.divf %91, %92 : vector<8x128xf32>
    %94 = vector.extract_strided_slice %73 {offsets = [0, 256], sizes = [8, 128], strides = [1, 1]} : vector<8x384xf32> to vector<8x128xf32>
    %95 = vector.extract_strided_slice %77 {offsets = [0, 256], sizes = [8, 128], strides = [1, 1]} : vector<8x384xf32> to vector<8x128xf32>
    %96 = arith.mulf %85, %95 : vector<8x128xf32>
    %97 = arith.addf %94, %96 : vector<8x128xf32>
    %98 = math.tanh %97 : vector<8x128xf32>
    %cst_35 = arith.constant 1.000000e+00 : f32
    %99 = vector.broadcast %cst_35 : f32 to vector<8x128xf32>
    %100 = arith.subf %99, %93 : vector<8x128xf32>
    %101 = arith.mulf %100, %98 : vector<8x128xf32>
    %102 = arith.mulf %93, %71 : vector<8x128xf32>
    %103 = arith.addf %101, %102 : vector<8x128xf32>
    %c16_36 = arith.constant 16 : index
    %c0_37 = arith.constant 0 : index
    %104 = vector.load %arg13[%c16_36, %c0_37] : memref<64x128xf32, #tpu.memory_space<vmem>>, vector<8x128xf32>
    tpu.vector_store %arg13[%c16_36, %c0_37], %103 {strides = array<i32>} : memref<64x128xf32, #tpu.memory_space<vmem>>, vector<8x128xf32>,
    %c24 = arith.constant 24 : index
    %c0_38 = arith.constant 0 : index
    %105 = vector.load %arg12[%c24, %c0_38] : memref<64x384xf32, #tpu.memory_space<vmem>>, vector<8x384xf32>
    %c0_39 = arith.constant 0 : index
    %c0_40 = arith.constant 0 : index
    %106 = vector.load %arg2[%c0_39, %c0_40] : memref<128x384xf32, #tpu.memory_space<vmem>>, vector<128x384xf32>
    %cst_41 = arith.constant dense<0.000000e+00> : vector<8x384xf32>
    %107 = tpu.matmul %103, %106, %cst_41 {dimension_numbers = #tpu.dot_dimension_numbers<[1], [0], [0], [1], [0, 0, 1, 1], [], []>} : vector<8x128xf32>, vector<128x384xf32>, vector<8x384xf32> -> vector<8x384xf32>
    %108 = vector.broadcast %7 : vector<1x384xf32> to vector<8x384xf32>
    %109 = arith.addf %107, %108 : vector<8x384xf32>
    %110 = vector.extract_strided_slice %105 {offsets = [0, 0], sizes = [8, 128], strides = [1, 1]} : vector<8x384xf32> to vector<8x128xf32>
    %111 = vector.extract_strided_slice %109 {offsets = [0, 0], sizes = [8, 128], strides = [1, 1]} : vector<8x384xf32> to vector<8x128xf32>
    %112 = arith.addf %110, %111 : vector<8x128xf32>
    %113 = arith.negf %112 : vector<8x128xf32>
    %114 = math.exp %113 : vector<8x128xf32>
    %cst_42 = arith.constant 1.000000e+00 : f32
    %115 = vector.broadcast %cst_42 : f32 to vector<8x128xf32>
    %116 = arith.addf %115, %114 : vector<8x128xf32>
    %117 = arith.divf %115, %116 : vector<8x128xf32>
    %118 = vector.extract_strided_slice %105 {offsets = [0, 128], sizes = [8, 128], strides = [1, 1]} : vector<8x384xf32> to vector<8x128xf32>
    %119 = vector.extract_strided_slice %109 {offsets = [0, 128], sizes = [8, 128], strides = [1, 1]} : vector<8x384xf32> to vector<8x128xf32>
    %120 = arith.addf %118, %119 : vector<8x128xf32>
    %121 = arith.negf %120 : vector<8x128xf32>
    %122 = math.exp %121 : vector<8x128xf32>
    %cst_43 = arith.constant 1.000000e+00 : f32
    %123 = vector.broadcast %cst_43 : f32 to vector<8x128xf32>
    %124 = arith.addf %123, %122 : vector<8x128xf32>
    %125 = arith.divf %123, %124 : vector<8x128xf32>
    %126 = vector.extract_strided_slice %105 {offsets = [0, 256], sizes = [8, 128], strides = [1, 1]} : vector<8x384xf32> to vector<8x128xf32>
    %127 = vector.extract_strided_slice %109 {offsets = [0, 256], sizes = [8, 128], strides = [1, 1]} : vector<8x384xf32> to vector<8x128xf32>
    %128 = arith.mulf %117, %127 : vector<8x128xf32>
    %129 = arith.addf %126, %128 : vector<8x128xf32>
    %130 = math.tanh %129 : vector<8x128xf32>
    %cst_44 = arith.constant 1.000000e+00 : f32
    %131 = vector.broadcast %cst_44 : f32 to vector<8x128xf32>
    %132 = arith.subf %131, %125 : vector<8x128xf32>
    %133 = arith.mulf %132, %130 : vector<8x128xf32>
    %134 = arith.mulf %125, %103 : vector<8x128xf32>
    %135 = arith.addf %133, %134 : vector<8x128xf32>
    %c24_45 = arith.constant 24 : index
    %c0_46 = arith.constant 0 : index
    %136 = vector.load %arg13[%c24_45, %c0_46] : memref<64x128xf32, #tpu.memory_space<vmem>>, vector<8x128xf32>
    tpu.vector_store %arg13[%c24_45, %c0_46], %135 {strides = array<i32>} : memref<64x128xf32, #tpu.memory_space<vmem>>, vector<8x128xf32>,
    %c32 = arith.constant 32 : index
    %c0_47 = arith.constant 0 : index
    %137 = vector.load %arg12[%c32, %c0_47] : memref<64x384xf32, #tpu.memory_space<vmem>>, vector<8x384xf32>
    %c0_48 = arith.constant 0 : index
    %c0_49 = arith.constant 0 : index
    %138 = vector.load %arg2[%c0_48, %c0_49] : memref<128x384xf32, #tpu.memory_space<vmem>>, vector<128x384xf32>
    %cst_50 = arith.constant dense<0.000000e+00> : vector<8x384xf32>
    %139 = tpu.matmul %135, %138, %cst_50 {dimension_numbers = #tpu.dot_dimension_numbers<[1], [0], [0], [1], [0, 0, 1, 1], [], []>} : vector<8x128xf32>, vector<128x384xf32>, vector<8x384xf32> -> vector<8x384xf32>
    %140 = vector.broadcast %7 : vector<1x384xf32> to vector<8x384xf32>
    %141 = arith.addf %139, %140 : vector<8x384xf32>
    %142 = vector.extract_strided_slice %137 {offsets = [0, 0], sizes = [8, 128], strides = [1, 1]} : vector<8x384xf32> to vector<8x128xf32>
    %143 = vector.extract_strided_slice %141 {offsets = [0, 0], sizes = [8, 128], strides = [1, 1]} : vector<8x384xf32> to vector<8x128xf32>
    %144 = arith.addf %142, %143 : vector<8x128xf32>
    %145 = arith.negf %144 : vector<8x128xf32>
    %146 = math.exp %145 : vector<8x128xf32>
    %cst_51 = arith.constant 1.000000e+00 : f32
    %147 = vector.broadcast %cst_51 : f32 to vector<8x128xf32>
    %148 = arith.addf %147, %146 : vector<8x128xf32>
    %149 = arith.divf %147, %148 : vector<8x128xf32>
    %150 = vector.extract_strided_slice %137 {offsets = [0, 128], sizes = [8, 128], strides = [1, 1]} : vector<8x384xf32> to vector<8x128xf32>
    %151 = vector.extract_strided_slice %141 {offsets = [0, 128], sizes = [8, 128], strides = [1, 1]} : vector<8x384xf32> to vector<8x128xf32>
    %152 = arith.addf %150, %151 : vector<8x128xf32>
    %153 = arith.negf %152 : vector<8x128xf32>
    %154 = math.exp %153 : vector<8x128xf32>
    %cst_52 = arith.constant 1.000000e+00 : f32
    %155 = vector.broadcast %cst_52 : f32 to vector<8x128xf32>
    %156 = arith.addf %155, %154 : vector<8x128xf32>
    %157 = arith.divf %155, %156 : vector<8x128xf32>
    %158 = vector.extract_strided_slice %137 {offsets = [0, 256], sizes = [8, 128], strides = [1, 1]} : vector<8x384xf32> to vector<8x128xf32>
    %159 = vector.extract_strided_slice %141 {offsets = [0, 256], sizes = [8, 128], strides = [1, 1]} : vector<8x384xf32> to vector<8x128xf32>
    %160 = arith.mulf %149, %159 : vector<8x128xf32>
    %161 = arith.addf %158, %160 : vector<8x128xf32>
    %162 = math.tanh %161 : vector<8x128xf32>
    %cst_53 = arith.constant 1.000000e+00 : f32
    %163 = vector.broadcast %cst_53 : f32 to vector<8x128xf32>
    %164 = arith.subf %163, %157 : vector<8x128xf32>
    %165 = arith.mulf %164, %162 : vector<8x128xf32>
    %166 = arith.mulf %157, %135 : vector<8x128xf32>
    %167 = arith.addf %165, %166 : vector<8x128xf32>
    %c32_54 = arith.constant 32 : index
    %c0_55 = arith.constant 0 : index
    %168 = vector.load %arg13[%c32_54, %c0_55] : memref<64x128xf32, #tpu.memory_space<vmem>>, vector<8x128xf32>
    tpu.vector_store %arg13[%c32_54, %c0_55], %167 {strides = array<i32>} : memref<64x128xf32, #tpu.memory_space<vmem>>, vector<8x128xf32>,
    %c40 = arith.constant 40 : index
    %c0_56 = arith.constant 0 : index
    %169 = vector.load %arg12[%c40, %c0_56] : memref<64x384xf32, #tpu.memory_space<vmem>>, vector<8x384xf32>
    %c0_57 = arith.constant 0 : index
    %c0_58 = arith.constant 0 : index
    %170 = vector.load %arg2[%c0_57, %c0_58] : memref<128x384xf32, #tpu.memory_space<vmem>>, vector<128x384xf32>
    %cst_59 = arith.constant dense<0.000000e+00> : vector<8x384xf32>
    %171 = tpu.matmul %167, %170, %cst_59 {dimension_numbers = #tpu.dot_dimension_numbers<[1], [0], [0], [1], [0, 0, 1, 1], [], []>} : vector<8x128xf32>, vector<128x384xf32>, vector<8x384xf32> -> vector<8x384xf32>
    %172 = vector.broadcast %7 : vector<1x384xf32> to vector<8x384xf32>
    %173 = arith.addf %171, %172 : vector<8x384xf32>
    %174 = vector.extract_strided_slice %169 {offsets = [0, 0], sizes = [8, 128], strides = [1, 1]} : vector<8x384xf32> to vector<8x128xf32>
    %175 = vector.extract_strided_slice %173 {offsets = [0, 0], sizes = [8, 128], strides = [1, 1]} : vector<8x384xf32> to vector<8x128xf32>
    %176 = arith.addf %174, %175 : vector<8x128xf32>
    %177 = arith.negf %176 : vector<8x128xf32>
    %178 = math.exp %177 : vector<8x128xf32>
    %cst_60 = arith.constant 1.000000e+00 : f32
    %179 = vector.broadcast %cst_60 : f32 to vector<8x128xf32>
    %180 = arith.addf %179, %178 : vector<8x128xf32>
    %181 = arith.divf %179, %180 : vector<8x128xf32>
    %182 = vector.extract_strided_slice %169 {offsets = [0, 128], sizes = [8, 128], strides = [1, 1]} : vector<8x384xf32> to vector<8x128xf32>
    %183 = vector.extract_strided_slice %173 {offsets = [0, 128], sizes = [8, 128], strides = [1, 1]} : vector<8x384xf32> to vector<8x128xf32>
    %184 = arith.addf %182, %183 : vector<8x128xf32>
    %185 = arith.negf %184 : vector<8x128xf32>
    %186 = math.exp %185 : vector<8x128xf32>
    %cst_61 = arith.constant 1.000000e+00 : f32
    %187 = vector.broadcast %cst_61 : f32 to vector<8x128xf32>
    %188 = arith.addf %187, %186 : vector<8x128xf32>
    %189 = arith.divf %187, %188 : vector<8x128xf32>
    %190 = vector.extract_strided_slice %169 {offsets = [0, 256], sizes = [8, 128], strides = [1, 1]} : vector<8x384xf32> to vector<8x128xf32>
    %191 = vector.extract_strided_slice %173 {offsets = [0, 256], sizes = [8, 128], strides = [1, 1]} : vector<8x384xf32> to vector<8x128xf32>
    %192 = arith.mulf %181, %191 : vector<8x128xf32>
    %193 = arith.addf %190, %192 : vector<8x128xf32>
    %194 = math.tanh %193 : vector<8x128xf32>
    %cst_62 = arith.constant 1.000000e+00 : f32
    %195 = vector.broadcast %cst_62 : f32 to vector<8x128xf32>
    %196 = arith.subf %195, %189 : vector<8x128xf32>
    %197 = arith.mulf %196, %194 : vector<8x128xf32>
    %198 = arith.mulf %189, %167 : vector<8x128xf32>
    %199 = arith.addf %197, %198 : vector<8x128xf32>
    %c40_63 = arith.constant 40 : index
    %c0_64 = arith.constant 0 : index
    %200 = vector.load %arg13[%c40_63, %c0_64] : memref<64x128xf32, #tpu.memory_space<vmem>>, vector<8x128xf32>
    tpu.vector_store %arg13[%c40_63, %c0_64], %199 {strides = array<i32>} : memref<64x128xf32, #tpu.memory_space<vmem>>, vector<8x128xf32>,
    %c48 = arith.constant 48 : index
    %c0_65 = arith.constant 0 : index
    %201 = vector.load %arg12[%c48, %c0_65] : memref<64x384xf32, #tpu.memory_space<vmem>>, vector<8x384xf32>
    %c0_66 = arith.constant 0 : index
    %c0_67 = arith.constant 0 : index
    %202 = vector.load %arg2[%c0_66, %c0_67] : memref<128x384xf32, #tpu.memory_space<vmem>>, vector<128x384xf32>
    %cst_68 = arith.constant dense<0.000000e+00> : vector<8x384xf32>
    %203 = tpu.matmul %199, %202, %cst_68 {dimension_numbers = #tpu.dot_dimension_numbers<[1], [0], [0], [1], [0, 0, 1, 1], [], []>} : vector<8x128xf32>, vector<128x384xf32>, vector<8x384xf32> -> vector<8x384xf32>
    %204 = vector.broadcast %7 : vector<1x384xf32> to vector<8x384xf32>
    %205 = arith.addf %203, %204 : vector<8x384xf32>
    %206 = vector.extract_strided_slice %201 {offsets = [0, 0], sizes = [8, 128], strides = [1, 1]} : vector<8x384xf32> to vector<8x128xf32>
    %207 = vector.extract_strided_slice %205 {offsets = [0, 0], sizes = [8, 128], strides = [1, 1]} : vector<8x384xf32> to vector<8x128xf32>
    %208 = arith.addf %206, %207 : vector<8x128xf32>
    %209 = arith.negf %208 : vector<8x128xf32>
    %210 = math.exp %209 : vector<8x128xf32>
    %cst_69 = arith.constant 1.000000e+00 : f32
    %211 = vector.broadcast %cst_69 : f32 to vector<8x128xf32>
    %212 = arith.addf %211, %210 : vector<8x128xf32>
    %213 = arith.divf %211, %212 : vector<8x128xf32>
    %214 = vector.extract_strided_slice %201 {offsets = [0, 128], sizes = [8, 128], strides = [1, 1]} : vector<8x384xf32> to vector<8x128xf32>
    %215 = vector.extract_strided_slice %205 {offsets = [0, 128], sizes = [8, 128], strides = [1, 1]} : vector<8x384xf32> to vector<8x128xf32>
    %216 = arith.addf %214, %215 : vector<8x128xf32>
    %217 = arith.negf %216 : vector<8x128xf32>
    %218 = math.exp %217 : vector<8x128xf32>
    %cst_70 = arith.constant 1.000000e+00 : f32
    %219 = vector.broadcast %cst_70 : f32 to vector<8x128xf32>
    %220 = arith.addf %219, %218 : vector<8x128xf32>
    %221 = arith.divf %219, %220 : vector<8x128xf32>
    %222 = vector.extract_strided_slice %201 {offsets = [0, 256], sizes = [8, 128], strides = [1, 1]} : vector<8x384xf32> to vector<8x128xf32>
    %223 = vector.extract_strided_slice %205 {offsets = [0, 256], sizes = [8, 128], strides = [1, 1]} : vector<8x384xf32> to vector<8x128xf32>
    %224 = arith.mulf %213, %223 : vector<8x128xf32>
    %225 = arith.addf %222, %224 : vector<8x128xf32>
    %226 = math.tanh %225 : vector<8x128xf32>
    %cst_71 = arith.constant 1.000000e+00 : f32
    %227 = vector.broadcast %cst_71 : f32 to vector<8x128xf32>
    %228 = arith.subf %227, %221 : vector<8x128xf32>
    %229 = arith.mulf %228, %226 : vector<8x128xf32>
    %230 = arith.mulf %221, %199 : vector<8x128xf32>
    %231 = arith.addf %229, %230 : vector<8x128xf32>
    %c48_72 = arith.constant 48 : index
    %c0_73 = arith.constant 0 : index
    %232 = vector.load %arg13[%c48_72, %c0_73] : memref<64x128xf32, #tpu.memory_space<vmem>>, vector<8x128xf32>
    tpu.vector_store %arg13[%c48_72, %c0_73], %231 {strides = array<i32>} : memref<64x128xf32, #tpu.memory_space<vmem>>, vector<8x128xf32>,
    %c56 = arith.constant 56 : index
    %c0_74 = arith.constant 0 : index
    %233 = vector.load %arg12[%c56, %c0_74] : memref<64x384xf32, #tpu.memory_space<vmem>>, vector<8x384xf32>
    %c0_75 = arith.constant 0 : index
    %c0_76 = arith.constant 0 : index
    %234 = vector.load %arg2[%c0_75, %c0_76] : memref<128x384xf32, #tpu.memory_space<vmem>>, vector<128x384xf32>
    %cst_77 = arith.constant dense<0.000000e+00> : vector<8x384xf32>
    %235 = tpu.matmul %231, %234, %cst_77 {dimension_numbers = #tpu.dot_dimension_numbers<[1], [0], [0], [1], [0, 0, 1, 1], [], []>} : vector<8x128xf32>, vector<128x384xf32>, vector<8x384xf32> -> vector<8x384xf32>
    %236 = vector.broadcast %7 : vector<1x384xf32> to vector<8x384xf32>
    %237 = arith.addf %235, %236 : vector<8x384xf32>
    %238 = vector.extract_strided_slice %233 {offsets = [0, 0], sizes = [8, 128], strides = [1, 1]} : vector<8x384xf32> to vector<8x128xf32>
    %239 = vector.extract_strided_slice %237 {offsets = [0, 0], sizes = [8, 128], strides = [1, 1]} : vector<8x384xf32> to vector<8x128xf32>
    %240 = arith.addf %238, %239 : vector<8x128xf32>
    %241 = arith.negf %240 : vector<8x128xf32>
    %242 = math.exp %241 : vector<8x128xf32>
    %cst_78 = arith.constant 1.000000e+00 : f32
    %243 = vector.broadcast %cst_78 : f32 to vector<8x128xf32>
    %244 = arith.addf %243, %242 : vector<8x128xf32>
    %245 = arith.divf %243, %244 : vector<8x128xf32>
    %246 = vector.extract_strided_slice %233 {offsets = [0, 128], sizes = [8, 128], strides = [1, 1]} : vector<8x384xf32> to vector<8x128xf32>
    %247 = vector.extract_strided_slice %237 {offsets = [0, 128], sizes = [8, 128], strides = [1, 1]} : vector<8x384xf32> to vector<8x128xf32>
    %248 = arith.addf %246, %247 : vector<8x128xf32>
    %249 = arith.negf %248 : vector<8x128xf32>
    %250 = math.exp %249 : vector<8x128xf32>
    %cst_79 = arith.constant 1.000000e+00 : f32
    %251 = vector.broadcast %cst_79 : f32 to vector<8x128xf32>
    %252 = arith.addf %251, %250 : vector<8x128xf32>
    %253 = arith.divf %251, %252 : vector<8x128xf32>
    %254 = vector.extract_strided_slice %233 {offsets = [0, 256], sizes = [8, 128], strides = [1, 1]} : vector<8x384xf32> to vector<8x128xf32>
    %255 = vector.extract_strided_slice %237 {offsets = [0, 256], sizes = [8, 128], strides = [1, 1]} : vector<8x384xf32> to vector<8x128xf32>
    %256 = arith.mulf %245, %255 : vector<8x128xf32>
    %257 = arith.addf %254, %256 : vector<8x128xf32>
    %258 = math.tanh %257 : vector<8x128xf32>
    %cst_80 = arith.constant 1.000000e+00 : f32
    %259 = vector.broadcast %cst_80 : f32 to vector<8x128xf32>
    %260 = arith.subf %259, %253 : vector<8x128xf32>
    %261 = arith.mulf %260, %258 : vector<8x128xf32>
    %262 = arith.mulf %253, %231 : vector<8x128xf32>
    %263 = arith.addf %261, %262 : vector<8x128xf32>
    %c56_81 = arith.constant 56 : index
    %c0_82 = arith.constant 0 : index
    %264 = vector.load %arg13[%c56_81, %c0_82] : memref<64x128xf32, #tpu.memory_space<vmem>>, vector<8x128xf32>
    tpu.vector_store %arg13[%c56_81, %c0_82], %263 {strides = array<i32>} : memref<64x128xf32, #tpu.memory_space<vmem>>, vector<8x128xf32>,
    %c0_83 = arith.constant 0 : index
    %c0_84 = arith.constant 0 : index
    %265 = vector.load %arg13[%c0_83, %c0_84] : memref<64x128xf32, #tpu.memory_space<vmem>>, vector<64x128xf32>
    %c0_85 = arith.constant 0 : index
    %c0_86 = arith.constant 0 : index
    %266 = vector.load %arg5[%c0_85, %c0_86] : memref<128x384xf32, #tpu.memory_space<vmem>>, vector<128x384xf32>
    %cst_87 = arith.constant dense<0.000000e+00> : vector<64x384xf32>
    %267 = tpu.matmul %265, %266, %cst_87 {dimension_numbers = #tpu.dot_dimension_numbers<[1], [0], [0], [1], [0, 0, 1, 1], [], []>} : vector<64x128xf32>, vector<128x384xf32>, vector<64x384xf32> -> vector<64x384xf32>
    %c0_88 = arith.constant 0 : index
    %c0_89 = arith.constant 0 : index
    %268 = vector.load %arg7[%c0_88, %c0_89] : memref<1x384xf32, #tpu.memory_space<vmem>>, vector<1x384xf32>
    %269 = vector.broadcast %268 : vector<1x384xf32> to vector<64x384xf32>
    %270 = arith.addf %267, %269 : vector<64x384xf32>
    %c0_90 = arith.constant 0 : index
    %c0_91 = arith.constant 0 : index
    %271 = vector.load %arg12[%c0_90, %c0_91] : memref<64x384xf32, #tpu.memory_space<vmem>>, vector<64x384xf32>
    tpu.vector_store %arg12[%c0_90, %c0_91], %270 {strides = array<i32>} : memref<64x384xf32, #tpu.memory_space<vmem>>, vector<64x384xf32>,
    %c0_92 = arith.constant 0 : index
    %c0_93 = arith.constant 0 : index
    %272 = vector.load %arg8[%c0_92, %c0_93] : memref<1x384xf32, #tpu.memory_space<vmem>>, vector<1x384xf32>
    %cst_94 = arith.constant 0.000000e+00 : f32
    %273 = vector.broadcast %cst_94 : f32 to vector<8x128xf32>
    %c0_95 = arith.constant 0 : index
    %c0_96 = arith.constant 0 : index
    %274 = vector.load %arg12[%c0_95, %c0_96] : memref<64x384xf32, #tpu.memory_space<vmem>>, vector<8x384xf32>
    %c0_97 = arith.constant 0 : index
    %c0_98 = arith.constant 0 : index
    %275 = vector.load %arg6[%c0_97, %c0_98] : memref<128x384xf32, #tpu.memory_space<vmem>>, vector<128x384xf32>
    %cst_99 = arith.constant dense<0.000000e+00> : vector<8x384xf32>
    %276 = tpu.matmul %273, %275, %cst_99 {dimension_numbers = #tpu.dot_dimension_numbers<[1], [0], [0], [1], [0, 0, 1, 1], [], []>} : vector<8x128xf32>, vector<128x384xf32>, vector<8x384xf32> -> vector<8x384xf32>
    %277 = vector.broadcast %272 : vector<1x384xf32> to vector<8x384xf32>
    %278 = arith.addf %276, %277 : vector<8x384xf32>
    %279 = vector.extract_strided_slice %274 {offsets = [0, 0], sizes = [8, 128], strides = [1, 1]} : vector<8x384xf32> to vector<8x128xf32>
    %280 = vector.extract_strided_slice %278 {offsets = [0, 0], sizes = [8, 128], strides = [1, 1]} : vector<8x384xf32> to vector<8x128xf32>
    %281 = arith.addf %279, %280 : vector<8x128xf32>
    %282 = arith.negf %281 : vector<8x128xf32>
    %283 = math.exp %282 : vector<8x128xf32>
    %cst_100 = arith.constant 1.000000e+00 : f32
    %284 = vector.broadcast %cst_100 : f32 to vector<8x128xf32>
    %285 = arith.addf %284, %283 : vector<8x128xf32>
    %286 = arith.divf %284, %285 : vector<8x128xf32>
    %287 = vector.extract_strided_slice %274 {offsets = [0, 128], sizes = [8, 128], strides = [1, 1]} : vector<8x384xf32> to vector<8x128xf32>
    %288 = vector.extract_strided_slice %278 {offsets = [0, 128], sizes = [8, 128], strides = [1, 1]} : vector<8x384xf32> to vector<8x128xf32>
    %289 = arith.addf %287, %288 : vector<8x128xf32>
    %290 = arith.negf %289 : vector<8x128xf32>
    %291 = math.exp %290 : vector<8x128xf32>
    %cst_101 = arith.constant 1.000000e+00 : f32
    %292 = vector.broadcast %cst_101 : f32 to vector<8x128xf32>
    %293 = arith.addf %292, %291 : vector<8x128xf32>
    %294 = arith.divf %292, %293 : vector<8x128xf32>
    %295 = vector.extract_strided_slice %274 {offsets = [0, 256], sizes = [8, 128], strides = [1, 1]} : vector<8x384xf32> to vector<8x128xf32>
    %296 = vector.extract_strided_slice %278 {offsets = [0, 256], sizes = [8, 128], strides = [1, 1]} : vector<8x384xf32> to vector<8x128xf32>
    %297 = arith.mulf %286, %296 : vector<8x128xf32>
    %298 = arith.addf %295, %297 : vector<8x128xf32>
    %299 = math.tanh %298 : vector<8x128xf32>
    %cst_102 = arith.constant 1.000000e+00 : f32
    %300 = vector.broadcast %cst_102 : f32 to vector<8x128xf32>
    %301 = arith.subf %300, %294 : vector<8x128xf32>
    %302 = arith.mulf %301, %299 : vector<8x128xf32>
    %303 = arith.mulf %294, %273 : vector<8x128xf32>
    %304 = arith.addf %302, %303 : vector<8x128xf32>
    %c8_103 = arith.constant 8 : index
    %c0_104 = arith.constant 0 : index
    %305 = vector.load %arg12[%c8_103, %c0_104] : memref<64x384xf32, #tpu.memory_space<vmem>>, vector<8x384xf32>
    %c0_105 = arith.constant 0 : index
    %c0_106 = arith.constant 0 : index
    %306 = vector.load %arg6[%c0_105, %c0_106] : memref<128x384xf32, #tpu.memory_space<vmem>>, vector<128x384xf32>
    %cst_107 = arith.constant dense<0.000000e+00> : vector<8x384xf32>
    %307 = tpu.matmul %304, %306, %cst_107 {dimension_numbers = #tpu.dot_dimension_numbers<[1], [0], [0], [1], [0, 0, 1, 1], [], []>} : vector<8x128xf32>, vector<128x384xf32>, vector<8x384xf32> -> vector<8x384xf32>
    %308 = vector.broadcast %272 : vector<1x384xf32> to vector<8x384xf32>
    %309 = arith.addf %307, %308 : vector<8x384xf32>
    %310 = vector.extract_strided_slice %305 {offsets = [0, 0], sizes = [8, 128], strides = [1, 1]} : vector<8x384xf32> to vector<8x128xf32>
    %311 = vector.extract_strided_slice %309 {offsets = [0, 0], sizes = [8, 128], strides = [1, 1]} : vector<8x384xf32> to vector<8x128xf32>
    %312 = arith.addf %310, %311 : vector<8x128xf32>
    %313 = arith.negf %312 : vector<8x128xf32>
    %314 = math.exp %313 : vector<8x128xf32>
    %cst_108 = arith.constant 1.000000e+00 : f32
    %315 = vector.broadcast %cst_108 : f32 to vector<8x128xf32>
    %316 = arith.addf %315, %314 : vector<8x128xf32>
    %317 = arith.divf %315, %316 : vector<8x128xf32>
    %318 = vector.extract_strided_slice %305 {offsets = [0, 128], sizes = [8, 128], strides = [1, 1]} : vector<8x384xf32> to vector<8x128xf32>
    %319 = vector.extract_strided_slice %309 {offsets = [0, 128], sizes = [8, 128], strides = [1, 1]} : vector<8x384xf32> to vector<8x128xf32>
    %320 = arith.addf %318, %319 : vector<8x128xf32>
    %321 = arith.negf %320 : vector<8x128xf32>
    %322 = math.exp %321 : vector<8x128xf32>
    %cst_109 = arith.constant 1.000000e+00 : f32
    %323 = vector.broadcast %cst_109 : f32 to vector<8x128xf32>
    %324 = arith.addf %323, %322 : vector<8x128xf32>
    %325 = arith.divf %323, %324 : vector<8x128xf32>
    %326 = vector.extract_strided_slice %305 {offsets = [0, 256], sizes = [8, 128], strides = [1, 1]} : vector<8x384xf32> to vector<8x128xf32>
    %327 = vector.extract_strided_slice %309 {offsets = [0, 256], sizes = [8, 128], strides = [1, 1]} : vector<8x384xf32> to vector<8x128xf32>
    %328 = arith.mulf %317, %327 : vector<8x128xf32>
    %329 = arith.addf %326, %328 : vector<8x128xf32>
    %330 = math.tanh %329 : vector<8x128xf32>
    %cst_110 = arith.constant 1.000000e+00 : f32
    %331 = vector.broadcast %cst_110 : f32 to vector<8x128xf32>
    %332 = arith.subf %331, %325 : vector<8x128xf32>
    %333 = arith.mulf %332, %330 : vector<8x128xf32>
    %334 = arith.mulf %325, %304 : vector<8x128xf32>
    %335 = arith.addf %333, %334 : vector<8x128xf32>
    %c16_111 = arith.constant 16 : index
    %c0_112 = arith.constant 0 : index
    %336 = vector.load %arg12[%c16_111, %c0_112] : memref<64x384xf32, #tpu.memory_space<vmem>>, vector<8x384xf32>
    %c0_113 = arith.constant 0 : index
    %c0_114 = arith.constant 0 : index
    %337 = vector.load %arg6[%c0_113, %c0_114] : memref<128x384xf32, #tpu.memory_space<vmem>>, vector<128x384xf32>
    %cst_115 = arith.constant dense<0.000000e+00> : vector<8x384xf32>
    %338 = tpu.matmul %335, %337, %cst_115 {dimension_numbers = #tpu.dot_dimension_numbers<[1], [0], [0], [1], [0, 0, 1, 1], [], []>} : vector<8x128xf32>, vector<128x384xf32>, vector<8x384xf32> -> vector<8x384xf32>
    %339 = vector.broadcast %272 : vector<1x384xf32> to vector<8x384xf32>
    %340 = arith.addf %338, %339 : vector<8x384xf32>
    %341 = vector.extract_strided_slice %336 {offsets = [0, 0], sizes = [8, 128], strides = [1, 1]} : vector<8x384xf32> to vector<8x128xf32>
    %342 = vector.extract_strided_slice %340 {offsets = [0, 0], sizes = [8, 128], strides = [1, 1]} : vector<8x384xf32> to vector<8x128xf32>
    %343 = arith.addf %341, %342 : vector<8x128xf32>
    %344 = arith.negf %343 : vector<8x128xf32>
    %345 = math.exp %344 : vector<8x128xf32>
    %cst_116 = arith.constant 1.000000e+00 : f32
    %346 = vector.broadcast %cst_116 : f32 to vector<8x128xf32>
    %347 = arith.addf %346, %345 : vector<8x128xf32>
    %348 = arith.divf %346, %347 : vector<8x128xf32>
    %349 = vector.extract_strided_slice %336 {offsets = [0, 128], sizes = [8, 128], strides = [1, 1]} : vector<8x384xf32> to vector<8x128xf32>
    %350 = vector.extract_strided_slice %340 {offsets = [0, 128], sizes = [8, 128], strides = [1, 1]} : vector<8x384xf32> to vector<8x128xf32>
    %351 = arith.addf %349, %350 : vector<8x128xf32>
    %352 = arith.negf %351 : vector<8x128xf32>
    %353 = math.exp %352 : vector<8x128xf32>
    %cst_117 = arith.constant 1.000000e+00 : f32
    %354 = vector.broadcast %cst_117 : f32 to vector<8x128xf32>
    %355 = arith.addf %354, %353 : vector<8x128xf32>
    %356 = arith.divf %354, %355 : vector<8x128xf32>
    %357 = vector.extract_strided_slice %336 {offsets = [0, 256], sizes = [8, 128], strides = [1, 1]} : vector<8x384xf32> to vector<8x128xf32>
    %358 = vector.extract_strided_slice %340 {offsets = [0, 256], sizes = [8, 128], strides = [1, 1]} : vector<8x384xf32> to vector<8x128xf32>
    %359 = arith.mulf %348, %358 : vector<8x128xf32>
    %360 = arith.addf %357, %359 : vector<8x128xf32>
    %361 = math.tanh %360 : vector<8x128xf32>
    %cst_118 = arith.constant 1.000000e+00 : f32
    %362 = vector.broadcast %cst_118 : f32 to vector<8x128xf32>
    %363 = arith.subf %362, %356 : vector<8x128xf32>
    %364 = arith.mulf %363, %361 : vector<8x128xf32>
    %365 = arith.mulf %356, %335 : vector<8x128xf32>
    %366 = arith.addf %364, %365 : vector<8x128xf32>
    %c24_119 = arith.constant 24 : index
    %c0_120 = arith.constant 0 : index
    %367 = vector.load %arg12[%c24_119, %c0_120] : memref<64x384xf32, #tpu.memory_space<vmem>>, vector<8x384xf32>
    %c0_121 = arith.constant 0 : index
    %c0_122 = arith.constant 0 : index
    %368 = vector.load %arg6[%c0_121, %c0_122] : memref<128x384xf32, #tpu.memory_space<vmem>>, vector<128x384xf32>
    %cst_123 = arith.constant dense<0.000000e+00> : vector<8x384xf32>
    %369 = tpu.matmul %366, %368, %cst_123 {dimension_numbers = #tpu.dot_dimension_numbers<[1], [0], [0], [1], [0, 0, 1, 1], [], []>} : vector<8x128xf32>, vector<128x384xf32>, vector<8x384xf32> -> vector<8x384xf32>
    %370 = vector.broadcast %272 : vector<1x384xf32> to vector<8x384xf32>
    %371 = arith.addf %369, %370 : vector<8x384xf32>
    %372 = vector.extract_strided_slice %367 {offsets = [0, 0], sizes = [8, 128], strides = [1, 1]} : vector<8x384xf32> to vector<8x128xf32>
    %373 = vector.extract_strided_slice %371 {offsets = [0, 0], sizes = [8, 128], strides = [1, 1]} : vector<8x384xf32> to vector<8x128xf32>
    %374 = arith.addf %372, %373 : vector<8x128xf32>
    %375 = arith.negf %374 : vector<8x128xf32>
    %376 = math.exp %375 : vector<8x128xf32>
    %cst_124 = arith.constant 1.000000e+00 : f32
    %377 = vector.broadcast %cst_124 : f32 to vector<8x128xf32>
    %378 = arith.addf %377, %376 : vector<8x128xf32>
    %379 = arith.divf %377, %378 : vector<8x128xf32>
    %380 = vector.extract_strided_slice %367 {offsets = [0, 128], sizes = [8, 128], strides = [1, 1]} : vector<8x384xf32> to vector<8x128xf32>
    %381 = vector.extract_strided_slice %371 {offsets = [0, 128], sizes = [8, 128], strides = [1, 1]} : vector<8x384xf32> to vector<8x128xf32>
    %382 = arith.addf %380, %381 : vector<8x128xf32>
    %383 = arith.negf %382 : vector<8x128xf32>
    %384 = math.exp %383 : vector<8x128xf32>
    %cst_125 = arith.constant 1.000000e+00 : f32
    %385 = vector.broadcast %cst_125 : f32 to vector<8x128xf32>
    %386 = arith.addf %385, %384 : vector<8x128xf32>
    %387 = arith.divf %385, %386 : vector<8x128xf32>
    %388 = vector.extract_strided_slice %367 {offsets = [0, 256], sizes = [8, 128], strides = [1, 1]} : vector<8x384xf32> to vector<8x128xf32>
    %389 = vector.extract_strided_slice %371 {offsets = [0, 256], sizes = [8, 128], strides = [1, 1]} : vector<8x384xf32> to vector<8x128xf32>
    %390 = arith.mulf %379, %389 : vector<8x128xf32>
    %391 = arith.addf %388, %390 : vector<8x128xf32>
    %392 = math.tanh %391 : vector<8x128xf32>
    %cst_126 = arith.constant 1.000000e+00 : f32
    %393 = vector.broadcast %cst_126 : f32 to vector<8x128xf32>
    %394 = arith.subf %393, %387 : vector<8x128xf32>
    %395 = arith.mulf %394, %392 : vector<8x128xf32>
    %396 = arith.mulf %387, %366 : vector<8x128xf32>
    %397 = arith.addf %395, %396 : vector<8x128xf32>
    %c32_127 = arith.constant 32 : index
    %c0_128 = arith.constant 0 : index
    %398 = vector.load %arg12[%c32_127, %c0_128] : memref<64x384xf32, #tpu.memory_space<vmem>>, vector<8x384xf32>
    %c0_129 = arith.constant 0 : index
    %c0_130 = arith.constant 0 : index
    %399 = vector.load %arg6[%c0_129, %c0_130] : memref<128x384xf32, #tpu.memory_space<vmem>>, vector<128x384xf32>
    %cst_131 = arith.constant dense<0.000000e+00> : vector<8x384xf32>
    %400 = tpu.matmul %397, %399, %cst_131 {dimension_numbers = #tpu.dot_dimension_numbers<[1], [0], [0], [1], [0, 0, 1, 1], [], []>} : vector<8x128xf32>, vector<128x384xf32>, vector<8x384xf32> -> vector<8x384xf32>
    %401 = vector.broadcast %272 : vector<1x384xf32> to vector<8x384xf32>
    %402 = arith.addf %400, %401 : vector<8x384xf32>
    %403 = vector.extract_strided_slice %398 {offsets = [0, 0], sizes = [8, 128], strides = [1, 1]} : vector<8x384xf32> to vector<8x128xf32>
    %404 = vector.extract_strided_slice %402 {offsets = [0, 0], sizes = [8, 128], strides = [1, 1]} : vector<8x384xf32> to vector<8x128xf32>
    %405 = arith.addf %403, %404 : vector<8x128xf32>
    %406 = arith.negf %405 : vector<8x128xf32>
    %407 = math.exp %406 : vector<8x128xf32>
    %cst_132 = arith.constant 1.000000e+00 : f32
    %408 = vector.broadcast %cst_132 : f32 to vector<8x128xf32>
    %409 = arith.addf %408, %407 : vector<8x128xf32>
    %410 = arith.divf %408, %409 : vector<8x128xf32>
    %411 = vector.extract_strided_slice %398 {offsets = [0, 128], sizes = [8, 128], strides = [1, 1]} : vector<8x384xf32> to vector<8x128xf32>
    %412 = vector.extract_strided_slice %402 {offsets = [0, 128], sizes = [8, 128], strides = [1, 1]} : vector<8x384xf32> to vector<8x128xf32>
    %413 = arith.addf %411, %412 : vector<8x128xf32>
    %414 = arith.negf %413 : vector<8x128xf32>
    %415 = math.exp %414 : vector<8x128xf32>
    %cst_133 = arith.constant 1.000000e+00 : f32
    %416 = vector.broadcast %cst_133 : f32 to vector<8x128xf32>
    %417 = arith.addf %416, %415 : vector<8x128xf32>
    %418 = arith.divf %416, %417 : vector<8x128xf32>
    %419 = vector.extract_strided_slice %398 {offsets = [0, 256], sizes = [8, 128], strides = [1, 1]} : vector<8x384xf32> to vector<8x128xf32>
    %420 = vector.extract_strided_slice %402 {offsets = [0, 256], sizes = [8, 128], strides = [1, 1]} : vector<8x384xf32> to vector<8x128xf32>
    %421 = arith.mulf %410, %420 : vector<8x128xf32>
    %422 = arith.addf %419, %421 : vector<8x128xf32>
    %423 = math.tanh %422 : vector<8x128xf32>
    %cst_134 = arith.constant 1.000000e+00 : f32
    %424 = vector.broadcast %cst_134 : f32 to vector<8x128xf32>
    %425 = arith.subf %424, %418 : vector<8x128xf32>
    %426 = arith.mulf %425, %423 : vector<8x128xf32>
    %427 = arith.mulf %418, %397 : vector<8x128xf32>
    %428 = arith.addf %426, %427 : vector<8x128xf32>
    %c40_135 = arith.constant 40 : index
    %c0_136 = arith.constant 0 : index
    %429 = vector.load %arg12[%c40_135, %c0_136] : memref<64x384xf32, #tpu.memory_space<vmem>>, vector<8x384xf32>
    %c0_137 = arith.constant 0 : index
    %c0_138 = arith.constant 0 : index
    %430 = vector.load %arg6[%c0_137, %c0_138] : memref<128x384xf32, #tpu.memory_space<vmem>>, vector<128x384xf32>
    %cst_139 = arith.constant dense<0.000000e+00> : vector<8x384xf32>
    %431 = tpu.matmul %428, %430, %cst_139 {dimension_numbers = #tpu.dot_dimension_numbers<[1], [0], [0], [1], [0, 0, 1, 1], [], []>} : vector<8x128xf32>, vector<128x384xf32>, vector<8x384xf32> -> vector<8x384xf32>
    %432 = vector.broadcast %272 : vector<1x384xf32> to vector<8x384xf32>
    %433 = arith.addf %431, %432 : vector<8x384xf32>
    %434 = vector.extract_strided_slice %429 {offsets = [0, 0], sizes = [8, 128], strides = [1, 1]} : vector<8x384xf32> to vector<8x128xf32>
    %435 = vector.extract_strided_slice %433 {offsets = [0, 0], sizes = [8, 128], strides = [1, 1]} : vector<8x384xf32> to vector<8x128xf32>
    %436 = arith.addf %434, %435 : vector<8x128xf32>
    %437 = arith.negf %436 : vector<8x128xf32>
    %438 = math.exp %437 : vector<8x128xf32>
    %cst_140 = arith.constant 1.000000e+00 : f32
    %439 = vector.broadcast %cst_140 : f32 to vector<8x128xf32>
    %440 = arith.addf %439, %438 : vector<8x128xf32>
    %441 = arith.divf %439, %440 : vector<8x128xf32>
    %442 = vector.extract_strided_slice %429 {offsets = [0, 128], sizes = [8, 128], strides = [1, 1]} : vector<8x384xf32> to vector<8x128xf32>
    %443 = vector.extract_strided_slice %433 {offsets = [0, 128], sizes = [8, 128], strides = [1, 1]} : vector<8x384xf32> to vector<8x128xf32>
    %444 = arith.addf %442, %443 : vector<8x128xf32>
    %445 = arith.negf %444 : vector<8x128xf32>
    %446 = math.exp %445 : vector<8x128xf32>
    %cst_141 = arith.constant 1.000000e+00 : f32
    %447 = vector.broadcast %cst_141 : f32 to vector<8x128xf32>
    %448 = arith.addf %447, %446 : vector<8x128xf32>
    %449 = arith.divf %447, %448 : vector<8x128xf32>
    %450 = vector.extract_strided_slice %429 {offsets = [0, 256], sizes = [8, 128], strides = [1, 1]} : vector<8x384xf32> to vector<8x128xf32>
    %451 = vector.extract_strided_slice %433 {offsets = [0, 256], sizes = [8, 128], strides = [1, 1]} : vector<8x384xf32> to vector<8x128xf32>
    %452 = arith.mulf %441, %451 : vector<8x128xf32>
    %453 = arith.addf %450, %452 : vector<8x128xf32>
    %454 = math.tanh %453 : vector<8x128xf32>
    %cst_142 = arith.constant 1.000000e+00 : f32
    %455 = vector.broadcast %cst_142 : f32 to vector<8x128xf32>
    %456 = arith.subf %455, %449 : vector<8x128xf32>
    %457 = arith.mulf %456, %454 : vector<8x128xf32>
    %458 = arith.mulf %449, %428 : vector<8x128xf32>
    %459 = arith.addf %457, %458 : vector<8x128xf32>
    %c48_143 = arith.constant 48 : index
    %c0_144 = arith.constant 0 : index
    %460 = vector.load %arg12[%c48_143, %c0_144] : memref<64x384xf32, #tpu.memory_space<vmem>>, vector<8x384xf32>
    %c0_145 = arith.constant 0 : index
    %c0_146 = arith.constant 0 : index
    %461 = vector.load %arg6[%c0_145, %c0_146] : memref<128x384xf32, #tpu.memory_space<vmem>>, vector<128x384xf32>
    %cst_147 = arith.constant dense<0.000000e+00> : vector<8x384xf32>
    %462 = tpu.matmul %459, %461, %cst_147 {dimension_numbers = #tpu.dot_dimension_numbers<[1], [0], [0], [1], [0, 0, 1, 1], [], []>} : vector<8x128xf32>, vector<128x384xf32>, vector<8x384xf32> -> vector<8x384xf32>
    %463 = vector.broadcast %272 : vector<1x384xf32> to vector<8x384xf32>
    %464 = arith.addf %462, %463 : vector<8x384xf32>
    %465 = vector.extract_strided_slice %460 {offsets = [0, 0], sizes = [8, 128], strides = [1, 1]} : vector<8x384xf32> to vector<8x128xf32>
    %466 = vector.extract_strided_slice %464 {offsets = [0, 0], sizes = [8, 128], strides = [1, 1]} : vector<8x384xf32> to vector<8x128xf32>
    %467 = arith.addf %465, %466 : vector<8x128xf32>
    %468 = arith.negf %467 : vector<8x128xf32>
    %469 = math.exp %468 : vector<8x128xf32>
    %cst_148 = arith.constant 1.000000e+00 : f32
    %470 = vector.broadcast %cst_148 : f32 to vector<8x128xf32>
    %471 = arith.addf %470, %469 : vector<8x128xf32>
    %472 = arith.divf %470, %471 : vector<8x128xf32>
    %473 = vector.extract_strided_slice %460 {offsets = [0, 128], sizes = [8, 128], strides = [1, 1]} : vector<8x384xf32> to vector<8x128xf32>
    %474 = vector.extract_strided_slice %464 {offsets = [0, 128], sizes = [8, 128], strides = [1, 1]} : vector<8x384xf32> to vector<8x128xf32>
    %475 = arith.addf %473, %474 : vector<8x128xf32>
    %476 = arith.negf %475 : vector<8x128xf32>
    %477 = math.exp %476 : vector<8x128xf32>
    %cst_149 = arith.constant 1.000000e+00 : f32
    %478 = vector.broadcast %cst_149 : f32 to vector<8x128xf32>
    %479 = arith.addf %478, %477 : vector<8x128xf32>
    %480 = arith.divf %478, %479 : vector<8x128xf32>
    %481 = vector.extract_strided_slice %460 {offsets = [0, 256], sizes = [8, 128], strides = [1, 1]} : vector<8x384xf32> to vector<8x128xf32>
    %482 = vector.extract_strided_slice %464 {offsets = [0, 256], sizes = [8, 128], strides = [1, 1]} : vector<8x384xf32> to vector<8x128xf32>
    %483 = arith.mulf %472, %482 : vector<8x128xf32>
    %484 = arith.addf %481, %483 : vector<8x128xf32>
    %485 = math.tanh %484 : vector<8x128xf32>
    %cst_150 = arith.constant 1.000000e+00 : f32
    %486 = vector.broadcast %cst_150 : f32 to vector<8x128xf32>
    %487 = arith.subf %486, %480 : vector<8x128xf32>
    %488 = arith.mulf %487, %485 : vector<8x128xf32>
    %489 = arith.mulf %480, %459 : vector<8x128xf32>
    %490 = arith.addf %488, %489 : vector<8x128xf32>
    %c56_151 = arith.constant 56 : index
    %c0_152 = arith.constant 0 : index
    %491 = vector.load %arg12[%c56_151, %c0_152] : memref<64x384xf32, #tpu.memory_space<vmem>>, vector<8x384xf32>
    %c0_153 = arith.constant 0 : index
    %c0_154 = arith.constant 0 : index
    %492 = vector.load %arg6[%c0_153, %c0_154] : memref<128x384xf32, #tpu.memory_space<vmem>>, vector<128x384xf32>
    %cst_155 = arith.constant dense<0.000000e+00> : vector<8x384xf32>
    %493 = tpu.matmul %490, %492, %cst_155 {dimension_numbers = #tpu.dot_dimension_numbers<[1], [0], [0], [1], [0, 0, 1, 1], [], []>} : vector<8x128xf32>, vector<128x384xf32>, vector<8x384xf32> -> vector<8x384xf32>
    %494 = vector.broadcast %272 : vector<1x384xf32> to vector<8x384xf32>
    %495 = arith.addf %493, %494 : vector<8x384xf32>
    %496 = vector.extract_strided_slice %491 {offsets = [0, 0], sizes = [8, 128], strides = [1, 1]} : vector<8x384xf32> to vector<8x128xf32>
    %497 = vector.extract_strided_slice %495 {offsets = [0, 0], sizes = [8, 128], strides = [1, 1]} : vector<8x384xf32> to vector<8x128xf32>
    %498 = arith.addf %496, %497 : vector<8x128xf32>
    %499 = arith.negf %498 : vector<8x128xf32>
    %500 = math.exp %499 : vector<8x128xf32>
    %cst_156 = arith.constant 1.000000e+00 : f32
    %501 = vector.broadcast %cst_156 : f32 to vector<8x128xf32>
    %502 = arith.addf %501, %500 : vector<8x128xf32>
    %503 = arith.divf %501, %502 : vector<8x128xf32>
    %504 = vector.extract_strided_slice %491 {offsets = [0, 128], sizes = [8, 128], strides = [1, 1]} : vector<8x384xf32> to vector<8x128xf32>
    %505 = vector.extract_strided_slice %495 {offsets = [0, 128], sizes = [8, 128], strides = [1, 1]} : vector<8x384xf32> to vector<8x128xf32>
    %506 = arith.addf %504, %505 : vector<8x128xf32>
    %507 = arith.negf %506 : vector<8x128xf32>
    %508 = math.exp %507 : vector<8x128xf32>
    %cst_157 = arith.constant 1.000000e+00 : f32
    %509 = vector.broadcast %cst_157 : f32 to vector<8x128xf32>
    %510 = arith.addf %509, %508 : vector<8x128xf32>
    %511 = arith.divf %509, %510 : vector<8x128xf32>
    %512 = vector.extract_strided_slice %491 {offsets = [0, 256], sizes = [8, 128], strides = [1, 1]} : vector<8x384xf32> to vector<8x128xf32>
    %513 = vector.extract_strided_slice %495 {offsets = [0, 256], sizes = [8, 128], strides = [1, 1]} : vector<8x384xf32> to vector<8x128xf32>
    %514 = arith.mulf %503, %513 : vector<8x128xf32>
    %515 = arith.addf %512, %514 : vector<8x128xf32>
    %516 = math.tanh %515 : vector<8x128xf32>
    %cst_158 = arith.constant 1.000000e+00 : f32
    %517 = vector.broadcast %cst_158 : f32 to vector<8x128xf32>
    %518 = arith.subf %517, %511 : vector<8x128xf32>
    %519 = arith.mulf %518, %516 : vector<8x128xf32>
    %520 = arith.mulf %511, %490 : vector<8x128xf32>
    %521 = arith.addf %519, %520 : vector<8x128xf32>
    %c0_159 = arith.constant 0 : index
    %c0_160 = arith.constant 0 : index
    %522 = vector.load %arg9[%c0_159, %c0_160] : memref<128x128xf32, #tpu.memory_space<vmem>>, vector<128x128xf32>
    %cst_161 = arith.constant dense<0.000000e+00> : vector<8x128xf32>
    %523 = tpu.matmul %521, %522, %cst_161 {dimension_numbers = #tpu.dot_dimension_numbers<[1], [0], [0], [1], [0, 0, 1, 1], [], []>} : vector<8x128xf32>, vector<128x128xf32>, vector<8x128xf32> -> vector<8x128xf32>
    %c0_162 = arith.constant 0 : index
    %c0_163 = arith.constant 0 : index
    %524 = vector.load %arg10[%c0_162, %c0_163] : memref<1x128xf32, #tpu.memory_space<vmem>>, vector<1x128xf32>
    %525 = vector.broadcast %524 : vector<1x128xf32> to vector<8x128xf32>
    %526 = arith.addf %523, %525 : vector<8x128xf32>
    %c0_164 = arith.constant 0 : index
    %c0_165 = arith.constant 0 : index
    %527 = vector.load %arg11[%c0_164, %c0_165] : memref<8x128xf32, #tpu.memory_space<vmem>>, vector<8x128xf32>
    tpu.vector_store %arg11[%c0_164, %c0_165], %526 {strides = array<i32>} : memref<8x128xf32, #tpu.memory_space<vmem>>, vector<8x128xf32>,
    return
  }
}

</mosaic_0001>

<bundles_post_ra>
// kernel: tpu_custom_call.1
= control target key start
LH: loop header
LB: loop body
LE: loop exit
PB: predicated region body
PF: predicated region fallthrough
CT: control target
= control target key end

     0   :  { %16 = vsyncpa [#allocation6], 0  ;;  %s7245_s0 = inlined_call_operand.vmem [shape: f32[64,5], index: 0, kind: input, shape index: {}]   ;;  %s7246_s1 = inlined_call_operand.vmem [shape: f32[5,384], index: 1, kind: input, shape index: {}]   ;;  %s7247_s2 = inlined_call_operand.hbm [shape: f32[128,384], index: 2, kind: input, shape index: {}]   ;;  %s7248_s3 = inlined_call_operand.vmem [shape: f32[1,384], index: 3, kind: input, shape index: {}]   ;;  %s7249_s4 = inlined_call_operand.vmem [shape: f32[1,384], index: 4, kind: input, shape index: {}]   ;;  %s7250_s5 = inlined_call_operand.hbm [shape: f32[128,384], index: 5, kind: input, shape index: {}]   ;;  %s7251_s6 = inlined_call_operand.hbm [shape: f32[128,384], index: 6, kind: input, shape index: {}]   ;;  %s7252_s7 = inlined_call_operand.vmem [shape: f32[1,384], index: 7, kind: input, shape index: {}]   ;;  %s7253_s8 = inlined_call_operand.vmem [shape: f32[1,384], index: 8, kind: input, shape index: {}]   ;;  %s7254_s9 = inlined_call_operand.hbm [shape: f32[128,128], index: 9, kind: input, shape index: {}]   ;;  %s7255_s10 = inlined_call_operand.vmem [shape: f32[1,128], index: 10, kind: input, shape index: {}]   ;;  %s7256_s11 = inlined_call_operand.hbm [shape: f32[8,128], index: 11, kind: output, shape index: {}]  }
   0x1   :  { %17 = vsyncpa [#allocation9], 0 }
   0x2   :  { %18 = vsyncpa [#allocation12], 0 }
   0x3   :  { %19 = vsyncpa [#allocation7], 0  ;;  %s5293_s17 = smov [#allocation8]   ;;  %s5294_s19 = smov [#allocation5]  }
   0x4   :  { %s45_s18 = sshll.u32 %s5293_s17, 4  ;;  %s29_s20 = sshll.u32 %s5294_s19, 4  ;;  %s46_s18 = int_to_ptr.vmem [resolvable:$true] %s45_s18  ;;  %s30_s20 = int_to_ptr.vmem [resolvable:$true] %s29_s20 }
   0x5   :  { %s5193_s21 = scalar_lea.vmem %s46_s18, 6144  ;;  %p5198_p1 = scmp.lt.s32.totalorder %s46_s18, %s46_s18 }
   0x6   :  { %p5194_p0 = scmp.ne.s32.totalorder %s46_s18, %s5193_s21  ;;  %p5199_p2 = scmp.lt.s32.totalorder %s5193_s21, %s5193_s21 }
   0x8   :  { %p5200_p3 = por %p5199_p2, %p5198_p1 }
   0xa   :  { %p5201_p4 = pnand %p5200_p3, %p5194_p0 }
   0xc   :  { %5204 = shalt.err (!%p5201_p4)
}
   0xd   :  { %s5295_s22 = smov 384   ;;  %s5296_s23 = smov 24  }
   0xe   :  { %51 = dma.hbm_to_vmem [thread:$0]  %s7250_s5, 6144, %s46_s18, [#allocation9], %s5295_s22, %s5295_s22, %s5296_s23  }
   0xf   :  { %s5213_s26 = scalar_lea.vmem %s30_s20, 6144  ;;  %p5218_p6 = scmp.lt.s32.totalorder %s30_s20, %s30_s20 }
  0x10   :  { %p5214_p5 = scmp.ne.s32.totalorder %s30_s20, %s5213_s26  ;;  %p5219_p7 = scmp.lt.s32.totalorder %s5213_s26, %s5213_s26 }
  0x12   :  { %p5220_p8 = por %p5219_p7, %p5218_p6 }
  0x14   :  { %p5221_p9 = pnand %p5220_p8, %p5214_p5 }
  0x16   :  { %5224 = shalt.err (!%p5221_p9)
}
  0x17   :  { %35 = dma.hbm_to_vmem [thread:$0]  %s7247_s2, 6144, %s30_s20, [#allocation6], %s5295_s22, %s5295_s22, %s5296_s23  }
  0x18   :  { %s5297_s29 = smov [#allocation10]   ;;  %s5298_s12 = smov [#allocation11]  }
  0x19   :  { %s57_s30 = sshll.u32 %s5297_s29, 4  ;;  %s73_s13 = sshll.u32 %s5298_s12, 4  ;;  %s58_s30 = int_to_ptr.vmem [resolvable:$true] %s57_s30  ;;  %s74_s13 = int_to_ptr.vmem [resolvable:$true] %s73_s13 }
  0x1a   :  { %s5233_s14 = scalar_lea.vmem %s58_s30, 6144  ;;  %p5238_p11 = scmp.lt.s32.totalorder %s58_s30, %s58_s30 }
  0x1b   :  { %p5234_p10 = scmp.ne.s32.totalorder %s58_s30, %s5233_s14  ;;  %p5239_p12 = scmp.lt.s32.totalorder %s5233_s14, %s5233_s14 }
  0x1d   :  { %p5240_p13 = por %p5239_p12, %p5238_p11 }
  0x1f   :  { %p5241_p0 = pnand %p5240_p13, %p5234_p10 }
  0x21   :  { %5244 = shalt.err (!%p5241_p0)
}
  0x22   :  { %63 = dma.hbm_to_vmem [thread:$0]  %s7251_s6, 6144, %s58_s30, [#allocation9], %s5295_s22, %s5295_s22, %s5296_s23  }
  0x23   :  { %s5253_s16 = scalar_lea.vmem %s74_s13, 2048  ;;  %p5258_p2 = scmp.lt.s32.totalorder %s74_s13, %s74_s13 }
  0x24   :  { %p5254_p1 = scmp.ne.s32.totalorder %s74_s13, %s5253_s16  ;;  %p5259_p3 = scmp.lt.s32.totalorder %s5253_s16, %s5253_s16 }
  0x26   :  { %p5260_p4 = por %p5259_p3, %p5258_p2 }
  0x28   :  { %p5261_p5 = pnand %p5260_p4, %p5254_p1 }
  0x2a   :  { %5264 = shalt.err (!%p5261_p5)
}
  0x2b   :  { %s5299_s2 = smov 128   ;;  %s5300_s17 = smov 8  }
  0x2c   :  { %79 = dma.hbm_to_vmem [thread:$0]  %s7254_s9, 2048, %s74_s13, [#allocation12], %s5299_s2, %s5299_s2, %s5300_s17  }
  0x2d   :  { %5285 = dma.done.wait [#allocation6], 6144  }
  0x2e   :  { %5286 = vsyncadd [#allocation6], 4294961152 }
  0x2f   :  { %5287 = dma.done.wait [#allocation9], 12288  }
  0x30   :  { %5288 = vsyncadd [#allocation9], 4294955008 }
  0x31   :  { %5289 = dma.done.wait [#allocation12], 2048  }
  0x32   :  { %5290 = vsyncadd [#allocation12], 4294965248  ;;  %v7257_v0 = vmov 0.0   ;;  %vm147_vm0 = vcmask 1044480   ;;  %v103_v1 = vld [vmem:[%s7246_s1 + $0x8] sm:$0x1f]  ;;  %v107_v60 = vlaneseq }
  0x33   :  { %221 = vmatprep.mubr.f32.mxu0 %v7257_v0  ;;  %v102_v2 = vld [vmem:[%s7246_s1] sm:$0x1f]  ;;  %vm122_vm1 = vcmask 39936   ;;  %3939 = vmatprep.subr.msk.mxu0 %vm147_vm0, %v103_v1  ;;  %v5387_v4 = vld [vmem:[#allocation5 + $0x170] sm:$0xff]  ;;  %v5389_v5 = vld [vmem:[#allocation5 + $0x168] sm:$0xff]  ;;  %vm5302_vm2 = vmmov 0  }
  0x34   :  { %v94_v3 = vld [vmem:[%s7245_s0] sm:$0xff]  ;;  %7340 = vst [vmem:[#allocation18_spill] sm:$0xff] %v5387_v4  ;;  %3940 = vmatpush1.msk.msra.mxu0 %vm147_vm0, %v102_v2  ;;  %v5393_v6 = vld [vmem:[#allocation5 + $0x158] sm:$0xff]  ;;  %v5397_v7 = vld [vmem:[#allocation5 + $0x150] sm:$0xff]  ;;  %v108_v61 = vshrl.u32 %v107_v60, 7  ;;  %s5303_s22 = smov [#allocation13]  }
  0x35   :  { %4315 = vmatprep.mubr.msk.f32.mxu1 %vm122_vm1, %v94_v3  ;;  %3941 = vmatmul.mubr.msk.f32.vlgmr.msra.gmra.mxu0 %vm122_vm1, %v94_v3  ;;  %v95_v8 = vld [vmem:[%s7245_s0 + $0x8] sm:$0xff]  ;;  %v5404_v9 = vld [vmem:[#allocation5 + $0x140] sm:$0xff]  ;;  %v5407_v10 = vld [vmem:[#allocation5 + $0x138] sm:$0xff]  ;;  %s3928_s23 = sshll.u32 %s5303_s22, 4  ;;  %s3929_s23 = int_to_ptr.vmem [resolvable:$true] %s3928_s23 }
  0x36   :  { %467 = vmatprep.subr.mxu0 %v5387_v4  ;;  %227 = vmatprep.mubr.f32.mxu0 %v7257_v0  ;;  %v5410_v11 = vld [vmem:[#allocation5 + $0x128] sm:$0xff]  ;;  %v5414_v12 = vld [vmem:[#allocation5 + $0x120] sm:$0xff]  ;;  %v5421_v13 = vld [vmem:[%s7245_s0 + $0x10] sm:$0xff]  ;;  %v5687_v62 = vsub.s32 0, %v108_v61  ;;  %v5692_v2 = vsub.s32 1, %v108_v61  ;;  %s5265_s9 = scalar_lea.vmem %s3929_s23, 128  ;;  %p5270_p7 = scmp.lt.s32.totalorder %s3929_s23, %s3929_s23 }
  0x37   :  { %468 = vmatpush1.msra.mxu0 %v5389_v5  ;;  %v5423_v14 = vld [vmem:[#allocation5 + $0x110] sm:$0xff]  ;;  %v5426_v15 = vld [vmem:[#allocation5 + $0x108] sm:$0xff]  ;;  %v5429_v16 = vld [vmem:[#allocation5 + $0xf8] sm:$0xff]  ;;  %p5266_p6 = scmp.ne.s32.totalorder %s3929_s23, %s5265_s9  ;;  %p5271_p8 = scmp.lt.s32.totalorder %s5265_s9, %s5265_s9 }
  0x38   :  { %469 = vmatprep.subr.mxu0 %v5393_v6  ;;  %v5434_v17 = vld [vmem:[#allocation5 + $0xf0] sm:$0xff]  ;;  %v5441_v18 = vld [vmem:[%s7245_s0 + $0x18] sm:$0xff]  ;;  %v5443_v19 = vld [vmem:[#allocation5 + $0xe0] sm:$0xff]  ;;  %7349 = vst [vmem:[#allocation27_spill] sm:$0xff] %v5687_v62 }
  0x39   :  { %470 = vmatpush1.msra.mxu0 %v5397_v7  ;;  %v5446_v20 = vld [vmem:[#allocation5 + $0xd8] sm:$0xff]  ;;  %v104_v21 = vld [vmem:[%s7246_s1 + $0x10] sm:$0x1f]  ;;  %v5452_v22 = vld [vmem:[#allocation5 + $0xc8] sm:$0xff]  ;;  %7350 = vst [vmem:[#allocation28_spill] sm:$0xff] %v5692_v2  ;;  %p5272_p9 = por %p5271_p8, %p5270_p7 }
  0x3a   :  { %3942 = vmatmul.mubr.msk.f32.gmra.mxu0 %vm122_vm1, %v95_v8  ;;  %471 = vmatprep.subr.mxu0 %v5404_v9  ;;  %v5458_v23 = vld [vmem:[#allocation5 + $0xc0] sm:$0xff]  ;;  %v5467_v25 = vld [vmem:[#allocation5 + $0xb0] sm:$0xff]  ;;  %v5470_v26 = vld [vmem:[#allocation5 + $0xa8] sm:$0xff] }
  0x3b   :  { %472 = vmatpush1.msra.mxu0 %v5407_v10  ;;  %233 = vmatprep.mubr.f32.mxu0 %v7257_v0  ;;  %v5465_v24 = vld [vmem:[%s7245_s0 + $0x20] sm:$0xff]  ;;  %v5474_v27 = vld [vmem:[#allocation5 + $0x98] sm:$0xff]  ;;  %v5480_v28 = vld [vmem:[#allocation5 + $0x90] sm:$0xff]  ;;  %p5273_p10 = pnand %p5272_p9, %p5266_p6 }
  0x3c   :  { %473 = vmatprep.subr.mxu0 %v5410_v11  ;;  %4313 = vmatprep.subr.msk.mxu1 %vm147_vm0, %v104_v21  ;;  %v5482_v29 = vld [vmem:[#allocation5 + $0x178] sm:$0xff]  ;;  %v5489_v30 = vld [vmem:[%s7245_s0 + $0x28] sm:$0xff]  ;;  %v5491_v31 = vld [vmem:[#allocation5 + $0x80] sm:$0xff] }
  0x3d   :  { %474 = vmatpush1.msra.mxu0 %v5414_v12  ;;  %4314 = vmatpush3.msk.msra.mxu1 %vm147_vm0, %v104_v21  ;;  %v5494_v32 = vld [vmem:[#allocation5 + $0x78] sm:$0xff]  ;;  %v5498_v33 = vld [vmem:[#allocation5 + $0x68] sm:$0xff]  ;;  %v5504_v34 = vld [vmem:[#allocation5 + $0x60] sm:$0xff] }
  0x3e   :  { %3943 = vmatmul.mubr.msk.f32.gmra.mxu0 %vm122_vm1, %v5421_v13  ;;  %475 = vmatprep.subr.mxu0 %v5423_v14  ;;  %v5506_v35 = vld [vmem:[#allocation5 + $0x160] sm:$0xff]  ;;  %v100_v36 = vld [vmem:[%s7245_s0 + $0x30] sm:$0xff]  ;;  %v5516_v38 = vld [vmem:[#allocation5 + $0x48] sm:$0xff] }
  0x3f   :  { %476 = vmatpush1.msra.mxu0 %v5426_v15  ;;  %239 = vmatprep.mubr.f32.mxu0 %v7257_v0  ;;  %v5513_v37 = vld [vmem:[#allocation5 + $0x50] sm:$0xff]  ;;  %v5520_v39 = vld [vmem:[#allocation5 + $0x38] sm:$0xff]  ;;  %v5527_v41 = vld [vmem:[#allocation5 + $0x148] sm:$0xff] }
  0x40   :  { %477 = vmatprep.subr.mxu0 %v5429_v16  ;;  %4327 = vmatprep.subr.mxu1 %v7257_v0  ;;  %v5525_v40 = vld [vmem:[#allocation5 + $0x30] sm:$0xff]  ;;  %v101_v42 = vld [vmem:[%s7245_s0 + $0x38] sm:$0xff]  ;;  %v5534_v43 = vld [vmem:[#allocation5 + $0x20] sm:$0xff] }
  0x41   :  { %478 = vmatpush1.msra.mxu0 %v5434_v17  ;;  %4316 = vmatmul.mubr.msk.f32.vlgmr.msra.gmra.mxu1 %vm122_vm1, %v95_v8  ;;  %7341 = vst [vmem:[#allocation19_spill] sm:$0xff] %v5525_v40  ;;  %7342 = vst [vmem:[#allocation20_spill] sm:$0xff] %v5534_v43  ;;  %v5537_v44 = vld [vmem:[#allocation5 + $0x18] sm:$0xff]  ;;  %v5541_v45 = vld [vmem:[#allocation5 + $0x8] sm:$0xff] }
  0x42   :  { %3944 = vmatmul.mubr.msk.f32.gmra.mxu0 %vm122_vm1, %v5441_v18  ;;  %479 = vmatprep.subr.mxu0 %v5443_v19  ;;  %7343 = vst [vmem:[#allocation21_spill] sm:$0xff] %v5537_v44  ;;  %7344 = vst [vmem:[#allocation22_spill] sm:$0xff] %v5541_v45  ;;  %v5546_v46 = vld [vmem:[#allocation5] sm:$0xff]  ;;  %v5548_v47 = vld [vmem:[#allocation5 + $0x130] sm:$0xff] }
  0x43   :  { %480 = vmatpush1.msra.mxu0 %v5446_v20  ;;  %245 = vmatprep.mubr.f32.mxu0 %v7257_v0  ;;  %7345 = vst [vmem:[#allocation23_spill] sm:$0xff] %v5546_v46  ;;  %v5554_v48 = vld [vmem:[#allocation5 + $0x118] sm:$0xff]  ;;  %v5560_v49 = vld [vmem:[#allocation5 + $0x100] sm:$0xff]  ;;  %v5566_v50 = vld [vmem:[#allocation5 + $0xe8] sm:$0xff] }
  0x44   :  { %481 = vmatprep.subr.mxu0 %v5452_v22  ;;  %4328 = vmatpush3.msra.mxu1 %v5482_v29  ;;  %v5574_v51 = vld [vmem:[#allocation5 + $0xd0] sm:$0xff]  ;;  %v5580_v52 = vld [vmem:[#allocation5 + $0xb8] sm:$0xff]  ;;  %v5587_v53 = vld [vmem:[#allocation5 + $0xa0] sm:$0xff] }
  0x45   :  { %482 = vmatpush1.msra.mxu0 %v5458_v23  ;;  %4329 = vmatprep.subr.mxu1 %v7257_v0  ;;  %v5593_v54 = vld [vmem:[#allocation5 + $0x88] sm:$0xff]  ;;  %v5600_v55 = vld [vmem:[#allocation5 + $0x70] sm:$0xff]  ;;  %v5606_v56 = vld [vmem:[#allocation5 + $0x58] sm:$0xff] }
  0x46   :  { %3945 = vmatmul.mubr.msk.f32.gmra.mxu0 %vm122_vm1, %v5465_v24  ;;  %483 = vmatprep.subr.mxu0 %v5467_v25  ;;  %v5612_v57 = vld [vmem:[#allocation5 + $0x40] sm:$0xff]  ;;  %v5618_v58 = vld [vmem:[#allocation5 + $0x28] sm:$0xff]  ;;  %v5624_v59 = vld [vmem:[#allocation5 + $0x10] sm:$0xff] }
  0x47   :  { %484 = vmatpush1.msra.mxu0 %v5470_v26  ;;  %251 = vmatprep.mubr.f32.mxu0 %v7257_v0  ;;  %7346 = vst [vmem:[#allocation24_spill] sm:$0xff] %v5612_v57  ;;  %7347 = vst [vmem:[#allocation25_spill] sm:$0xff] %v5618_v58  ;;  %v105_v63 = vld [vmem:[%s7248_s3] sm:$0x7] }
  0x48   :  { %485 = vmatprep.subr.mxu0 %v5474_v27  ;;  %4330 = vmatpush3.msra.mxu1 %v5506_v35  ;;  %7348 = vst [vmem:[#allocation26_spill] sm:$0xff] %v5624_v59  ;;  %v110_v8 = vrot.slane %v105_v63, %v5687_v62 }
  0x49   :  { %486 = vmatpush1.msra.mxu0 %v5480_v28  ;;  %4331 = vmatprep.subr.mxu1 %v7257_v0 }
  0x4a   :  { %3946 = vmatmul.mubr.msk.f32.gmra.mxu0 %vm122_vm1, %v5489_v30  ;;  %487 = vmatprep.subr.mxu0 %v5491_v31 }
  0x4b   :  { %488 = vmatpush1.msra.mxu0 %v5494_v32  ;;  %257 = vmatprep.mubr.f32.mxu0 %v7257_v0 }
  0x4c   :  { %489 = vmatprep.subr.mxu0 %v5498_v33  ;;  %4332 = vmatpush3.msra.mxu1 %v5527_v41 }
  0x4d   :  { %490 = vmatpush1.msra.mxu0 %v5504_v34  ;;  %4333 = vmatprep.subr.mxu1 %v7257_v0 }
  0x4e   :  { %3947 = vmatmul.mubr.msk.f32.gmra.mxu0 %vm122_vm1, %v100_v36  ;;  %491 = vmatprep.subr.mxu0 %v5513_v37 }
  0x4f   :  { %492 = vmatpush1.msra.mxu0 %v5516_v38  ;;  %263 = vmatprep.mubr.f32.mxu0 %v7257_v0 }
  0x50   :  { %493 = vmatprep.subr.mxu0 %v5520_v39  ;;  %4334 = vmatpush3.msra.mxu1 %v5548_v47 }
  0x51   :  { %494 = vmatpush1.msra.mxu0 %v5525_v40  ;;  %4335 = vmatprep.subr.mxu1 %v7257_v0 }
  0x52   :  { %3948 = vmatmul.mubr.msk.f32.gmra.mxu0 %vm122_vm1, %v101_v42  ;;  %495 = vmatprep.subr.mxu0 %v5534_v43 }
  0x53   :  { %496 = vmatpush1.msra.mxu0 %v5537_v44  ;;  %531 = vmatprep.mubr.f32.mxu0 %v7257_v0 }
  0x54   :  { %497 = vmatprep.subr.mxu0 %v5541_v45  ;;  %4336 = vmatpush3.msra.mxu1 %v5554_v48 }
  0x55   :  { %498 = vmatpush1.msra.mxu0 %v5546_v46  ;;  %4318 = vmatprep.mubr.msk.f32.mxu1 %vm122_vm1, %v5421_v13 }
  0x56   :  { %532 = vmatmul.mubr.f32.vlgmr.msra.gmra.mxu0 %v7257_v0  ;;  %4337 = vmatprep.subr.mxu1 %v7257_v0 }
  0x57   :  { %4319 = vmatmul.mubr.msk.f32.gmra.mxu1 %vm122_vm1, %v5441_v18  ;;  %681 = vmatprep.subr.mxu0 %v5387_v4  ;;  %v114_v18 = vrot.slane %v105_v63, %v5692_v2 }
  0x58   :  { %4338 = vmatpush3.msra.mxu1 %v5560_v49  ;;  %4321 = vmatprep.mubr.msk.f32.mxu1 %vm122_vm1, %v5465_v24 }
  0x59   :  { %4339 = vmatprep.subr.mxu1 %v7257_v0  ;;  %682 = vmatpush1.msra.mxu0 %v5389_v5 }
  0x5a   :  { %4340 = vmatpush3.msra.mxu1 %v5566_v50  ;;  %683 = vmatprep.subr.mxu0 %v5393_v6 }
  0x5b   :  { %4341 = vmatprep.subr.mxu1 %v7257_v0  ;;  %4322 = vmatmul.mubr.msk.f32.gmra.mxu1 %vm122_vm1, %v5489_v30 }
  0x5c   :  { %4342 = vmatpush3.msra.mxu1 %v5574_v51  ;;  %4324 = vmatprep.mubr.msk.f32.mxu1 %vm122_vm1, %v100_v36 }
  0x5d   :  { %4343 = vmatprep.subr.mxu1 %v7257_v0  ;;  %684 = vmatpush1.msra.mxu0 %v5397_v7 }
  0x5e   :  { %4344 = vmatpush3.msra.mxu1 %v5580_v52  ;;  %685 = vmatprep.subr.mxu0 %v5404_v9 }
  0x5f   :  { %4345 = vmatprep.subr.mxu1 %v7257_v0  ;;  %4325 = vmatmul.mubr.msk.f32.gmra.mxu1 %vm122_vm1, %v101_v42 }
  0x60   :  { %4346 = vmatpush3.msra.mxu1 %v5587_v53  ;;  %4359 = vmatprep.mubr.msk.f32.mxu1 %vm5302_vm2, %v7257_v0 }
  0x61   :  { %4347 = vmatprep.subr.mxu1 %v7257_v0  ;;  %686 = vmatpush1.msra.mxu0 %v5407_v10 }
  0x62   :  { %4348 = vmatpush3.msra.mxu1 %v5593_v54  ;;  %687 = vmatprep.subr.mxu0 %v5410_v11 }
  0x63   :  { %4349 = vmatprep.subr.mxu1 %v7257_v0  ;;  %688 = vmatpush1.msra.mxu0 %v5414_v12 }
  0x64   :  { %4350 = vmatpush3.msra.mxu1 %v5600_v55  ;;  %689 = vmatprep.subr.mxu0 %v5423_v14 }
  0x65   :  { %4351 = vmatprep.subr.mxu1 %v7257_v0  ;;  %690 = vmatpush1.msra.mxu0 %v5426_v15 }
  0x66   :  { %4352 = vmatpush3.msra.mxu1 %v5606_v56  ;;  %691 = vmatprep.subr.mxu0 %v5429_v16 }
  0x67   :  { %4353 = vmatprep.subr.mxu1 %v7257_v0  ;;  %692 = vmatpush1.msra.mxu0 %v5434_v17 }
  0x68   :  { %4354 = vmatpush3.msra.mxu1 %v5612_v57  ;;  %693 = vmatprep.subr.mxu0 %v5443_v19 }
  0x69   :  { %4355 = vmatprep.subr.mxu1 %v7257_v0  ;;  %694 = vmatpush1.msra.mxu0 %v5446_v20 }
  0x6a   :  { %4356 = vmatpush3.msra.mxu1 %v5618_v58  ;;  %695 = vmatprep.subr.mxu0 %v5452_v22 }
  0x6b   :  { %4357 = vmatprep.subr.mxu1 %v7257_v0  ;;  %696 = vmatpush1.msra.mxu0 %v5458_v23 }
  0x6c   :  { %4358 = vmatpush3.msra.mxu1 %v5624_v59  ;;  %697 = vmatprep.subr.mxu0 %v5467_v25 }
  0x6d   :  { %4360 = vmatmul.mubr.f32.vlgmr.msra.gmra.mxu1 %v7257_v0  ;;  %4362 = vmatprep.subr.mxu1 %v7257_v0 }
  0x6e   :  { %4363 = vmatpush3.msra.mxu1 %v5482_v29  ;;  %698 = vmatpush1.msra.mxu0 %v5470_v26 }
  0x6f   :  { %4364 = vmatprep.subr.mxu1 %v7257_v0  ;;  %699 = vmatprep.subr.mxu0 %v5474_v27 }
  0x70   :  { %4365 = vmatpush3.msra.mxu1 %v5506_v35  ;;  %700 = vmatpush1.msra.mxu0 %v5480_v28 }
  0x71   :  { %4366 = vmatprep.subr.mxu1 %v7257_v0  ;;  %701 = vmatprep.subr.mxu0 %v5491_v31 }
  0x72   :  { %4367 = vmatpush3.msra.mxu1 %v5527_v41  ;;  %702 = vmatpush1.msra.mxu0 %v5494_v32 }
  0x73   :  { %4368 = vmatprep.subr.mxu1 %v7257_v0  ;;  %703 = vmatprep.subr.mxu0 %v5498_v33 }
  0x74   :  { %4369 = vmatpush3.msra.mxu1 %v5548_v47  ;;  %704 = vmatpush1.msra.mxu0 %v5504_v34 }
  0x75   :  { %4370 = vmatprep.subr.mxu1 %v7257_v0  ;;  %705 = vmatprep.subr.mxu0 %v5513_v37 }
  0x76   :  { %4371 = vmatpush3.msra.mxu1 %v5554_v48  ;;  %706 = vmatpush1.msra.mxu0 %v5516_v38 }
  0x77   :  { %4372 = vmatprep.subr.mxu1 %v7257_v0  ;;  %707 = vmatprep.subr.mxu0 %v5520_v39 }
  0x78   :  { %4373 = vmatpush3.msra.mxu1 %v5560_v49  ;;  %708 = vmatpush1.msra.mxu0 %v5525_v40 }
  0x79   :  { %4374 = vmatprep.subr.mxu1 %v7257_v0  ;;  %709 = vmatprep.subr.mxu0 %v5534_v43 }
  0x7a   :  { %4375 = vmatpush3.msra.mxu1 %v5566_v50  ;;  %710 = vmatpush1.msra.mxu0 %v5537_v44 }
  0x7b   :  { %4376 = vmatprep.subr.mxu1 %v7257_v0  ;;  %711 = vmatprep.subr.mxu0 %v5541_v45 }
  0x7c   :  { %4377 = vmatpush3.msra.mxu1 %v5574_v51  ;;  %712 = vmatpush1.msra.mxu0 %v5546_v46 }
  0x7d   :  { %4378 = vmatprep.subr.mxu1 %v7257_v0  ;;  %745 = vmatprep.mubr.f32.mxu0 %v7257_v0 }
  0x7e   :  { %4379 = vmatpush3.msra.mxu1 %v5580_v52  ;;  %4394 = vmatprep.mubr.msk.f32.mxu1 %vm5302_vm2, %v7257_v0 }
  0x7f   :  { %4380 = vmatprep.subr.mxu1 %v7257_v0  ;;  %895 = vmatprep.subr.mxu0 %v5387_v4  ;;  %v5704_v4 = vsub.s32 2, %v108_v61 }
  0x80   :  { %4381 = vmatpush3.msra.mxu1 %v5587_v53 }
  0x81   :  { %4382 = vmatprep.subr.mxu1 %v7257_v0  ;;  %7355 = vst [vmem:[#allocation33_spill] sm:$0xff] %v5704_v4 }
  0x82   :  { %4383 = vmatpush3.msra.mxu1 %v5593_v54 }
  0x83   :  { %4384 = vmatprep.subr.mxu1 %v7257_v0 }
  0x84   :  { %4385 = vmatpush3.msra.mxu1 %v5600_v55 }
  0x85   :  { %4386 = vmatprep.subr.mxu1 %v7257_v0 }
  0x86   :  { %4387 = vmatpush3.msra.mxu1 %v5606_v56 }
  0x87   :  { %4388 = vmatprep.subr.mxu1 %v7257_v0 }
  0x88   :  { %4389 = vmatpush3.msra.mxu1 %v5612_v57 }
  0x89   :  { %4390 = vmatprep.subr.mxu1 %v7257_v0 }
  0x8a   :  { %4391 = vmatpush3.msra.mxu1 %v5618_v58 }
  0x8b   :  { %4392 = vmatprep.subr.mxu1 %v7257_v0 }
  0x8c   :  { %4393 = vmatpush3.msra.mxu1 %v5624_v59 }
  0x8d   :  { %4397 = vmatprep.subr.mxu1 %v7257_v0 }
  0xf5   :  { %v223_v1 = vpop.f32.mrf.mxu0 }
  0xf7   :  { %v225_v3 = vpop.f32.mrf.mxu0 }
  0xfa   :  { %v229_v13 = vpop.f32.mrf.mxu0 }
  0xfb   :  { %v5696_v21 = vadd.f32 %v229_v13, %v110_v8  ;;  %v118_v13 = vrot.slane %v105_v63, %v5704_v4  ;;  %v399_v63 = vld [vmem:[%s7249_s4] sm:$0x7] }
  0xfc   :  { %v231_v24 = vpop.f32.mrf.mxu0 }
  0xfd   :  { %7351 = vst [vmem:[#allocation29_spill] sm:$0xff] %v5696_v21  ;;  %v5698_v30 = vadd.f32 %v231_v24, %v114_v18 }
  0xfe   :  { %v235_v36 = vpop.f32.mrf.mxu0 }
  0xff   :  { %7352 = vst [vmem:[#allocation30_spill] sm:$0xff] %v5698_v30  ;;  %v5700_v42 = vadd.f32 %v235_v36, %v110_v8 }
 0x100   :  { %v237_v60 = vpop.f32.mrf.mxu0 }
 0x101   :  { %7353 = vst [vmem:[#allocation31_spill] sm:$0xff] %v5700_v42  ;;  %v5702_v0 = vadd.f32 %v237_v60, %v114_v18  ;;  %v4317_v30 = vpop.f32.mrf.mxu1 }
 0x102   :  { %v241_v59 = vpop.f32.mrf.mxu0  ;;  %v5715_v42 = vadd.f32 %v4317_v30, %v118_v13  ;;  %v5731_v30 = vrot.slane %v399_v63, %v5687_v62 }
 0x103   :  { %7354 = vst [vmem:[#allocation32_spill] sm:$0xff] %v5702_v0  ;;  %v5706_v46 = vadd.f32 %v241_v59, %v110_v8 }
 0x104   :  { %v243_v45 = vpop.f32.mrf.mxu0  ;;  %7360 = vst [vmem:[#allocation38_spill] sm:$0xff] %v5715_v42  ;;  %7366 = vst [vmem:[#allocation44_spill] sm:$0xff] %v5731_v30 }
 0x105   :  { %7356 = vst [vmem:[#allocation34_spill] sm:$0xff] %v5706_v46  ;;  %v5708_v58 = vadd.f32 %v243_v45, %v114_v18 }
 0x106   :  { %v247_v21 = vpop.f32.mrf.mxu0 }
 0x107   :  { %7357 = vst [vmem:[#allocation35_spill] sm:$0xff] %v5708_v58  ;;  %v5711_v44 = vadd.f32 %v247_v21, %v110_v8 }
 0x108   :  { %v249_v24 = vpop.f32.mrf.mxu0 }
 0x109   :  { %7358 = vst [vmem:[#allocation36_spill] sm:$0xff] %v5711_v44  ;;  %v5713_v36 = vadd.f32 %v249_v24, %v114_v18  ;;  %v5737_v44 = vrot.slane %v399_v63, %v5692_v2 }
 0x10a   :  { %v253_v60 = vpop.f32.mrf.mxu0 }
 0x10b   :  { %7359 = vst [vmem:[#allocation37_spill] sm:$0xff] %v5713_v36  ;;  %v5717_v61 = vadd.f32 %v253_v60, %v110_v8 }
 0x10c   :  { %v255_v0 = vpop.f32.mrf.mxu0 }
 0x10d   :  { %7361 = vst [vmem:[#allocation39_spill] sm:$0xff] %v5717_v61  ;;  %v5719_v59 = vadd.f32 %v255_v0, %v114_v18 }
 0x10e   :  { %v259_v46 = vpop.f32.mrf.mxu0 }
 0x10f   :  { %7362 = vst [vmem:[#allocation40_spill] sm:$0xff] %v5719_v59  ;;  %v5721_v45 = vadd.f32 %v259_v46, %v110_v8  ;;  %v336_v59 = vpop.f32.mrf.mxu1  ;;  %v224_v46 = vadd.f32 %v223_v1, %v110_v8 }
 0x110   :  { %v261_v58 = vpop.f32.mrf.mxu0 }
 0x111   :  { %7363 = vst [vmem:[#allocation41_spill] sm:$0xff] %v5721_v45  ;;  %v5726_v21 = vadd.f32 %v261_v58, %v114_v18 }
 0x112   :  { %v265_v24 = vpop.f32.mrf.mxu0 }
 0x113   :  { %7364 = vst [vmem:[#allocation42_spill] sm:$0xff] %v5726_v21  ;;  %v5728_v36 = vadd.f32 %v265_v24, %v110_v8 }
 0x114   :  { %v267_v60 = vpop.f32.mrf.mxu0 }
 0x115   :  { %7365 = vst [vmem:[#allocation43_spill] sm:$0xff] %v5728_v36  ;;  %v5733_v61 = vadd.f32 %v267_v60, %v114_v18 }
 0x116   :  { %v533_v0 = vpop.f32.mrf.mxu0 }
 0x117   :  { %7367 = vst [vmem:[#allocation45_spill] sm:$0xff] %v5733_v61  ;;  %v534_v45 = vadd.f32 %v533_v0, %v5731_v30  ;;  %v4320_v58 = vpop.f32.mrf.mxu1  ;;  %v226_v61 = vadd.f32 %v225_v3, %v114_v18  ;;  %v5753_v18 = vrot.slane %v399_v63, %v5704_v4  ;;  %v7398_v4 = vld [vmem:[#allocation34_spill] sm:$0xff] }
 0x118   :  { %v535_v42 = vpop.f32.mrf.mxu0  ;;  %v5739_v43 = vadd.f32 %v4320_v58, %v118_v13 }
 0x119   :  { %v608_v21 = vadd.f32 %v534_v45, %v224_v46  ;;  %v346_v24 = vpop.f32.mrf.mxu1  ;;  %v536_v62 = vadd.f32 %v535_v42, %v5737_v44 }
 0x11a   :  { %v5742_v57 = vadd.f32 %v346_v24, %v118_v13 }
 0x11b   :  { %v3958_v36 = vmul.f32 -1.442695, %v608_v21  ;;  %v4323_v60 = vpop.f32.mrf.mxu1  ;;  %v615_v0 = vadd.f32 %v536_v62, %v226_v61 }
 0x11c   :  { %v5744_v1 = vadd.f32 %v4323_v60, %v118_v13 }
 0x11d   :  { %4977 = vpow2.f32 %v3958_v36  ;;  %v356_v8 = vpop.f32.mrf.mxu1  ;;  %v3959_v46 = vmul.f32 -1.442695, %v615_v0 }
 0x11e   :  { %7368 = vst [vmem:[#allocation46_spill] sm:$0xff] %v5744_v1  ;;  %v5746_v2 = vadd.f32 %v356_v8, %v118_v13 }
 0x11f   :  { %v4326_v30 = vpop.f32.mrf.mxu1  ;;  %4979 = vpow2.f32 %v3959_v46 }
 0x120   :  { %7369 = vst [vmem:[#allocation47_spill] sm:$0xff] %v5746_v2  ;;  %v5748_v40 = vadd.f32 %v4326_v30, %v118_v13  ;;  %v337_v30 = vadd.f32 %v336_v59, %v118_v13  ;;  %v7399_v2 = vld [vmem:[#allocation35_spill] sm:$0xff] }
 0x121   :  { %v366_v45 = vpop.f32.mrf.mxu1 }
 0x122   :  { %7370 = vst [vmem:[#allocation48_spill] sm:$0xff] %v5748_v40  ;;  %v5750_v58 = vadd.f32 %v366_v45, %v118_v13  ;;  %v7373_v13 = vmov 0.0  }
 0x124   :  { %7371 = vst [vmem:[#allocation49_spill] sm:$0xff] %v5750_v58 }
 0x12a   :  { %v4978_v42 = vpop.eup %4977 }
 0x12b   :  { %v612_v21 = vadd.f32 1.0, %v4978_v42 }
 0x12c   :  { %v4980_v36 = vpop.eup %4979 }
 0x12d   :  { %4981 = vrcp.f32 %v612_v21  ;;  %v604_v24 = vpop.f32.mrf.mxu1  ;;  %v619_v62 = vadd.f32 1.0, %v4980_v36 }
 0x12e   :  { %v605_v61 = vadd.f32 %v604_v24, %v5753_v18 }
 0x12f   :  { %v4361_v3 = vpop.f32.mrf.mxu1  ;;  %4983 = vrcp.f32 %v619_v62 }
 0x130   :  { %v7386_v3 = vld [vmem:[#allocation38_spill] sm:$0xff] }
 0x13a   :  { %v4982_v60 = vpop.eup %4981 }
 0x13b   :  { %v622_v8 = vmul.f32 %v4982_v60, %v605_v61 }
 0x13c   :  { %v4984_v45 = vpop.eup %4983 }
 0x13d   :  { %v623_v0 = vadd.f32 %v622_v8, %v337_v30  ;;  %v625_v46 = vsub.f32 1.0, %v4984_v45  ;;  %v627_v21 = vmul.f32 0.0, %v4984_v45  ;;  %v5915_v45 = vld [vmem:[#allocation5 + $0xb0] sm:$0xff] }
 0x13f   :  { %4985 = vtanh.f32 %v623_v0 }
 0x14c   :  { %v4986_v40 = vpop.eup %4985 }
 0x14d   :  { %v626_v42 = vmul.f32 %v4986_v40, %v625_v46  ;;  %v5917_v46 = vld [vmem:[#allocation5 + $0xa8] sm:$0xff] }
 0x14f   :  { %v5756_v58 = vadd.f32 %v627_v21, %v626_v42  ;;  %v5920_v42 = vld [vmem:[#allocation5 + $0x98] sm:$0xff]  ;;  %v5923_v21 = vld [vmem:[#allocation5 + $0x90] sm:$0xff] }
 0x151   :  { %7372 = vst [vmem:[#allocation50_spill] sm:$0xff] %v5756_v58  ;;  %746 = vmatmul.mubr.f32.vlgmr.msra.gmra.mxu0 %v5756_v58  ;;  %4395 = vmatmul.mubr.f32.vlgmr.msra.gmra.mxu1 %v5756_v58 }
 0x152   :  { %896 = vmatpush1.msra.mxu0 %v5389_v5  ;;  %4398 = vmatpush3.msra.mxu1 %v5482_v29 }
 0x153   :  { %897 = vmatprep.subr.mxu0 %v5393_v6  ;;  %4399 = vmatprep.subr.mxu1 %v7373_v13  ;;  %v7374_v6 = vld [vmem:[#allocation19_spill] sm:$0xff] }
 0x154   :  { %898 = vmatpush1.msra.mxu0 %v5397_v7  ;;  %4400 = vmatpush3.msra.mxu1 %v5506_v35  ;;  %v7375_v7 = vld [vmem:[#allocation24_spill] sm:$0xff] }
 0x155   :  { %899 = vmatprep.subr.mxu0 %v5404_v9  ;;  %4401 = vmatprep.subr.mxu1 %v7373_v13  ;;  %v7376_v9 = vld [vmem:[#allocation20_spill] sm:$0xff] }
 0x156   :  { %900 = vmatpush1.msra.mxu0 %v5407_v10  ;;  %4402 = vmatpush3.msra.mxu1 %v5527_v41  ;;  %v7377_v10 = vld [vmem:[#allocation21_spill] sm:$0xff] }
 0x157   :  { %901 = vmatprep.subr.mxu0 %v5410_v11  ;;  %4403 = vmatprep.subr.mxu1 %v7373_v13  ;;  %v7378_v11 = vld [vmem:[#allocation25_spill] sm:$0xff] }
 0x158   :  { %902 = vmatpush1.msra.mxu0 %v5414_v12  ;;  %4404 = vmatpush3.msra.mxu1 %v5548_v47  ;;  %v7379_v12 = vld [vmem:[#allocation22_spill] sm:$0xff] }
 0x159   :  { %903 = vmatprep.subr.mxu0 %v5423_v14  ;;  %4405 = vmatprep.subr.mxu1 %v7373_v13  ;;  %v7380_v14 = vld [vmem:[#allocation23_spill] sm:$0xff] }
 0x15a   :  { %904 = vmatpush1.msra.mxu0 %v5426_v15  ;;  %4406 = vmatpush3.msra.mxu1 %v5554_v48  ;;  %v7381_v15 = vld [vmem:[#allocation26_spill] sm:$0xff] }
 0x15b   :  { %905 = vmatprep.subr.mxu0 %v5429_v16  ;;  %4407 = vmatprep.subr.mxu1 %v7373_v13  ;;  %v7382_v16 = vld [vmem:[#allocation18_spill] sm:$0xff] }
 0x15c   :  { %906 = vmatpush1.msra.mxu0 %v5434_v17  ;;  %4408 = vmatpush3.msra.mxu1 %v5560_v49 }
 0x15d   :  { %907 = vmatprep.subr.mxu0 %v5443_v19  ;;  %4409 = vmatprep.subr.mxu1 %v7373_v13 }
 0x15e   :  { %908 = vmatpush1.msra.mxu0 %v5446_v20  ;;  %4410 = vmatpush3.msra.mxu1 %v5566_v50  ;;  %v7383_v20 = vld [vmem:[#allocation44_spill] sm:$0xff] }
 0x15f   :  { %909 = vmatprep.subr.mxu0 %v5452_v22  ;;  %4411 = vmatprep.subr.mxu1 %v7373_v13 }
 0x160   :  { %910 = vmatpush1.msra.mxu0 %v5458_v23  ;;  %4412 = vmatpush3.msra.mxu1 %v5574_v51 }
 0x161   :  { %911 = vmatprep.subr.mxu0 %v5467_v25  ;;  %4413 = vmatprep.subr.mxu1 %v7373_v13 }
 0x162   :  { %912 = vmatpush1.msra.mxu0 %v5470_v26  ;;  %4414 = vmatpush3.msra.mxu1 %v5580_v52  ;;  %v7384_v26 = vld [vmem:[#allocation29_spill] sm:$0xff] }
 0x163   :  { %913 = vmatprep.subr.mxu0 %v5474_v27  ;;  %4415 = vmatprep.subr.mxu1 %v7373_v13 }
 0x164   :  { %914 = vmatpush1.msra.mxu0 %v5480_v28  ;;  %4416 = vmatpush3.msra.mxu1 %v5587_v53 }
 0x165   :  { %915 = vmatprep.subr.mxu0 %v5491_v31  ;;  %4417 = vmatprep.subr.mxu1 %v7373_v13 }
 0x166   :  { %916 = vmatpush1.msra.mxu0 %v5494_v32  ;;  %4418 = vmatpush3.msra.mxu1 %v5593_v54  ;;  %v7385_v32 = vld [vmem:[#allocation30_spill] sm:$0xff] }
 0x167   :  { %917 = vmatprep.subr.mxu0 %v5498_v33  ;;  %4419 = vmatprep.subr.mxu1 %v7373_v13 }
 0x168   :  { %918 = vmatpush1.msra.mxu0 %v5504_v34  ;;  %4420 = vmatpush3.msra.mxu1 %v5600_v55 }
 0x169   :  { %919 = vmatprep.subr.mxu0 %v5513_v37  ;;  %4421 = vmatprep.subr.mxu1 %v7373_v13 }
 0x16a   :  { %920 = vmatpush1.msra.mxu0 %v5516_v38  ;;  %4422 = vmatpush3.msra.mxu1 %v5606_v56 }
 0x16b   :  { %921 = vmatprep.subr.mxu0 %v5520_v39  ;;  %4423 = vmatprep.subr.mxu1 %v7373_v13 }
 0x16c   :  { %922 = vmatpush1.msra.mxu0 %v7374_v6  ;;  %4424 = vmatpush3.msra.mxu1 %v7375_v7  ;;  %v5926_v6 = vld [vmem:[#allocation5 + $0x80] sm:$0xff] }
 0x16d   :  { %923 = vmatprep.subr.mxu0 %v7376_v9  ;;  %4425 = vmatprep.subr.mxu1 %v7373_v13  ;;  %v5932_v9 = vld [vmem:[#allocation5 + $0x68] sm:$0xff] }
 0x16e   :  { %924 = vmatpush1.msra.mxu0 %v7377_v10  ;;  %4426 = vmatpush3.msra.mxu1 %v7378_v11  ;;  %v5935_v10 = vld [vmem:[#allocation5 + $0x60] sm:$0xff] }
 0x16f   :  { %925 = vmatprep.subr.mxu0 %v7379_v12  ;;  %4427 = vmatprep.subr.mxu1 %v7373_v13  ;;  %v5941_v12 = vld [vmem:[#allocation5 + $0x48] sm:$0xff] }
 0x170   :  { %926 = vmatpush1.msra.mxu0 %v7380_v14  ;;  %959 = vmatprep.mubr.f32.mxu0 %v7373_v13  ;;  %v5944_v14 = vld [vmem:[#allocation5 + $0x38] sm:$0xff] }
 0x171   :  { %4428 = vmatpush3.msra.mxu1 %v7381_v15  ;;  %4429 = vmatprep.mubr.msk.f32.mxu1 %vm5302_vm2, %v7373_v13 }
 0x172   :  { %1109 = vmatprep.subr.mxu0 %v7382_v16  ;;  %4432 = vmatprep.subr.mxu1 %v7373_v13  ;;  %v5950_v16 = vld [vmem:[#allocation5 + $0x20] sm:$0xff] }
 0x173   :  { %7388 = vst [vmem:[#allocation24_spill] sm:$0xff] %v5950_v16 }
 0x211   :  { %v747_v17 = vpop.f32.mrf.mxu0  ;;  %v818_v19 = vpop.f32.mrf.mxu1 }
 0x212   :  { %v748_v22 = vadd.f32 %v747_v17, %v7383_v20  ;;  %v819_v59 = vadd.f32 %v818_v19, %v5753_v18  ;;  %v5953_v17 = vld [vmem:[#allocation5 + $0x18] sm:$0xff]  ;;  %v5956_v19 = vld [vmem:[#allocation5 + $0x8] sm:$0xff] }
 0x213   :  { %v749_v23 = vpop.f32.mrf.mxu0  ;;  %v4396_v25 = vpop.f32.mrf.mxu1  ;;  %7389 = vst [vmem:[#allocation20_spill] sm:$0xff] %v5953_v17  ;;  %7390 = vst [vmem:[#allocation21_spill] sm:$0xff] %v5956_v19 }
 0x214   :  { %v822_v27 = vadd.f32 %v748_v22, %v7384_v26  ;;  %v750_v31 = vadd.f32 %v749_v23, %v5737_v44  ;;  %v5959_v22 = vld [vmem:[#allocation5] sm:$0xff] }
 0x215   :  { %7391 = vst [vmem:[#allocation25_spill] sm:$0xff] %v5959_v22 }
 0x216   :  { %v3960_v28 = vmul.f32 -1.442695, %v822_v27  ;;  %v829_v33 = vadd.f32 %v750_v31, %v7385_v32  ;;  %v7392_v31 = vld [vmem:[#allocation31_spill] sm:$0xff] }
 0x218   :  { %4987 = vpow2.f32 %v3960_v28  ;;  %v3961_v34 = vmul.f32 -1.442695, %v829_v33 }
 0x21a   :  { %4989 = vpow2.f32 %v3961_v34 }
 0x225   :  { %v4988_v37 = vpop.eup %4987 }
 0x226   :  { %v826_v38 = vadd.f32 1.0, %v4988_v37  ;;  %v7393_v37 = vld [vmem:[#allocation32_spill] sm:$0xff] }
 0x227   :  { %v4990_v39 = vpop.eup %4989 }
 0x228   :  { %4991 = vrcp.f32 %v826_v38  ;;  %v833_v40 = vadd.f32 1.0, %v4990_v39 }
 0x22a   :  { %4993 = vrcp.f32 %v833_v40 }
 0x235   :  { %v4992_v63 = vpop.eup %4991 }
 0x236   :  { %v836_v24 = vmul.f32 %v4992_v63, %v819_v59 }
 0x237   :  { %v4994_v62 = vpop.eup %4993 }
 0x238   :  { %v837_v36 = vadd.f32 %v836_v24, %v7386_v3  ;;  %v839_v61 = vsub.f32 1.0, %v4994_v62  ;;  %v841_v8 = vmul.f32 %v4994_v62, %v5756_v58 }
 0x23a   :  { %4995 = vtanh.f32 %v837_v36 }
 0x247   :  { %v4996_v60 = vpop.eup %4995 }
 0x248   :  { %v840_v30 = vmul.f32 %v4996_v60, %v839_v61 }
 0x24a   :  { %v5834_v0 = vadd.f32 %v841_v8, %v840_v30 }
 0x24c   :  { %7387 = vst [vmem:[#allocation19_spill] sm:$0xff] %v5834_v0  ;;  %960 = vmatmul.mubr.f32.vlgmr.msra.gmra.mxu0 %v5834_v0  ;;  %4430 = vmatmul.mubr.f32.vlgmr.msra.gmra.mxu1 %v5834_v0 }
 0x24d   :  { %1110 = vmatpush1.msra.mxu0 %v5389_v5  ;;  %4433 = vmatpush3.msra.mxu1 %v5482_v29  ;;  %v5874_v5 = vld [vmem:[#allocation5 + $0x158] sm:$0xff]  ;;  %v5877_v29 = vld [vmem:[#allocation5 + $0x150] sm:$0xff] }
 0x24e   :  { %4434 = vmatprep.subr.mxu1 %v7373_v13  ;;  %1173 = vmatprep.mubr.f32.mxu0 %v7373_v13 }
 0x24f   :  { %4435 = vmatpush3.msra.mxu1 %v5506_v35  ;;  %4464 = vmatprep.mubr.msk.f32.mxu1 %vm5302_vm2, %v7373_v13  ;;  %v5880_v35 = vld [vmem:[#allocation5 + $0x140] sm:$0xff] }
 0x250   :  { %4436 = vmatprep.subr.mxu1 %v7373_v13  ;;  %1111 = vmatprep.subr.mxu0 %v5874_v5 }
 0x251   :  { %4437 = vmatpush3.msra.mxu1 %v5527_v41  ;;  %1112 = vmatpush1.msra.mxu0 %v5877_v29  ;;  %v5883_v41 = vld [vmem:[#allocation5 + $0x138] sm:$0xff] }
 0x252   :  { %4438 = vmatprep.subr.mxu1 %v7373_v13  ;;  %1113 = vmatprep.subr.mxu0 %v5880_v35 }
 0x253   :  { %4439 = vmatpush3.msra.mxu1 %v5548_v47  ;;  %1114 = vmatpush1.msra.mxu0 %v5883_v41  ;;  %v5886_v47 = vld [vmem:[#allocation5 + $0x128] sm:$0xff] }
 0x254   :  { %4440 = vmatprep.subr.mxu1 %v7373_v13  ;;  %1115 = vmatprep.subr.mxu0 %v5886_v47 }
 0x255   :  { %4441 = vmatpush3.msra.mxu1 %v5554_v48  ;;  %v5889_v48 = vld [vmem:[#allocation5 + $0x120] sm:$0xff] }
 0x256   :  { %4442 = vmatprep.subr.mxu1 %v7373_v13  ;;  %1116 = vmatpush1.msra.mxu0 %v5889_v48 }
 0x257   :  { %4443 = vmatpush3.msra.mxu1 %v5560_v49  ;;  %v5892_v49 = vld [vmem:[#allocation5 + $0x110] sm:$0xff] }
 0x258   :  { %4444 = vmatprep.subr.mxu1 %v7373_v13  ;;  %1117 = vmatprep.subr.mxu0 %v5892_v49 }
 0x259   :  { %4445 = vmatpush3.msra.mxu1 %v5566_v50  ;;  %v5895_v50 = vld [vmem:[#allocation5 + $0x108] sm:$0xff] }
 0x25a   :  { %4446 = vmatprep.subr.mxu1 %v7373_v13  ;;  %1118 = vmatpush1.msra.mxu0 %v5895_v50 }
 0x25b   :  { %4447 = vmatpush3.msra.mxu1 %v5574_v51  ;;  %v5898_v51 = vld [vmem:[#allocation5 + $0xf8] sm:$0xff] }
 0x25c   :  { %4448 = vmatprep.subr.mxu1 %v7373_v13  ;;  %1119 = vmatprep.subr.mxu0 %v5898_v51 }
 0x25d   :  { %4449 = vmatpush3.msra.mxu1 %v5580_v52  ;;  %v5901_v52 = vld [vmem:[#allocation5 + $0xf0] sm:$0xff] }
 0x25e   :  { %4450 = vmatprep.subr.mxu1 %v7373_v13  ;;  %1120 = vmatpush1.msra.mxu0 %v5901_v52 }
 0x25f   :  { %4451 = vmatpush3.msra.mxu1 %v5587_v53  ;;  %v5904_v53 = vld [vmem:[#allocation5 + $0xe0] sm:$0xff] }
 0x260   :  { %4452 = vmatprep.subr.mxu1 %v7373_v13  ;;  %1121 = vmatprep.subr.mxu0 %v5904_v53 }
 0x261   :  { %4453 = vmatpush3.msra.mxu1 %v5593_v54  ;;  %v5907_v54 = vld [vmem:[#allocation5 + $0xd8] sm:$0xff] }
 0x262   :  { %4454 = vmatprep.subr.mxu1 %v7373_v13  ;;  %1122 = vmatpush1.msra.mxu0 %v5907_v54 }
 0x263   :  { %4455 = vmatpush3.msra.mxu1 %v5600_v55  ;;  %v5910_v55 = vld [vmem:[#allocation5 + $0xc8] sm:$0xff] }
 0x264   :  { %4456 = vmatprep.subr.mxu1 %v7373_v13  ;;  %1123 = vmatprep.subr.mxu0 %v5910_v55 }
 0x265   :  { %4457 = vmatpush3.msra.mxu1 %v5606_v56  ;;  %v5913_v56 = vld [vmem:[#allocation5 + $0xc0] sm:$0xff] }
 0x266   :  { %4458 = vmatprep.subr.mxu1 %v7373_v13  ;;  %1124 = vmatpush1.msra.mxu0 %v5913_v56 }
 0x267   :  { %4459 = vmatpush3.msra.mxu1 %v7375_v7  ;;  %1125 = vmatprep.subr.mxu0 %v5915_v45  ;;  %v5929_v7 = vld [vmem:[#allocation5 + $0x78] sm:$0xff] }
 0x268   :  { %4460 = vmatprep.subr.mxu1 %v7373_v13  ;;  %1126 = vmatpush1.msra.mxu0 %v5917_v46 }
 0x269   :  { %4461 = vmatpush3.msra.mxu1 %v7378_v11  ;;  %1127 = vmatprep.subr.mxu0 %v5920_v42  ;;  %v5938_v11 = vld [vmem:[#allocation5 + $0x50] sm:$0xff] }
 0x26a   :  { %4462 = vmatprep.subr.mxu1 %v7373_v13  ;;  %1128 = vmatpush1.msra.mxu0 %v5923_v21 }
 0x26b   :  { %4463 = vmatpush3.msra.mxu1 %v7381_v15  ;;  %1129 = vmatprep.subr.mxu0 %v5926_v6  ;;  %v5947_v15 = vld [vmem:[#allocation5 + $0x30] sm:$0xff] }
 0x26c   :  { %4467 = vmatprep.subr.mxu1 %v7373_v13  ;;  %1130 = vmatpush1.msra.mxu0 %v5929_v7 }
 0x26d   :  { %1131 = vmatprep.subr.mxu0 %v5932_v9 }
 0x26e   :  { %1132 = vmatpush1.msra.mxu0 %v5935_v10 }
 0x26f   :  { %1133 = vmatprep.subr.mxu0 %v5938_v11 }
 0x270   :  { %1134 = vmatpush1.msra.mxu0 %v5941_v12 }
 0x271   :  { %1135 = vmatprep.subr.mxu0 %v5944_v14 }
 0x272   :  { %1136 = vmatpush1.msra.mxu0 %v5947_v15 }
 0x273   :  { %1137 = vmatprep.subr.mxu0 %v5950_v16 }
 0x274   :  { %1138 = vmatpush1.msra.mxu0 %v5953_v17 }
 0x275   :  { %1139 = vmatprep.subr.mxu0 %v5956_v19 }
 0x276   :  { %1140 = vmatpush1.msra.mxu0 %v5959_v22 }
 0x30c   :  { %v961_v23 = vpop.f32.mrf.mxu0  ;;  %v1032_v25 = vpop.f32.mrf.mxu1 }
 0x30d   :  { %v962_v26 = vadd.f32 %v961_v23, %v7383_v20  ;;  %v1033_v3 = vadd.f32 %v1032_v25, %v5753_v18  ;;  %v5978_v25 = vld [vmem:[#allocation5 + $0x170] sm:$0xff] }
 0x30e   :  { %v963_v27 = vpop.f32.mrf.mxu0  ;;  %v4431_v28 = vpop.f32.mrf.mxu1  ;;  %7395 = vst [vmem:[#allocation23_spill] sm:$0xff] %v5978_v25  ;;  %1323 = vmatprep.subr.mxu0 %v5978_v25 }
 0x30f   :  { %v1036_v32 = vadd.f32 %v962_v26, %v7392_v31  ;;  %v964_v34 = vadd.f32 %v963_v27, %v5737_v44  ;;  %v5983_v28 = vld [vmem:[#allocation5 + $0x178] sm:$0xff]  ;;  %v5989_v31 = vld [vmem:[#allocation5 + $0x160] sm:$0xff] }
 0x311   :  { %v3962_v33 = vmul.f32 -1.442695, %v1036_v32  ;;  %v1043_v38 = vadd.f32 %v964_v34, %v7393_v37  ;;  %v5995_v32 = vld [vmem:[#allocation5 + $0x148] sm:$0xff]  ;;  %v6007_v34 = vld [vmem:[#allocation5 + $0x118] sm:$0xff]  ;;  %v6013_v37 = vld [vmem:[#allocation5 + $0x100] sm:$0xff] }
 0x313   :  { %4997 = vpow2.f32 %v3962_v33  ;;  %v3963_v39 = vmul.f32 -1.442695, %v1043_v38  ;;  %v6001_v33 = vld [vmem:[#allocation5 + $0x130] sm:$0xff]  ;;  %v6019_v38 = vld [vmem:[#allocation5 + $0xe8] sm:$0xff] }
 0x315   :  { %4999 = vpow2.f32 %v3963_v39  ;;  %v6025_v39 = vld [vmem:[#allocation5 + $0xd0] sm:$0xff] }
 0x320   :  { %v4998_v40 = vpop.eup %4997 }
 0x321   :  { %v1040_v59 = vadd.f32 1.0, %v4998_v40  ;;  %v6027_v40 = vld [vmem:[#allocation5 + $0xb8] sm:$0xff] }
 0x322   :  { %v5000_v63 = vpop.eup %4999 }
 0x323   :  { %5001 = vrcp.f32 %v1040_v59  ;;  %v1047_v24 = vadd.f32 1.0, %v5000_v63  ;;  %v6033_v59 = vld [vmem:[#allocation5 + $0xa0] sm:$0xff]  ;;  %v6039_v63 = vld [vmem:[#allocation5 + $0x88] sm:$0xff] }
 0x325   :  { %5003 = vrcp.f32 %v1047_v24  ;;  %v6045_v24 = vld [vmem:[#allocation5 + $0x70] sm:$0xff] }
 0x330   :  { %v5002_v36 = vpop.eup %5001 }
 0x331   :  { %v1050_v62 = vmul.f32 %v5002_v36, %v1033_v3  ;;  %v6051_v3 = vld [vmem:[#allocation5 + $0x58] sm:$0xff]  ;;  %v6057_v36 = vld [vmem:[#allocation5 + $0x40] sm:$0xff] }
 0x332   :  { %v5004_v60 = vpop.eup %5003 }
 0x333   :  { %v1051_v61 = vadd.f32 %v1050_v62, %v5742_v57  ;;  %v1053_v30 = vsub.f32 1.0, %v5004_v60  ;;  %v1055_v26 = vmul.f32 %v5004_v60, %v5834_v0  ;;  %v5981_v57 = vld [vmem:[#allocation5 + $0x168] sm:$0xff] }
 0x334   :  { %v6063_v62 = vld [vmem:[#allocation5 + $0x28] sm:$0xff] }
 0x335   :  { %5005 = vtanh.f32 %v1051_v61  ;;  %7396 = vst [vmem:[#allocation26_spill] sm:$0xff] %v6063_v62  ;;  %v6069_v61 = vld [vmem:[#allocation5 + $0x10] sm:$0xff] }
 0x336   :  { %7397 = vst [vmem:[#allocation18_spill] sm:$0xff] %v6069_v61 }
 0x342   :  { %v5006_v8 = vpop.eup %5005 }
 0x343   :  { %v1054_v23 = vmul.f32 %v5006_v8, %v1053_v30 }
 0x345   :  { %v5971_v27 = vadd.f32 %v1055_v26, %v1054_v23 }
 0x347   :  { %7394 = vst [vmem:[#allocation22_spill] sm:$0xff] %v5971_v27  ;;  %1174 = vmatmul.mubr.f32.vlgmr.msra.gmra.mxu0 %v5971_v27  ;;  %4465 = vmatmul.mubr.f32.vlgmr.msra.gmra.mxu1 %v5971_v27 }
 0x348   :  { %1387 = vmatprep.mubr.f32.mxu0 %v7373_v13  ;;  %4499 = vmatprep.mubr.msk.f32.mxu1 %vm5302_vm2, %v7373_v13 }
 0x349   :  { %1324 = vmatpush1.msra.mxu0 %v5981_v57  ;;  %4468 = vmatpush3.msra.mxu1 %v5983_v28 }
 0x34a   :  { %1325 = vmatprep.subr.mxu0 %v5874_v5  ;;  %4469 = vmatprep.subr.mxu1 %v7373_v13 }
 0x34b   :  { %1326 = vmatpush1.msra.mxu0 %v5877_v29  ;;  %4470 = vmatpush3.msra.mxu1 %v5989_v31 }
 0x34c   :  { %1327 = vmatprep.subr.mxu0 %v5880_v35  ;;  %4471 = vmatprep.subr.mxu1 %v7373_v13 }
 0x34d   :  { %1328 = vmatpush1.msra.mxu0 %v5883_v41  ;;  %4472 = vmatpush3.msra.mxu1 %v5995_v32 }
 0x34e   :  { %1329 = vmatprep.subr.mxu0 %v5886_v47  ;;  %4473 = vmatprep.subr.mxu1 %v7373_v13 }
 0x34f   :  { %1330 = vmatpush1.msra.mxu0 %v5889_v48  ;;  %4474 = vmatpush3.msra.mxu1 %v6001_v33 }
 0x350   :  { %1331 = vmatprep.subr.mxu0 %v5892_v49  ;;  %4475 = vmatprep.subr.mxu1 %v7373_v13 }
 0x351   :  { %1332 = vmatpush1.msra.mxu0 %v5895_v50  ;;  %4476 = vmatpush3.msra.mxu1 %v6007_v34 }
 0x352   :  { %1333 = vmatprep.subr.mxu0 %v5898_v51  ;;  %4477 = vmatprep.subr.mxu1 %v7373_v13 }
 0x353   :  { %1334 = vmatpush1.msra.mxu0 %v5901_v52  ;;  %4478 = vmatpush3.msra.mxu1 %v6013_v37 }
 0x354   :  { %1335 = vmatprep.subr.mxu0 %v5904_v53  ;;  %4479 = vmatprep.subr.mxu1 %v7373_v13 }
 0x355   :  { %1336 = vmatpush1.msra.mxu0 %v5907_v54  ;;  %4480 = vmatpush3.msra.mxu1 %v6019_v38 }
 0x356   :  { %1337 = vmatprep.subr.mxu0 %v5910_v55  ;;  %4481 = vmatprep.subr.mxu1 %v7373_v13 }
 0x357   :  { %1338 = vmatpush1.msra.mxu0 %v5913_v56  ;;  %4482 = vmatpush3.msra.mxu1 %v6025_v39 }
 0x358   :  { %1339 = vmatprep.subr.mxu0 %v5915_v45  ;;  %4483 = vmatprep.subr.mxu1 %v7373_v13 }
 0x359   :  { %1340 = vmatpush1.msra.mxu0 %v5917_v46  ;;  %4484 = vmatpush3.msra.mxu1 %v6027_v40 }
 0x35a   :  { %1341 = vmatprep.subr.mxu0 %v5920_v42  ;;  %4485 = vmatprep.subr.mxu1 %v7373_v13 }
 0x35b   :  { %1342 = vmatpush1.msra.mxu0 %v5923_v21  ;;  %4486 = vmatpush3.msra.mxu1 %v6033_v59 }
 0x35c   :  { %1343 = vmatprep.subr.mxu0 %v5926_v6  ;;  %4487 = vmatprep.subr.mxu1 %v7373_v13 }
 0x35d   :  { %1344 = vmatpush1.msra.mxu0 %v5929_v7  ;;  %4488 = vmatpush3.msra.mxu1 %v6039_v63 }
 0x35e   :  { %1345 = vmatprep.subr.mxu0 %v5932_v9  ;;  %4489 = vmatprep.subr.mxu1 %v7373_v13 }
 0x35f   :  { %1346 = vmatpush1.msra.mxu0 %v5935_v10  ;;  %4490 = vmatpush3.msra.mxu1 %v6045_v24 }
 0x360   :  { %1347 = vmatprep.subr.mxu0 %v5938_v11  ;;  %4491 = vmatprep.subr.mxu1 %v7373_v13 }
 0x361   :  { %1348 = vmatpush1.msra.mxu0 %v5941_v12  ;;  %4492 = vmatpush3.msra.mxu1 %v6051_v3 }
 0x362   :  { %1349 = vmatprep.subr.mxu0 %v5944_v14  ;;  %4493 = vmatprep.subr.mxu1 %v7373_v13 }
 0x363   :  { %1350 = vmatpush1.msra.mxu0 %v5947_v15  ;;  %4494 = vmatpush3.msra.mxu1 %v6057_v36 }
 0x364   :  { %1351 = vmatprep.subr.mxu0 %v5950_v16  ;;  %4495 = vmatprep.subr.mxu1 %v7373_v13 }
 0x365   :  { %1352 = vmatpush1.msra.mxu0 %v5953_v17  ;;  %4496 = vmatpush3.msra.mxu1 %v6063_v62 }
 0x366   :  { %1353 = vmatprep.subr.mxu0 %v5956_v19  ;;  %4497 = vmatprep.subr.mxu1 %v7373_v13 }
 0x367   :  { %1354 = vmatpush1.msra.mxu0 %v5959_v22  ;;  %4498 = vmatpush3.msra.mxu1 %v6069_v61 }
 0x368   :  { %1537 = vmatprep.subr.mxu0 %v5978_v25  ;;  %4502 = vmatprep.subr.mxu1 %v7373_v13 }
 0x407   :  { %v1175_v60 = vpop.f32.mrf.mxu0  ;;  %v1246_v30 = vpop.f32.mrf.mxu1 }
 0x408   :  { %v1176_v8 = vadd.f32 %v1175_v60, %v7383_v20  ;;  %v1247_v16 = vadd.f32 %v1246_v30, %v5753_v18  ;;  %v7407_v30 = vld [vmem:[#allocation44_spill] sm:$0xff] }
 0x409   :  { %v1177_v23 = vpop.f32.mrf.mxu0  ;;  %v4466_v26 = vpop.f32.mrf.mxu1 }
 0x40a   :  { %v1250_v0 = vadd.f32 %v1176_v8, %v7398_v4  ;;  %v1178_v1 = vadd.f32 %v1177_v23, %v5737_v44 }
 0x40c   :  { %v3964_v58 = vmul.f32 -1.442695, %v1250_v0  ;;  %v1257_v22 = vadd.f32 %v1178_v1, %v7399_v2 }
 0x40e   :  { %5007 = vpow2.f32 %v3964_v58  ;;  %v3965_v19 = vmul.f32 -1.442695, %v1257_v22  ;;  %v7405_v22 = vld [vmem:[#allocation18_spill] sm:$0xff] }
 0x410   :  { %5009 = vpow2.f32 %v3965_v19  ;;  %v7404_v19 = vld [vmem:[#allocation25_spill] sm:$0xff] }
 0x41b   :  { %v5008_v61 = vpop.eup %5007 }
 0x41c   :  { %v1254_v25 = vadd.f32 1.0, %v5008_v61 }
 0x41d   :  { %v5010_v62 = vpop.eup %5009 }
 0x41e   :  { %5011 = vrcp.f32 %v1254_v25  ;;  %v1261_v17 = vadd.f32 1.0, %v5010_v62  ;;  %v7406_v25 = vld [vmem:[#allocation23_spill] sm:$0xff] }
 0x420   :  { %5013 = vrcp.f32 %v1261_v17  ;;  %v7403_v17 = vld [vmem:[#allocation21_spill] sm:$0xff] }
 0x42b   :  { %v5012_v60 = vpop.eup %5011 }
 0x42c   :  { %v1264_v20 = vmul.f32 %v5012_v60, %v1247_v16  ;;  %v7402_v16 = vld [vmem:[#allocation26_spill] sm:$0xff] }
 0x42d   :  { %v5014_v0 = vpop.eup %5013 }
 0x42e   :  { %v1265_v4 = vadd.f32 %v1264_v20, %v5739_v43  ;;  %v1267_v8 = vsub.f32 1.0, %v5014_v0  ;;  %v1269_v2 = vmul.f32 %v5014_v0, %v5971_v27  ;;  %v7400_v43 = vld [vmem:[#allocation24_spill] sm:$0xff] }
 0x42f   :  { %v7401_v20 = vld [vmem:[#allocation20_spill] sm:$0xff] }
 0x430   :  { %5015 = vtanh.f32 %v1265_v4  ;;  %v7408_v0 = vld [vmem:[#allocation36_spill] sm:$0xff] }
 0x43d   :  { %v5016_v58 = vpop.eup %5015 }
 0x43e   :  { %v1268_v23 = vmul.f32 %v5016_v58, %v1267_v8 }
 0x440   :  { %v6086_v1 = vadd.f32 %v1269_v2, %v1268_v23  ;;  %v7409_v2 = vld [vmem:[#allocation37_spill] sm:$0xff] }
 0x442   :  { %1388 = vmatmul.mubr.f32.vlgmr.msra.gmra.mxu0 %v6086_v1  ;;  %4500 = vmatmul.mubr.f32.vlgmr.msra.gmra.mxu1 %v6086_v1 }
 0x443   :  { %1538 = vmatpush1.msra.mxu0 %v5981_v57  ;;  %4503 = vmatpush3.msra.mxu1 %v5983_v28 }
 0x444   :  { %1539 = vmatprep.subr.mxu0 %v5874_v5  ;;  %4504 = vmatprep.subr.mxu1 %v7373_v13 }
 0x445   :  { %1540 = vmatpush1.msra.mxu0 %v5877_v29  ;;  %4505 = vmatpush3.msra.mxu1 %v5989_v31 }
 0x446   :  { %1541 = vmatprep.subr.mxu0 %v5880_v35  ;;  %4506 = vmatprep.subr.mxu1 %v7373_v13 }
 0x447   :  { %1542 = vmatpush1.msra.mxu0 %v5883_v41  ;;  %4507 = vmatpush3.msra.mxu1 %v5995_v32 }
 0x448   :  { %1543 = vmatprep.subr.mxu0 %v5886_v47  ;;  %4508 = vmatprep.subr.mxu1 %v7373_v13 }
 0x449   :  { %1544 = vmatpush1.msra.mxu0 %v5889_v48  ;;  %4509 = vmatpush3.msra.mxu1 %v6001_v33 }
 0x44a   :  { %1545 = vmatprep.subr.mxu0 %v5892_v49  ;;  %4510 = vmatprep.subr.mxu1 %v7373_v13 }
 0x44b   :  { %1546 = vmatpush1.msra.mxu0 %v5895_v50  ;;  %4511 = vmatpush3.msra.mxu1 %v6007_v34 }
 0x44c   :  { %1547 = vmatprep.subr.mxu0 %v5898_v51  ;;  %4512 = vmatprep.subr.mxu1 %v7373_v13 }
 0x44d   :  { %1548 = vmatpush1.msra.mxu0 %v5901_v52  ;;  %4513 = vmatpush3.msra.mxu1 %v6013_v37 }
 0x44e   :  { %1549 = vmatprep.subr.mxu0 %v5904_v53  ;;  %4514 = vmatprep.subr.mxu1 %v7373_v13 }
 0x44f   :  { %1550 = vmatpush1.msra.mxu0 %v5907_v54  ;;  %4515 = vmatpush3.msra.mxu1 %v6019_v38 }
 0x450   :  { %1551 = vmatprep.subr.mxu0 %v5910_v55  ;;  %4516 = vmatprep.subr.mxu1 %v7373_v13 }
 0x451   :  { %1552 = vmatpush1.msra.mxu0 %v5913_v56  ;;  %4517 = vmatpush3.msra.mxu1 %v6025_v39 }
 0x452   :  { %1553 = vmatprep.subr.mxu0 %v5915_v45  ;;  %4518 = vmatprep.subr.mxu1 %v7373_v13 }
 0x453   :  { %1554 = vmatpush1.msra.mxu0 %v5917_v46  ;;  %4519 = vmatpush3.msra.mxu1 %v6027_v40 }
 0x454   :  { %1555 = vmatprep.subr.mxu0 %v5920_v42  ;;  %4520 = vmatprep.subr.mxu1 %v7373_v13 }
 0x455   :  { %1556 = vmatpush1.msra.mxu0 %v5923_v21  ;;  %4521 = vmatpush3.msra.mxu1 %v6033_v59 }
 0x456   :  { %1557 = vmatprep.subr.mxu0 %v5926_v6  ;;  %4522 = vmatprep.subr.mxu1 %v7373_v13 }
 0x457   :  { %1558 = vmatpush1.msra.mxu0 %v5929_v7  ;;  %4523 = vmatpush3.msra.mxu1 %v6039_v63 }
 0x458   :  { %1559 = vmatprep.subr.mxu0 %v5932_v9  ;;  %4524 = vmatprep.subr.mxu1 %v7373_v13 }
 0x459   :  { %1560 = vmatpush1.msra.mxu0 %v5935_v10  ;;  %4525 = vmatpush3.msra.mxu1 %v6045_v24 }
 0x45a   :  { %1561 = vmatprep.subr.mxu0 %v5938_v11  ;;  %4526 = vmatprep.subr.mxu1 %v7373_v13 }
 0x45b   :  { %1562 = vmatpush1.msra.mxu0 %v5941_v12  ;;  %4527 = vmatpush3.msra.mxu1 %v6051_v3 }
 0x45c   :  { %1563 = vmatprep.subr.mxu0 %v5944_v14  ;;  %4528 = vmatprep.subr.mxu1 %v7373_v13 }
 0x45d   :  { %1564 = vmatpush1.msra.mxu0 %v5947_v15  ;;  %4529 = vmatpush3.msra.mxu1 %v6057_v36 }
 0x45e   :  { %1565 = vmatprep.subr.mxu0 %v7400_v43  ;;  %4530 = vmatprep.subr.mxu1 %v7373_v13 }
 0x45f   :  { %1566 = vmatpush1.msra.mxu0 %v7401_v20  ;;  %4531 = vmatpush3.msra.mxu1 %v7402_v16 }
 0x460   :  { %1567 = vmatprep.subr.mxu0 %v7403_v17  ;;  %4532 = vmatprep.subr.mxu1 %v7373_v13 }
 0x461   :  { %1568 = vmatpush1.msra.mxu0 %v7404_v19  ;;  %1601 = vmatprep.mubr.f32.mxu0 %v7373_v13 }
 0x462   :  { %4533 = vmatpush3.msra.mxu1 %v7405_v22  ;;  %4534 = vmatprep.mubr.msk.f32.mxu1 %vm5302_vm2, %v7373_v13 }
 0x463   :  { %1751 = vmatprep.subr.mxu0 %v7406_v25  ;;  %4537 = vmatprep.subr.mxu1 %v7373_v13 }
 0x502   :  { %v1389_v62 = vpop.f32.mrf.mxu0  ;;  %v1460_v61 = vpop.f32.mrf.mxu1 }
 0x503   :  { %v1390_v26 = vadd.f32 %v1389_v62, %v7407_v30  ;;  %v1461_v20 = vadd.f32 %v1460_v61, %v5753_v18 }
 0x504   :  { %v1391_v60 = vpop.f32.mrf.mxu0  ;;  %v4501_v4 = vpop.f32.mrf.mxu1 }
 0x505   :  { %v1464_v8 = vadd.f32 %v1390_v26, %v7408_v0  ;;  %v1392_v23 = vadd.f32 %v1391_v60, %v5737_v44  ;;  %v7410_v4 = vld [vmem:[#allocation47_spill] sm:$0xff] }
 0x507   :  { %v3966_v58 = vmul.f32 -1.442695, %v1464_v8  ;;  %v1471_v27 = vadd.f32 %v1392_v23, %v7409_v2  ;;  %v1938_v23 = vld [vmem:[#allocation5 + $0xa8] sm:$0xff]  ;;  %v1936_v2 = vld [vmem:[#allocation5 + $0x98] sm:$0xff] }
 0x509   :  { %5017 = vpow2.f32 %v3966_v58  ;;  %v3967_v22 = vmul.f32 -1.442695, %v1471_v27 }
 0x50b   :  { %5019 = vpow2.f32 %v3967_v22 }
 0x516   :  { %v5018_v19 = vpop.eup %5017 }
 0x517   :  { %v1468_v25 = vadd.f32 1.0, %v5018_v19 }
 0x518   :  { %v5020_v17 = vpop.eup %5019 }
 0x519   :  { %5021 = vrcp.f32 %v1468_v25  ;;  %v1475_v16 = vadd.f32 1.0, %v5020_v17 }
 0x51b   :  { %5023 = vrcp.f32 %v1475_v16 }
 0x526   :  { %v5022_v62 = vpop.eup %5021 }
 0x527   :  { %v1478_v30 = vmul.f32 %v5022_v62, %v1461_v20  ;;  %v1935_v62 = vld [vmem:[#allocation5 + $0x90] sm:$0xff] }
 0x528   :  { %v5024_v0 = vpop.eup %5023 }
 0x529   :  { %v1479_v26 = vadd.f32 %v1478_v30, %v7410_v4  ;;  %v1481_v60 = vsub.f32 1.0, %v5024_v0  ;;  %v1483_v27 = vmul.f32 %v5024_v0, %v6086_v1  ;;  %v1933_v4 = vld [vmem:[#allocation5 + $0x80] sm:$0xff]  ;;  %v1930_v0 = vld [vmem:[#allocation5 + $0x68] sm:$0xff] }
 0x52b   :  { %5025 = vtanh.f32 %v1479_v26  ;;  %v1932_v26 = vld [vmem:[#allocation5 + $0x78] sm:$0xff] }
 0x538   :  { %v5026_v8 = vpop.eup %5025 }
 0x539   :  { %v1482_v58 = vmul.f32 %v5026_v8, %v1481_v60  ;;  %v1929_v60 = vld [vmem:[#allocation5 + $0x60] sm:$0xff]  ;;  %v2183_v8 = vld [vmem:[#allocation8 + $0x178] sm:$0xff] }
 0x53b   :  { %v6164_v22 = vadd.f32 %v1483_v27, %v1482_v58  ;;  %v1927_v58 = vld [vmem:[#allocation5 + $0x50] sm:$0xff]  ;;  %v1926_v27 = vld [vmem:[#allocation5 + $0x48] sm:$0xff] }
 0x53d   :  { %1602 = vmatmul.mubr.f32.vlgmr.msra.gmra.mxu0 %v6164_v22  ;;  %4535 = vmatmul.mubr.f32.vlgmr.msra.gmra.mxu1 %v6164_v22 }
 0x53e   :  { %1752 = vmatpush1.msra.mxu0 %v5981_v57  ;;  %4538 = vmatpush3.msra.mxu1 %v5983_v28 }
 0x53f   :  { %1753 = vmatprep.subr.mxu0 %v5874_v5  ;;  %4539 = vmatprep.subr.mxu1 %v7373_v13  ;;  %v7411_v5 = vld [vmem:[#allocation20_spill] sm:$0xff] }
 0x540   :  { %1754 = vmatpush1.msra.mxu0 %v5877_v29  ;;  %4540 = vmatpush3.msra.mxu1 %v5989_v31  ;;  %v7412_v29 = vld [vmem:[#allocation26_spill] sm:$0xff] }
 0x541   :  { %1755 = vmatprep.subr.mxu0 %v5880_v35  ;;  %4541 = vmatprep.subr.mxu1 %v7373_v13  ;;  %v7413_v35 = vld [vmem:[#allocation21_spill] sm:$0xff] }
 0x542   :  { %1756 = vmatpush1.msra.mxu0 %v5883_v41  ;;  %4542 = vmatpush3.msra.mxu1 %v5995_v32  ;;  %v7414_v41 = vld [vmem:[#allocation25_spill] sm:$0xff] }
 0x543   :  { %1757 = vmatprep.subr.mxu0 %v5886_v47  ;;  %4543 = vmatprep.subr.mxu1 %v7373_v13  ;;  %v7415_v47 = vld [vmem:[#allocation18_spill] sm:$0xff] }
 0x544   :  { %1758 = vmatpush1.msra.mxu0 %v5889_v48  ;;  %4544 = vmatpush3.msra.mxu1 %v6001_v33  ;;  %v7416_v48 = vld [vmem:[#allocation23_spill] sm:$0xff] }
 0x545   :  { %1759 = vmatprep.subr.mxu0 %v5892_v49  ;;  %4545 = vmatprep.subr.mxu1 %v7373_v13 }
 0x546   :  { %1760 = vmatpush1.msra.mxu0 %v5895_v50  ;;  %4546 = vmatpush3.msra.mxu1 %v6007_v34 }
 0x547   :  { %1761 = vmatprep.subr.mxu0 %v5898_v51  ;;  %4547 = vmatprep.subr.mxu1 %v7373_v13  ;;  %v7417_v51 = vld [vmem:[#allocation44_spill] sm:$0xff] }
 0x548   :  { %1762 = vmatpush1.msra.mxu0 %v5901_v52  ;;  %4548 = vmatpush3.msra.mxu1 %v6013_v37 }
 0x549   :  { %1763 = vmatprep.subr.mxu0 %v5904_v53  ;;  %4549 = vmatprep.subr.mxu1 %v7373_v13 }
 0x54a   :  { %1764 = vmatpush1.msra.mxu0 %v5907_v54  ;;  %4550 = vmatpush3.msra.mxu1 %v6019_v38 }
 0x54b   :  { %1765 = vmatprep.subr.mxu0 %v5910_v55  ;;  %4551 = vmatprep.subr.mxu1 %v7373_v13  ;;  %v7418_v55 = vld [vmem:[#allocation39_spill] sm:$0xff] }
 0x54c   :  { %1766 = vmatpush1.msra.mxu0 %v5913_v56  ;;  %4552 = vmatpush3.msra.mxu1 %v6025_v39 }
 0x54d   :  { %1767 = vmatprep.subr.mxu0 %v5915_v45  ;;  %4553 = vmatprep.subr.mxu1 %v7373_v13 }
 0x54e   :  { %1768 = vmatpush1.msra.mxu0 %v5917_v46  ;;  %4554 = vmatpush3.msra.mxu1 %v6027_v40 }
 0x54f   :  { %1769 = vmatprep.subr.mxu0 %v5920_v42  ;;  %4555 = vmatprep.subr.mxu1 %v7373_v13  ;;  %v7419_v42 = vld [vmem:[#allocation40_spill] sm:$0xff] }
 0x550   :  { %1770 = vmatpush1.msra.mxu0 %v5923_v21  ;;  %4556 = vmatpush3.msra.mxu1 %v6033_v59 }
 0x551   :  { %1771 = vmatprep.subr.mxu0 %v5926_v6  ;;  %4557 = vmatprep.subr.mxu1 %v7373_v13 }
 0x552   :  { %1772 = vmatpush1.msra.mxu0 %v5929_v7  ;;  %4558 = vmatpush3.msra.mxu1 %v6039_v63 }
 0x553   :  { %1773 = vmatprep.subr.mxu0 %v5932_v9  ;;  %4559 = vmatprep.subr.mxu1 %v7373_v13 }
 0x554   :  { %1774 = vmatpush1.msra.mxu0 %v5935_v10  ;;  %4560 = vmatpush3.msra.mxu1 %v6045_v24 }
 0x555   :  { %1775 = vmatprep.subr.mxu0 %v5938_v11  ;;  %4561 = vmatprep.subr.mxu1 %v7373_v13 }
 0x556   :  { %1776 = vmatpush1.msra.mxu0 %v5941_v12  ;;  %4562 = vmatpush3.msra.mxu1 %v6051_v3 }
 0x557   :  { %1777 = vmatprep.subr.mxu0 %v5944_v14  ;;  %4563 = vmatprep.subr.mxu1 %v7373_v13 }
 0x558   :  { %1778 = vmatpush1.msra.mxu0 %v5947_v15  ;;  %4564 = vmatpush3.msra.mxu1 %v6057_v36 }
 0x559   :  { %1779 = vmatprep.subr.mxu0 %v7400_v43  ;;  %4565 = vmatprep.subr.mxu1 %v7373_v13  ;;  %v7420_v43 = vld [vmem:[#allocation46_spill] sm:$0xff] }
 0x55a   :  { %1780 = vmatpush1.msra.mxu0 %v7411_v5  ;;  %4566 = vmatpush3.msra.mxu1 %v7412_v29  ;;  %v1924_v5 = vld [vmem:[#allocation5 + $0x38] sm:$0xff] }
 0x55b   :  { %1781 = vmatprep.subr.mxu0 %v7413_v35  ;;  %4567 = vmatprep.subr.mxu1 %v7373_v13  ;;  %v1921_v35 = vld [vmem:[#allocation5 + $0x20] sm:$0xff] }
 0x55c   :  { %1782 = vmatpush1.msra.mxu0 %v7414_v41  ;;  %1815 = vmatprep.mubr.f32.mxu0 %v7373_v13  ;;  %v1920_v41 = vld [vmem:[#allocation5 + $0x18] sm:$0xff] }
 0x55d   :  { %4568 = vmatpush3.msra.mxu1 %v7415_v47  ;;  %4569 = vmatprep.mubr.msk.f32.mxu1 %vm5302_vm2, %v7373_v13 }
 0x55e   :  { %1965 = vmatprep.subr.mxu0 %v7416_v48  ;;  %4572 = vmatprep.subr.mxu1 %v7373_v13  ;;  %v1917_v48 = vld [vmem:[#allocation5] sm:$0xff] }
 0x5fd   :  { %v1603_v49 = vpop.f32.mrf.mxu0  ;;  %v1674_v50 = vpop.f32.mrf.mxu1 }
 0x5fe   :  { %v1604_v52 = vadd.f32 %v1603_v49, %v7417_v51  ;;  %v1675_v12 = vadd.f32 %v1674_v50, %v5753_v18  ;;  %v2182_v49 = vld [vmem:[#allocation8 + $0x170] sm:$0xff] }
 0x5ff   :  { %v1605_v53 = vpop.f32.mrf.mxu0  ;;  %v4536_v54 = vpop.f32.mrf.mxu1 }
 0x600   :  { %v1678_v56 = vadd.f32 %v1604_v52, %v7418_v55  ;;  %v1606_v46 = vadd.f32 %v1605_v53, %v5737_v44 }
 0x602   :  { %v3968_v45 = vmul.f32 -1.442695, %v1678_v56  ;;  %v1685_v21 = vadd.f32 %v1606_v46, %v7419_v42  ;;  %v7421_v56 = vld [vmem:[#allocation41_spill] sm:$0xff] }
 0x604   :  { %5027 = vpow2.f32 %v3968_v45  ;;  %v3969_v6 = vmul.f32 -1.442695, %v1685_v21  ;;  %v7422_v21 = vld [vmem:[#allocation42_spill] sm:$0xff] }
 0x606   :  { %5029 = vpow2.f32 %v3969_v6 }
 0x611   :  { %v5028_v7 = vpop.eup %5027 }
 0x612   :  { %v1682_v9 = vadd.f32 1.0, %v5028_v7 }
 0x613   :  { %v5030_v10 = vpop.eup %5029 }
 0x614   :  { %5031 = vrcp.f32 %v1682_v9  ;;  %v1689_v11 = vadd.f32 1.0, %v5030_v10 }
 0x616   :  { %5033 = vrcp.f32 %v1689_v11 }
 0x621   :  { %v5032_v14 = vpop.eup %5031 }
 0x622   :  { %v1692_v15 = vmul.f32 %v5032_v14, %v1675_v12 }
 0x623   :  { %v5034_v16 = vpop.eup %5033 }
 0x624   :  { %v1693_v20 = vadd.f32 %v1692_v15, %v7420_v43  ;;  %v1695_v17 = vsub.f32 1.0, %v5034_v16  ;;  %v1697_v61 = vmul.f32 %v5034_v16, %v6164_v22 }
 0x626   :  { %5035 = vtanh.f32 %v1693_v20  ;;  %v7423_v20 = vld [vmem:[#allocation49_spill] sm:$0xff] }
 0x633   :  { %v5036_v19 = vpop.eup %5035 }
 0x634   :  { %v1696_v25 = vmul.f32 %v5036_v19, %v1695_v17 }
 0x636   :  { %v6242_v30 = vadd.f32 %v1697_v61, %v1696_v25 }
 0x638   :  { %1816 = vmatmul.mubr.f32.vlgmr.msra.gmra.mxu0 %v6242_v30  ;;  %4570 = vmatmul.mubr.f32.vlgmr.msra.gmra.mxu1 %v6242_v30 }
 0x639   :  { %1966 = vmatpush1.msra.mxu0 %v5981_v57  ;;  %4573 = vmatpush3.msra.mxu1 %v5983_v28  ;;  %v1960_v57 = vld [vmem:[#allocation5 + $0x158] sm:$0xff]  ;;  %v1959_v28 = vld [vmem:[#allocation5 + $0x150] sm:$0xff] }
 0x63a   :  { %4574 = vmatprep.subr.mxu1 %v7373_v13  ;;  %2029 = vmatprep.mubr.f32.mxu0 %v7373_v13 }
 0x63b   :  { %4575 = vmatpush3.msra.mxu1 %v5989_v31  ;;  %4604 = vmatprep.mubr.msk.f32.mxu1 %vm5302_vm2, %v7373_v13  ;;  %v1957_v31 = vld [vmem:[#allocation5 + $0x140] sm:$0xff] }
 0x63c   :  { %4576 = vmatprep.subr.mxu1 %v7373_v13  ;;  %1967 = vmatprep.subr.mxu0 %v1960_v57 }
 0x63d   :  { %4577 = vmatpush3.msra.mxu1 %v5995_v32  ;;  %1968 = vmatpush1.msra.mxu0 %v1959_v28  ;;  %v1956_v32 = vld [vmem:[#allocation5 + $0x138] sm:$0xff] }
 0x63e   :  { %4578 = vmatprep.subr.mxu1 %v7373_v13  ;;  %1969 = vmatprep.subr.mxu0 %v1957_v31  ;;  %v2181_v31 = vld [vmem:[#allocation8 + $0x168] sm:$0xff] }
 0x63f   :  { %4579 = vmatpush3.msra.mxu1 %v6001_v33  ;;  %1970 = vmatpush1.msra.mxu0 %v1956_v32  ;;  %v1954_v33 = vld [vmem:[#allocation5 + $0x128] sm:$0xff]  ;;  %v2179_v32 = vld [vmem:[#allocation8 + $0x158] sm:$0xff] }
 0x640   :  { %4580 = vmatprep.subr.mxu1 %v7373_v13  ;;  %1971 = vmatprep.subr.mxu0 %v1954_v33  ;;  %v2180_v33 = vld [vmem:[#allocation8 + $0x160] sm:$0xff] }
 0x641   :  { %4581 = vmatpush3.msra.mxu1 %v6007_v34  ;;  %v1953_v34 = vld [vmem:[#allocation5 + $0x120] sm:$0xff] }
 0x642   :  { %4582 = vmatprep.subr.mxu1 %v7373_v13  ;;  %1972 = vmatpush1.msra.mxu0 %v1953_v34  ;;  %v2178_v34 = vld [vmem:[#allocation8 + $0x150] sm:$0xff] }
 0x643   :  { %4583 = vmatpush3.msra.mxu1 %v6013_v37  ;;  %v1951_v37 = vld [vmem:[#allocation5 + $0x110] sm:$0xff] }
 0x644   :  { %4584 = vmatprep.subr.mxu1 %v7373_v13  ;;  %1973 = vmatprep.subr.mxu0 %v1951_v37  ;;  %v2176_v37 = vld [vmem:[#allocation8 + $0x140] sm:$0xff] }
 0x645   :  { %4585 = vmatpush3.msra.mxu1 %v6019_v38  ;;  %v1950_v38 = vld [vmem:[#allocation5 + $0x108] sm:$0xff] }
 0x646   :  { %4586 = vmatprep.subr.mxu1 %v7373_v13  ;;  %1974 = vmatpush1.msra.mxu0 %v1950_v38  ;;  %v2177_v38 = vld [vmem:[#allocation8 + $0x148] sm:$0xff] }
 0x647   :  { %4587 = vmatpush3.msra.mxu1 %v6025_v39  ;;  %v1948_v39 = vld [vmem:[#allocation5 + $0xf8] sm:$0xff] }
 0x648   :  { %4588 = vmatprep.subr.mxu1 %v7373_v13  ;;  %1975 = vmatprep.subr.mxu0 %v1948_v39  ;;  %v2175_v39 = vld [vmem:[#allocation8 + $0x138] sm:$0xff] }
 0x649   :  { %4589 = vmatpush3.msra.mxu1 %v6027_v40  ;;  %v1947_v40 = vld [vmem:[#allocation5 + $0xf0] sm:$0xff] }
 0x64a   :  { %4590 = vmatprep.subr.mxu1 %v7373_v13  ;;  %1976 = vmatpush1.msra.mxu0 %v1947_v40  ;;  %v7424_v40 = vld [vmem:[#allocation50_spill] sm:$0xff] }
 0x64b   :  { %4591 = vmatpush3.msra.mxu1 %v6033_v59  ;;  %v1945_v59 = vld [vmem:[#allocation5 + $0xe0] sm:$0xff] }
 0x64c   :  { %4592 = vmatprep.subr.mxu1 %v7373_v13  ;;  %1977 = vmatprep.subr.mxu0 %v1945_v59  ;;  %v2173_v59 = vld [vmem:[#allocation8 + $0x128] sm:$0xff] }
 0x64d   :  { %4593 = vmatpush3.msra.mxu1 %v6039_v63  ;;  %v1944_v63 = vld [vmem:[#allocation5 + $0xd8] sm:$0xff] }
 0x64e   :  { %4594 = vmatprep.subr.mxu1 %v7373_v13  ;;  %1978 = vmatpush1.msra.mxu0 %v1944_v63  ;;  %v2174_v63 = vld [vmem:[#allocation8 + $0x130] sm:$0xff] }
 0x64f   :  { %4595 = vmatpush3.msra.mxu1 %v6045_v24  ;;  %v1942_v24 = vld [vmem:[#allocation5 + $0xc8] sm:$0xff] }
 0x650   :  { %4596 = vmatprep.subr.mxu1 %v7373_v13  ;;  %1979 = vmatprep.subr.mxu0 %v1942_v24  ;;  %v2172_v24 = vld [vmem:[#allocation8 + $0x120] sm:$0xff] }
 0x651   :  { %4597 = vmatpush3.msra.mxu1 %v6051_v3  ;;  %v1941_v3 = vld [vmem:[#allocation5 + $0xc0] sm:$0xff] }
 0x652   :  { %4598 = vmatprep.subr.mxu1 %v7373_v13  ;;  %1980 = vmatpush1.msra.mxu0 %v1941_v3  ;;  %v2170_v3 = vld [vmem:[#allocation8 + $0x110] sm:$0xff] }
 0x653   :  { %4599 = vmatpush3.msra.mxu1 %v6057_v36  ;;  %v1939_v36 = vld [vmem:[#allocation5 + $0xb0] sm:$0xff] }
 0x654   :  { %4600 = vmatprep.subr.mxu1 %v7373_v13  ;;  %1981 = vmatprep.subr.mxu0 %v1939_v36  ;;  %v2171_v36 = vld [vmem:[#allocation8 + $0x118] sm:$0xff] }
 0x655   :  { %4601 = vmatpush3.msra.mxu1 %v7412_v29  ;;  %1982 = vmatpush1.msra.mxu0 %v1938_v23  ;;  %v1923_v29 = vld [vmem:[#allocation5 + $0x30] sm:$0xff]  ;;  %v2169_v23 = vld [vmem:[#allocation8 + $0x108] sm:$0xff] }
 0x656   :  { %4602 = vmatprep.subr.mxu1 %v7373_v13  ;;  %1983 = vmatprep.subr.mxu0 %v1936_v2  ;;  %v2167_v2 = vld [vmem:[#allocation8 + $0xf8] sm:$0xff] }
 0x657   :  { %4603 = vmatpush3.msra.mxu1 %v7415_v47  ;;  %1984 = vmatpush1.msra.mxu0 %v1935_v62  ;;  %v1918_v47 = vld [vmem:[#allocation5 + $0x8] sm:$0xff]  ;;  %v2168_v62 = vld [vmem:[#allocation8 + $0x100] sm:$0xff] }
 0x658   :  { %1985 = vmatprep.subr.mxu0 %v1933_v4  ;;  %4607 = vmatprep.subr.mxu1 %v2183_v8  ;;  %v2166_v4 = vld [vmem:[#allocation8 + $0xf0] sm:$0xff] }
 0x659   :  { %1986 = vmatpush1.msra.mxu0 %v1932_v26  ;;  %v2164_v26 = vld [vmem:[#allocation8 + $0xe0] sm:$0xff] }
 0x65a   :  { %1987 = vmatprep.subr.mxu0 %v1930_v0  ;;  %v2165_v0 = vld [vmem:[#allocation8 + $0xe8] sm:$0xff] }
 0x65b   :  { %1988 = vmatpush1.msra.mxu0 %v1929_v60  ;;  %v2163_v60 = vld [vmem:[#allocation8 + $0xd8] sm:$0xff] }
 0x65c   :  { %1989 = vmatprep.subr.mxu0 %v1927_v58  ;;  %v2162_v58 = vld [vmem:[#allocation8 + $0xd0] sm:$0xff] }
 0x65d   :  { %1990 = vmatpush1.msra.mxu0 %v1926_v27  ;;  %v2160_v27 = vld [vmem:[#allocation8 + $0xc0] sm:$0xff] }
 0x65e   :  { %1991 = vmatprep.subr.mxu0 %v1924_v5  ;;  %v2158_v5 = vld [vmem:[#allocation8 + $0xb0] sm:$0xff] }
 0x65f   :  { %1992 = vmatpush1.msra.mxu0 %v1923_v29  ;;  %v2159_v29 = vld [vmem:[#allocation8 + $0xb8] sm:$0xff] }
 0x660   :  { %1993 = vmatprep.subr.mxu0 %v1921_v35  ;;  %v2157_v35 = vld [vmem:[#allocation8 + $0xa8] sm:$0xff] }
 0x661   :  { %1994 = vmatpush1.msra.mxu0 %v1920_v41  ;;  %v2155_v41 = vld [vmem:[#allocation8 + $0x98] sm:$0xff] }
 0x662   :  { %1995 = vmatprep.subr.mxu0 %v1918_v47  ;;  %v2156_v47 = vld [vmem:[#allocation8 + $0xa0] sm:$0xff] }
 0x663   :  { %1996 = vmatpush1.msra.mxu0 %v1917_v48  ;;  %v2154_v48 = vld [vmem:[#allocation8 + $0x90] sm:$0xff] }
 0x664   :  { %2201 = vmatprep.subr.mxu0 %v2182_v49  ;;  %v2152_v49 = vld [vmem:[#allocation8 + $0x80] sm:$0xff] }
 0x6f8   :  { %v1817_v50 = vpop.f32.mrf.mxu0  ;;  %v1888_v52 = vpop.f32.mrf.mxu1 }
 0x6f9   :  { %v1818_v53 = vadd.f32 %v1817_v50, %v7417_v51  ;;  %v1889_v14 = vadd.f32 %v1888_v52, %v5753_v18  ;;  %v2153_v50 = vld [vmem:[#allocation8 + $0x88] sm:$0xff]  ;;  %v2151_v52 = vld [vmem:[#allocation8 + $0x78] sm:$0xff] }
 0x6fa   :  { %v1819_v54 = vpop.f32.mrf.mxu0  ;;  %v4571_v55 = vpop.f32.mrf.mxu1 }
 0x6fb   :  { %v1892_v45 = vadd.f32 %v1818_v53, %v7421_v56  ;;  %v1820_v42 = vadd.f32 %v1819_v54, %v5737_v44  ;;  %v2149_v53 = vld [vmem:[#allocation8 + $0x68] sm:$0xff]  ;;  %v2150_v54 = vld [vmem:[#allocation8 + $0x70] sm:$0xff]  ;;  %v2148_v55 = vld [vmem:[#allocation8 + $0x60] sm:$0xff] }
 0x6fc   :  { %v2146_v56 = vld [vmem:[#allocation8 + $0x50] sm:$0xff] }
 0x6fd   :  { %v3970_v46 = vmul.f32 -1.442695, %v1892_v45  ;;  %v1899_v6 = vadd.f32 %v1820_v42, %v7422_v21  ;;  %v2147_v45 = vld [vmem:[#allocation8 + $0x58] sm:$0xff]  ;;  %v2144_v21 = vld [vmem:[#allocation8 + $0x40] sm:$0xff] }
 0x6fe   :  { %v2143_v42 = vld [vmem:[#allocation8 + $0x38] sm:$0xff] }
 0x6ff   :  { %5037 = vpow2.f32 %v3970_v46  ;;  %v3971_v7 = vmul.f32 -1.442695, %v1899_v6  ;;  %v2145_v46 = vld [vmem:[#allocation8 + $0x48] sm:$0xff]  ;;  %v2142_v6 = vld [vmem:[#allocation8 + $0x30] sm:$0xff] }
 0x701   :  { %5039 = vpow2.f32 %v3971_v7  ;;  %v2140_v7 = vld [vmem:[#allocation8 + $0x20] sm:$0xff] }
 0x70c   :  { %v5038_v9 = vpop.eup %5037 }
 0x70d   :  { %v1896_v10 = vadd.f32 1.0, %v5038_v9  ;;  %v2141_v9 = vld [vmem:[#allocation8 + $0x28] sm:$0xff] }
 0x70e   :  { %v5040_v11 = vpop.eup %5039 }
 0x70f   :  { %5041 = vrcp.f32 %v1896_v10  ;;  %v1903_v12 = vadd.f32 1.0, %v5040_v11  ;;  %v2139_v10 = vld [vmem:[#allocation8 + $0x18] sm:$0xff]  ;;  %v2137_v11 = vld [vmem:[#allocation8 + $0x8] sm:$0xff] }
 0x711   :  { %5043 = vrcp.f32 %v1903_v12  ;;  %v2138_v12 = vld [vmem:[#allocation8 + $0x10] sm:$0xff] }
 0x71c   :  { %v5042_v15 = vpop.eup %5041 }
 0x71d   :  { %v1906_v43 = vmul.f32 %v5042_v15, %v1889_v14  ;;  %v2136_v14 = vld [vmem:[#allocation8] sm:$0xff]  ;;  %v7425_v15 = vld [vmem:[#allocation19_spill] sm:$0xff] }
 0x71e   :  { %v5044_v17 = vpop.eup %5043 }
 0x71f   :  { %v1907_v16 = vadd.f32 %v1906_v43, %v7423_v20  ;;  %v1909_v19 = vsub.f32 1.0, %v5044_v17  ;;  %v1911_v57 = vmul.f32 %v5044_v17, %v6242_v30  ;;  %v7426_v43 = vld [vmem:[#allocation22_spill] sm:$0xff]  ;;  %v6315_v20 = vld [vmem:[#allocation10 + $0x170] sm:$0xff]  ;;  %v6330_v17 = vld [vmem:[#allocation10 + $0x138] sm:$0xff] }
 0x720   :  { %7427 = vst [vmem:[#allocation29_spill] sm:$0xff] %v6315_v20 }
 0x721   :  { %5045 = vtanh.f32 %v1907_v16  ;;  %v6318_v16 = vld [vmem:[#allocation10 + $0x168] sm:$0xff] }
 0x72e   :  { %v5046_v25 = vpop.eup %5045 }
 0x72f   :  { %v1910_v61 = vmul.f32 %v5046_v25, %v1909_v19  ;;  %v6333_v19 = vld [vmem:[#allocation10 + $0x128] sm:$0xff]  ;;  %v6336_v25 = vld [vmem:[#allocation10 + $0x120] sm:$0xff] }
 0x731   :  { %v6288_v28 = vadd.f32 %v1911_v57, %v1910_v61  ;;  %v6339_v61 = vld [vmem:[#allocation10 + $0x110] sm:$0xff]  ;;  %v6342_v57 = vld [vmem:[#allocation10 + $0x108] sm:$0xff] }
 0x733   :  { %2030 = vmatmul.mubr.f32.vlgmr.msra.gmra.mxu0 %v6288_v28  ;;  %4605 = vmatmul.mubr.f32.vlgmr.msra.gmra.mxu1 %v6288_v28 }
 0x734   :  { %2202 = vmatpush1.msra.mxu0 %v2181_v31  ;;  %4608 = vmatpush3.msra.mxu1 %v2183_v8  ;;  %v2161_v8 = vld [vmem:[#allocation8 + $0xc8] sm:$0xff]  ;;  %v6345_v31 = vld [vmem:[#allocation10 + $0xf8] sm:$0xff] }
 0x735   :  { %2203 = vmatprep.subr.mxu0 %v2179_v32  ;;  %4609 = vmatprep.subr.mxu1 %v2180_v33  ;;  %v6348_v32 = vld [vmem:[#allocation10 + $0xf0] sm:$0xff] }
 0x736   :  { %4639 = vmatprep.mubr.f32.mxu1 %v7424_v40  ;;  %2204 = vmatpush1.msra.mxu0 %v2178_v34  ;;  %v6354_v34 = vld [vmem:[#allocation10 + $0xd8] sm:$0xff] }
 0x737   :  { %4610 = vmatpush3.msra.mxu1 %v2180_v33  ;;  %2205 = vmatprep.subr.mxu0 %v2176_v37  ;;  %v6351_v33 = vld [vmem:[#allocation10 + $0xe0] sm:$0xff]  ;;  %v6357_v37 = vld [vmem:[#allocation10 + $0xc8] sm:$0xff] }
 0x738   :  { %4611 = vmatprep.subr.mxu1 %v2177_v38  ;;  %2206 = vmatpush1.msra.mxu0 %v2175_v39  ;;  %v6363_v39 = vld [vmem:[#allocation10 + $0xb0] sm:$0xff] }
 0x739   :  { %4612 = vmatpush3.msra.mxu1 %v2177_v38  ;;  %2207 = vmatprep.subr.mxu0 %v2173_v59  ;;  %v6360_v38 = vld [vmem:[#allocation10 + $0xc0] sm:$0xff]  ;;  %v6369_v59 = vld [vmem:[#allocation10 + $0x98] sm:$0xff] }
 0x73a   :  { %4613 = vmatprep.subr.mxu1 %v2174_v63  ;;  %2208 = vmatpush1.msra.mxu0 %v2172_v24  ;;  %v6375_v24 = vld [vmem:[#allocation10 + $0x80] sm:$0xff] }
 0x73b   :  { %4614 = vmatpush3.msra.mxu1 %v2174_v63  ;;  %2209 = vmatprep.subr.mxu0 %v2170_v3  ;;  %v6372_v63 = vld [vmem:[#allocation10 + $0x90] sm:$0xff]  ;;  %v6378_v3 = vld [vmem:[#allocation10 + $0x78] sm:$0xff] }
 0x73c   :  { %4615 = vmatprep.subr.mxu1 %v2171_v36  ;;  %2210 = vmatpush1.msra.mxu0 %v2169_v23  ;;  %v6384_v23 = vld [vmem:[#allocation10 + $0x60] sm:$0xff] }
 0x73d   :  { %4616 = vmatpush3.msra.mxu1 %v2171_v36  ;;  %2211 = vmatprep.subr.mxu0 %v2167_v2  ;;  %v6381_v36 = vld [vmem:[#allocation10 + $0x68] sm:$0xff]  ;;  %v6387_v2 = vld [vmem:[#allocation10 + $0x50] sm:$0xff] }
 0x73e   :  { %4617 = vmatprep.subr.mxu1 %v2168_v62  ;;  %2212 = vmatpush1.msra.mxu0 %v2166_v4  ;;  %v6393_v4 = vld [vmem:[#allocation10 + $0x38] sm:$0xff] }
 0x73f   :  { %4618 = vmatpush3.msra.mxu1 %v2168_v62  ;;  %2213 = vmatprep.subr.mxu0 %v2164_v26  ;;  %v6390_v62 = vld [vmem:[#allocation10 + $0x48] sm:$0xff]  ;;  %v6396_v26 = vld [vmem:[#allocation10 + $0x30] sm:$0xff] }
 0x740   :  { %4619 = vmatprep.subr.mxu1 %v2165_v0  ;;  %2214 = vmatpush1.msra.mxu0 %v2163_v60  ;;  %7428 = vst [vmem:[#allocation30_spill] sm:$0xff] %v6396_v26  ;;  %v6401_v60 = vld [vmem:[#allocation10 + $0x18] sm:$0xff] }
 0x741   :  { %4620 = vmatpush3.msra.mxu1 %v2165_v0  ;;  %2215 = vmatprep.subr.mxu0 %v2161_v8  ;;  %v6399_v0 = vld [vmem:[#allocation10 + $0x20] sm:$0xff]  ;;  %7430 = vst [vmem:[#allocation31_spill] sm:$0xff] %v6401_v60  ;;  %v6403_v8 = vld [vmem:[#allocation10 + $0x8] sm:$0xff] }
 0x742   :  { %4621 = vmatprep.subr.mxu1 %v2162_v58  ;;  %2216 = vmatpush1.msra.mxu0 %v2160_v27  ;;  %7429 = vst [vmem:[#allocation38_spill] sm:$0xff] %v6399_v0  ;;  %7431 = vst [vmem:[#allocation32_spill] sm:$0xff] %v6403_v8  ;;  %v6410_v27 = vld [vmem:[#allocation10 + $0x178] sm:$0xff] }
 0x743   :  { %4622 = vmatpush3.msra.mxu1 %v2162_v58  ;;  %2217 = vmatprep.subr.mxu0 %v2158_v5  ;;  %v6406_v58 = vld [vmem:[#allocation10] sm:$0xff] }
 0x744   :  { %4623 = vmatprep.subr.mxu1 %v2159_v29  ;;  %2218 = vmatpush1.msra.mxu0 %v2157_v35  ;;  %7432 = vst [vmem:[#allocation34_spill] sm:$0xff] %v6406_v58  ;;  %v6412_v5 = vld [vmem:[#allocation10 + $0x160] sm:$0xff]  ;;  %v6422_v35 = vld [vmem:[#allocation10 + $0x130] sm:$0xff] }
 0x745   :  { %4624 = vmatpush3.msra.mxu1 %v2159_v29  ;;  %2219 = vmatprep.subr.mxu0 %v2155_v41  ;;  %v6417_v29 = vld [vmem:[#allocation10 + $0x148] sm:$0xff]  ;;  %v6426_v41 = vld [vmem:[#allocation10 + $0x118] sm:$0xff] }
 0x746   :  { %4625 = vmatprep.subr.mxu1 %v2156_v47  ;;  %2220 = vmatpush1.msra.mxu0 %v2154_v48  ;;  %v6434_v48 = vld [vmem:[#allocation10 + $0xe8] sm:$0xff] }
 0x747   :  { %4626 = vmatpush3.msra.mxu1 %v2156_v47  ;;  %2221 = vmatprep.subr.mxu0 %v2152_v49  ;;  %v6430_v47 = vld [vmem:[#allocation10 + $0x100] sm:$0xff]  ;;  %v6438_v49 = vld [vmem:[#allocation10 + $0xd0] sm:$0xff] }
 0x748   :  { %4627 = vmatprep.subr.mxu1 %v2153_v50  ;;  %2222 = vmatpush1.msra.mxu0 %v2151_v52  ;;  %v6446_v52 = vld [vmem:[#allocation10 + $0xa0] sm:$0xff] }
 0x749   :  { %4628 = vmatpush3.msra.mxu1 %v2153_v50  ;;  %2223 = vmatprep.subr.mxu0 %v2149_v53  ;;  %v6442_v50 = vld [vmem:[#allocation10 + $0xb8] sm:$0xff]  ;;  %v6450_v53 = vld [vmem:[#allocation10 + $0x88] sm:$0xff] }
 0x74a   :  { %4629 = vmatprep.subr.mxu1 %v2150_v54  ;;  %2224 = vmatpush1.msra.mxu0 %v2148_v55  ;;  %v6458_v55 = vld [vmem:[#allocation10 + $0x58] sm:$0xff] }
 0x74b   :  { %4630 = vmatpush3.msra.mxu1 %v2150_v54  ;;  %2225 = vmatprep.subr.mxu0 %v2146_v56  ;;  %v6454_v54 = vld [vmem:[#allocation10 + $0x70] sm:$0xff]  ;;  %v6462_v56 = vld [vmem:[#allocation10 + $0x40] sm:$0xff] }
 0x74c   :  { %4631 = vmatprep.subr.mxu1 %v2147_v45  ;;  %2226 = vmatpush1.msra.mxu0 %v2145_v46  ;;  %7433 = vst [vmem:[#allocation35_spill] sm:$0xff] %v6462_v56  ;;  %v6470_v46 = vld [vmem:[#allocation10 + $0x10] sm:$0xff] }
 0x74d   :  { %4632 = vmatpush3.msra.mxu1 %v2147_v45  ;;  %2227 = vmatprep.subr.mxu0 %v2143_v42  ;;  %v6466_v45 = vld [vmem:[#allocation10 + $0x28] sm:$0xff]  ;;  %7435 = vst [vmem:[#allocation36_spill] sm:$0xff] %v6470_v46 }
 0x74e   :  { %4633 = vmatprep.subr.mxu1 %v2144_v21  ;;  %2228 = vmatpush1.msra.mxu0 %v2142_v6  ;;  %7434 = vst [vmem:[#allocation24_spill] sm:$0xff] %v6466_v45 }
 0x74f   :  { %4634 = vmatpush3.msra.mxu1 %v2144_v21  ;;  %2229 = vmatprep.subr.mxu0 %v2140_v7 }
 0x750   :  { %4635 = vmatprep.subr.mxu1 %v2141_v9  ;;  %2230 = vmatpush1.msra.mxu0 %v2139_v10  ;;  %v7436_v10 = vld [vmem:[#allocation43_spill] sm:$0xff] }
 0x751   :  { %4636 = vmatpush3.msra.mxu1 %v2141_v9  ;;  %2231 = vmatprep.subr.mxu0 %v2137_v11 }
 0x752   :  { %4637 = vmatprep.subr.mxu1 %v2138_v12  ;;  %2232 = vmatpush1.msra.mxu0 %v2136_v14 }
 0x753   :  { %2265 = vmatprep.mubr.f32.mxu0 %v7373_v13  ;;  %4638 = vmatpush3.msra.mxu1 %v2138_v12 }
 0x754   :  { %2266 = vmatmul.mubr.f32.vlgmr.msra.gmra.mxu0 %v7424_v40  ;;  %4640 = vmatmul.mubr.f32.vlgmr.msra.gmra.mxu1 %v7425_v15  ;;  %v6366_v40 = vld [vmem:[#allocation10 + $0xa8] sm:$0xff] }
 0x755   :  { %4642 = vmatprep.mubr.f32.mxu1 %v7426_v43  ;;  %2271 = vmatprep.mubr.f32.mxu0 %v7373_v13 }
 0x756   :  { %4651 = vmatprep.subr.mxu1 %v7373_v13  ;;  %2511 = vmatprep.subr.mxu0 %v6315_v20 }
 0x757   :  { %2512 = vmatpush1.msra.mxu0 %v6318_v16  ;;  %4652 = vmatpush3.msra.mxu1 %v6410_v27 }
 0x758   :  { %2272 = vmatmul.mubr.f32.gmra.mxu0 %v7425_v15  ;;  %4643 = vmatmul.mubr.f32.gmra.mxu1 %v6086_v1  ;;  %v7437_v15 = vld [vmem:[#allocation45_spill] sm:$0xff] }
 0x759   :  { %4645 = vmatprep.mubr.f32.mxu1 %v6164_v22  ;;  %2277 = vmatprep.mubr.f32.mxu0 %v7373_v13 }
 0x75a   :  { %4653 = vmatprep.subr.mxu1 %v7373_v13 }
 0x75b   :  { %4654 = vmatpush3.msra.mxu1 %v6412_v5 }
 0x75c   :  { %2278 = vmatmul.mubr.f32.gmra.mxu0 %v7426_v43  ;;  %4646 = vmatmul.mubr.f32.gmra.mxu1 %v6242_v30 }
 0x75d   :  { %4648 = vmatprep.mubr.f32.mxu1 %v6288_v28  ;;  %2283 = vmatprep.mubr.f32.mxu0 %v7373_v13 }
 0x75e   :  { %4655 = vmatprep.subr.mxu1 %v7373_v13 }
 0x75f   :  { %4656 = vmatpush3.msra.mxu1 %v6417_v29 }
 0x760   :  { %2284 = vmatmul.mubr.f32.gmra.mxu0 %v6086_v1  ;;  %v6321_v1 = vld [vmem:[#allocation10 + $0x158] sm:$0xff]  ;;  %4657 = vmatprep.subr.mxu1 %v7373_v13 }
 0x761   :  { %2289 = vmatprep.mubr.f32.mxu0 %v7373_v13  ;;  %2513 = vmatprep.subr.mxu0 %v6321_v1 }
 0x762   :  { %4658 = vmatpush3.msra.mxu1 %v6422_v35 }
 0x763   :  { %4659 = vmatprep.subr.mxu1 %v7373_v13 }
 0x764   :  { %2290 = vmatmul.mubr.f32.gmra.mxu0 %v6164_v22  ;;  %v6324_v22 = vld [vmem:[#allocation10 + $0x150] sm:$0xff]  ;;  %4660 = vmatpush3.msra.mxu1 %v6426_v41 }
 0x765   :  { %2295 = vmatprep.mubr.f32.mxu0 %v7373_v13  ;;  %2514 = vmatpush1.msra.mxu0 %v6324_v22 }
 0x766   :  { %4661 = vmatprep.subr.mxu1 %v7373_v13 }
 0x767   :  { %4662 = vmatpush3.msra.mxu1 %v6430_v47 }
 0x768   :  { %2296 = vmatmul.mubr.f32.gmra.mxu0 %v6242_v30  ;;  %v6327_v30 = vld [vmem:[#allocation10 + $0x140] sm:$0xff]  ;;  %4663 = vmatprep.subr.mxu1 %v7373_v13 }
 0x769   :  { %2301 = vmatprep.mubr.f32.mxu0 %v7373_v13  ;;  %2515 = vmatprep.subr.mxu0 %v6327_v30 }
 0x76a   :  { %2516 = vmatpush1.msra.mxu0 %v6330_v17  ;;  %4664 = vmatpush3.msra.mxu1 %v6434_v48 }
 0x76b   :  { %2517 = vmatprep.subr.mxu0 %v6333_v19  ;;  %4665 = vmatprep.subr.mxu1 %v7373_v13 }
 0x76c   :  { %2302 = vmatmul.mubr.f32.gmra.mxu0 %v6288_v28  ;;  %4666 = vmatpush3.msra.mxu1 %v6438_v49 }
 0x76d   :  { %2307 = vmatprep.mubr.f32.mxu0 %v7373_v13  ;;  %2518 = vmatpush1.msra.mxu0 %v6336_v25 }
 0x76e   :  { %2519 = vmatprep.subr.mxu0 %v6339_v61  ;;  %4667 = vmatprep.subr.mxu1 %v7373_v13 }
 0x76f   :  { %2520 = vmatpush1.msra.mxu0 %v6342_v57  ;;  %4668 = vmatpush3.msra.mxu1 %v6442_v50 }
 0x770   :  { %2521 = vmatprep.subr.mxu0 %v6345_v31  ;;  %4669 = vmatprep.subr.mxu1 %v7373_v13 }
 0x771   :  { %2522 = vmatpush1.msra.mxu0 %v6348_v32  ;;  %4670 = vmatpush3.msra.mxu1 %v6446_v52 }
 0x772   :  { %2523 = vmatprep.subr.mxu0 %v6351_v33  ;;  %4671 = vmatprep.subr.mxu1 %v7373_v13 }
 0x773   :  { %2524 = vmatpush1.msra.mxu0 %v6354_v34  ;;  %4672 = vmatpush3.msra.mxu1 %v6450_v53 }
 0x774   :  { %2525 = vmatprep.subr.mxu0 %v6357_v37  ;;  %4673 = vmatprep.subr.mxu1 %v7373_v13 }
 0x775   :  { %2526 = vmatpush1.msra.mxu0 %v6360_v38  ;;  %4674 = vmatpush3.msra.mxu1 %v6454_v54 }
 0x776   :  { %2527 = vmatprep.subr.mxu0 %v6363_v39  ;;  %4675 = vmatprep.subr.mxu1 %v7373_v13 }
 0x777   :  { %2528 = vmatpush1.msra.mxu0 %v6366_v40  ;;  %4676 = vmatpush3.msra.mxu1 %v6458_v55 }
 0x778   :  { %2529 = vmatprep.subr.mxu0 %v6369_v59  ;;  %4677 = vmatprep.subr.mxu1 %v7373_v13 }
 0x779   :  { %2530 = vmatpush1.msra.mxu0 %v6372_v63  ;;  %4678 = vmatpush3.msra.mxu1 %v6462_v56 }
 0x77a   :  { %2531 = vmatprep.subr.mxu0 %v6375_v24  ;;  %4679 = vmatprep.subr.mxu1 %v7373_v13 }
 0x77b   :  { %2532 = vmatpush1.msra.mxu0 %v6378_v3  ;;  %4680 = vmatpush3.msra.mxu1 %v6466_v45 }
 0x77c   :  { %2533 = vmatprep.subr.mxu0 %v6381_v36  ;;  %4681 = vmatprep.subr.mxu1 %v7373_v13 }
 0x77d   :  { %2534 = vmatpush1.msra.mxu0 %v6384_v23  ;;  %4682 = vmatpush3.msra.mxu1 %v6470_v46 }
 0x77e   :  { %2535 = vmatprep.subr.mxu0 %v6387_v2  ;;  %4686 = vmatprep.subr.mxu1 %v7373_v13 }
 0x77f   :  { %2536 = vmatpush1.msra.mxu0 %v6390_v62 }
 0x780   :  { %2537 = vmatprep.subr.mxu0 %v6393_v4 }
 0x781   :  { %2538 = vmatpush1.msra.mxu0 %v6396_v26 }
 0x782   :  { %2539 = vmatprep.subr.mxu0 %v6399_v0 }
 0x783   :  { %2540 = vmatpush1.msra.mxu0 %v6401_v60 }
 0x784   :  { %2541 = vmatprep.subr.mxu0 %v6403_v8 }
 0x785   :  { %2542 = vmatpush1.msra.mxu0 %v6406_v58 }
 0x786   :  { %2676 = vmatprep.subr.mxu0 %v6315_v20 }
 0x7f3   :  { %v2031_v42 = vpop.f32.mrf.mxu0  ;;  %v2102_v21 = vpop.f32.mrf.mxu1 }
 0x7f4   :  { %v2032_v6 = vadd.f32 %v2031_v42, %v7417_v51  ;;  %v2103_v60 = vadd.f32 %v2102_v21, %v5753_v18  ;;  %v7439_v18 = vld [vmem:[#allocation31_spill] sm:$0xff] }
 0x7f5   :  { %v2033_v7 = vpop.f32.mrf.mxu0  ;;  %v4606_v9 = vpop.f32.mrf.mxu1 }
 0x7f6   :  { %v2106_v11 = vadd.f32 %v2032_v6, %v7436_v10  ;;  %v2034_v14 = vadd.f32 %v2033_v7, %v5737_v44  ;;  %v7438_v9 = vld [vmem:[#allocation48_spill] sm:$0xff] }
 0x7f8   :  { %v3972_v12 = vmul.f32 -1.442695, %v2106_v11  ;;  %v2113_v43 = vadd.f32 %v2034_v14, %v7437_v15 }
 0x7fa   :  { %5047 = vpow2.f32 %v3972_v12  ;;  %v3973_v20 = vmul.f32 -1.442695, %v2113_v43 }
 0x7fc   :  { %5049 = vpow2.f32 %v3973_v20 }
 0x807   :  { %v5048_v58 = vpop.eup %5047 }
 0x808   :  { %v2110_v46 = vadd.f32 1.0, %v5048_v58  ;;  %v7443_v58 = vld [vmem:[#allocation36_spill] sm:$0xff] }
 0x809   :  { %v5050_v8 = vpop.eup %5049 }
 0x80a   :  { %5051 = vrcp.f32 %v2110_v46  ;;  %v2117_v45 = vadd.f32 1.0, %v5050_v8  ;;  %v7442_v8 = vld [vmem:[#allocation34_spill] sm:$0xff] }
 0x80c   :  { %5053 = vrcp.f32 %v2117_v45  ;;  %v7444_v45 = vld [vmem:[#allocation29_spill] sm:$0xff] }
 0x814   :  { %v2267_v46 = vpop.f32.mrf.mxu0 }
 0x816   :  { %v2269_v21 = vpop.f32.mrf.mxu0 }
 0x817   :  { %v5052_v51 = vpop.eup %5051 }
 0x818   :  { %v2120_v42 = vmul.f32 %v5052_v51, %v2103_v60  ;;  %v7441_v60 = vld [vmem:[#allocation32_spill] sm:$0xff]  ;;  %v6555_v14 = vpop.f32.mrf.mxu0 }
 0x819   :  { %v5054_v10 = vpop.eup %5053  ;;  %7445 = vst [vmem:[#allocation37_spill] sm:$0xff] %v6555_v14 }
 0x81a   :  { %v2121_v6 = vadd.f32 %v2120_v42, %v7438_v9  ;;  %v2123_v44 = vsub.f32 1.0, %v5054_v10  ;;  %v2125_v12 = vmul.f32 %v5054_v10, %v6288_v28  ;;  %v7440_v28 = vld [vmem:[#allocation24_spill] sm:$0xff]  ;;  %v6557_v15 = vpop.f32.mrf.mxu0 }
 0x81b   :  { %7446 = vst [vmem:[#allocation47_spill] sm:$0xff] %v6557_v15 }
 0x81c   :  { %5055 = vtanh.f32 %v2121_v6  ;;  %v6559_v43 = vpop.f32.mrf.mxu0  ;;  %v6567_v6 = vpop.f32.mrf.mxu1 }
 0x81d   :  { %7447 = vst [vmem:[#allocation20_spill] sm:$0xff] %v6559_v43  ;;  %7451 = vst [vmem:[#allocation18_spill] sm:$0xff] %v6567_v6 }
 0x81e   :  { %v6561_v51 = vpop.f32.mrf.mxu0 }
 0x81f   :  { %7448 = vst [vmem:[#allocation26_spill] sm:$0xff] %v6561_v51 }
 0x820   :  { %v6563_v42 = vpop.f32.mrf.mxu0 }
 0x821   :  { %7449 = vst [vmem:[#allocation21_spill] sm:$0xff] %v6563_v42 }
 0x822   :  { %v6565_v9 = vpop.f32.mrf.mxu0 }
 0x823   :  { %7450 = vst [vmem:[#allocation25_spill] sm:$0xff] %v6565_v9  ;;  %v2184_v9 = vld [vmem:[%s7252_s7] sm:$0x7] }
 0x824   :  { %v6569_v10 = vpop.f32.mrf.mxu0 }
 0x825   :  { %7452 = vst [vmem:[#allocation23_spill] sm:$0xff] %v6569_v10 }
 0x829   :  { %v5056_v7 = vpop.eup %5055 }
 0x82a   :  { %v2124_v11 = vmul.f32 %v5056_v7, %v2123_v44  ;;  %v2380_v44 = vpop.f32.mrf.mxu1  ;;  %v6571_v7 = vpop.f32.mrf.mxu0 }
 0x82b   :  { %7453 = vst [vmem:[#allocation44_spill] sm:$0xff] %v6571_v7 }
 0x82c   :  { %v2126_v20 = vadd.f32 %v2125_v12, %v2124_v11  ;;  %v6573_v11 = vpop.f32.mrf.mxu1  ;;  %v6575_v12 = vpop.f32.mrf.mxu0 }
 0x82d   :  { %7454 = vst [vmem:[#allocation39_spill] sm:$0xff] %v6573_v11  ;;  %7455 = vst [vmem:[#allocation40_spill] sm:$0xff] %v6575_v12  ;;  %v2443_v12 = vld [vmem:[%s7253_s8] sm:$0x7] }
 0x82e   :  { %2308 = vmatmul.mubr.f32.gmra.mxu0 %v2126_v20  ;;  %4649 = vmatmul.mubr.f32.gmra.mxu1 %v2126_v20  ;;  %v6577_v20 = vpop.f32.mrf.mxu1  ;;  %v6579_v43 = vpop.f32.mrf.mxu0 }
 0x82f   :  { %2575 = vmatprep.mubr.f32.mxu0 %v7373_v13  ;;  %4683 = vmatprep.mubr.msk.f32.mxu1 %vm5302_vm2, %v7373_v13  ;;  %7456 = vst [vmem:[#allocation46_spill] sm:$0xff] %v6577_v20  ;;  %7457 = vst [vmem:[#allocation41_spill] sm:$0xff] %v6579_v43  ;;  %v7464_v43 = vld [vmem:[#allocation27_spill] sm:$0xff] }
 0x830   :  { %v6581_v51 = vpop.f32.mrf.mxu1  ;;  %v6583_v42 = vpop.f32.mrf.mxu0 }
 0x831   :  { %7458 = vst [vmem:[#allocation42_spill] sm:$0xff] %v6581_v51  ;;  %7459 = vst [vmem:[#allocation49_spill] sm:$0xff] %v6583_v42  ;;  %v6600_v51 = vrot.slane %v2184_v9, %v7464_v43  ;;  %v6603_v42 = vrot.slane %v2443_v12, %v7464_v43 }
 0x832   :  { %2576 = vmatmul.mubr.f32.vlgmr.msra.gmra.mxu0 %v7373_v13  ;;  %4684 = vmatmul.mubr.f32.vlgmr.msra.gmra.mxu1 %v7373_v13  ;;  %v6588_v10 = vpop.f32.mrf.mxu1  ;;  %v6590_v6 = vpop.f32.mrf.mxu0 }
 0x833   :  { %2677 = vmatpush1.msra.mxu0 %v6318_v16  ;;  %4687 = vmatpush3.msra.mxu1 %v6410_v27  ;;  %7460 = vst [vmem:[#allocation50_spill] sm:$0xff] %v6588_v10  ;;  %7461 = vst [vmem:[#allocation19_spill] sm:$0xff] %v6590_v6  ;;  %v2268_v14 = vadd.f32 %v2267_v46, %v6600_v51 }
 0x834   :  { %2678 = vmatprep.subr.mxu0 %v6321_v1  ;;  %4688 = vmatprep.subr.mxu1 %v7373_v13  ;;  %7465 = vst [vmem:[#allocation45_spill] sm:$0xff] %v6600_v51  ;;  %7466 = vst [vmem:[#allocation48_spill] sm:$0xff] %v6603_v42 }
 0x835   :  { %2679 = vmatpush1.msra.mxu0 %v6324_v22  ;;  %4689 = vmatpush3.msra.mxu1 %v6412_v5 }
 0x836   :  { %2680 = vmatprep.subr.mxu0 %v6327_v30  ;;  %4690 = vmatprep.subr.mxu1 %v7373_v13 }
 0x837   :  { %2681 = vmatpush1.msra.mxu0 %v6330_v17  ;;  %4691 = vmatpush3.msra.mxu1 %v6417_v29 }
 0x838   :  { %2682 = vmatprep.subr.mxu0 %v6333_v19  ;;  %4692 = vmatprep.subr.mxu1 %v7373_v13 }
 0x839   :  { %2683 = vmatpush1.msra.mxu0 %v6336_v25  ;;  %4693 = vmatpush3.msra.mxu1 %v6422_v35 }
 0x83a   :  { %2684 = vmatprep.subr.mxu0 %v6339_v61  ;;  %4694 = vmatprep.subr.mxu1 %v7373_v13 }
 0x83b   :  { %2685 = vmatpush1.msra.mxu0 %v6342_v57  ;;  %4695 = vmatpush3.msra.mxu1 %v6426_v41 }
 0x83c   :  { %2686 = vmatprep.subr.mxu0 %v6345_v31  ;;  %4696 = vmatprep.subr.mxu1 %v7373_v13 }
 0x83d   :  { %2687 = vmatpush1.msra.mxu0 %v6348_v32  ;;  %4697 = vmatpush3.msra.mxu1 %v6430_v47 }
 0x83e   :  { %2688 = vmatprep.subr.mxu0 %v6351_v33  ;;  %4698 = vmatprep.subr.mxu1 %v7373_v13 }
 0x83f   :  { %2689 = vmatpush1.msra.mxu0 %v6354_v34  ;;  %4699 = vmatpush3.msra.mxu1 %v6434_v48 }
 0x840   :  { %2690 = vmatprep.subr.mxu0 %v6357_v37  ;;  %4700 = vmatprep.subr.mxu1 %v7373_v13 }
 0x841   :  { %2691 = vmatpush1.msra.mxu0 %v6360_v38  ;;  %4701 = vmatpush3.msra.mxu1 %v6438_v49 }
 0x842   :  { %2692 = vmatprep.subr.mxu0 %v6363_v39  ;;  %4702 = vmatprep.subr.mxu1 %v7373_v13 }
 0x843   :  { %2693 = vmatpush1.msra.mxu0 %v6366_v40  ;;  %4703 = vmatpush3.msra.mxu1 %v6442_v50 }
 0x844   :  { %2694 = vmatprep.subr.mxu0 %v6369_v59  ;;  %4704 = vmatprep.subr.mxu1 %v7373_v13 }
 0x845   :  { %2695 = vmatpush1.msra.mxu0 %v6372_v63  ;;  %4705 = vmatpush3.msra.mxu1 %v6446_v52 }
 0x846   :  { %2696 = vmatprep.subr.mxu0 %v6375_v24  ;;  %4706 = vmatprep.subr.mxu1 %v7373_v13 }
 0x847   :  { %2697 = vmatpush1.msra.mxu0 %v6378_v3  ;;  %4707 = vmatpush3.msra.mxu1 %v6450_v53 }
 0x848   :  { %2698 = vmatprep.subr.mxu0 %v6381_v36  ;;  %4708 = vmatprep.subr.mxu1 %v7373_v13 }
 0x849   :  { %2699 = vmatpush1.msra.mxu0 %v6384_v23  ;;  %4709 = vmatpush3.msra.mxu1 %v6454_v54 }
 0x84a   :  { %2700 = vmatprep.subr.mxu0 %v6387_v2  ;;  %4710 = vmatprep.subr.mxu1 %v7373_v13 }
 0x84b   :  { %2701 = vmatpush1.msra.mxu0 %v6390_v62  ;;  %4711 = vmatpush3.msra.mxu1 %v6458_v55 }
 0x84c   :  { %2702 = vmatprep.subr.mxu0 %v6393_v4  ;;  %4712 = vmatprep.subr.mxu1 %v7373_v13 }
 0x84d   :  { %2703 = vmatpush1.msra.mxu0 %v6396_v26  ;;  %4713 = vmatpush3.msra.mxu1 %v6462_v56 }
 0x84e   :  { %2704 = vmatprep.subr.mxu0 %v6399_v0  ;;  %4714 = vmatprep.subr.mxu1 %v7373_v13 }
 0x84f   :  { %2705 = vmatpush1.msra.mxu0 %v7439_v18  ;;  %4715 = vmatpush3.msra.mxu1 %v7440_v28 }
 0x850   :  { %2706 = vmatprep.subr.mxu0 %v7441_v60  ;;  %4716 = vmatprep.subr.mxu1 %v7373_v13 }
 0x851   :  { %2707 = vmatpush1.msra.mxu0 %v7442_v8  ;;  %2740 = vmatprep.mubr.f32.mxu0 %v7373_v13 }
 0x852   :  { %4717 = vmatpush3.msra.mxu1 %v7443_v58  ;;  %4718 = vmatprep.mubr.msk.f32.mxu1 %vm5302_vm2, %v7373_v13  ;;  %v7469_v58 = vld [vmem:[#allocation28_spill] sm:$0xff] }
 0x853   :  { %2841 = vmatprep.subr.mxu0 %v7444_v45  ;;  %4721 = vmatprep.subr.mxu1 %v7373_v13  ;;  %v6615_v60 = vrot.slane %v2184_v9, %v7469_v58 }
 0x8ee   :  { %v6595_v7 = vpop.f32.mrf.mxu0  ;;  %v6597_v11 = vpop.f32.mrf.mxu1 }
 0x8ef   :  { %7462 = vst [vmem:[#allocation22_spill] sm:$0xff] %v6595_v7  ;;  %7463 = vst [vmem:[#allocation43_spill] sm:$0xff] %v6597_v11  ;;  %v6612_v7 = vrot.slane %v2443_v12, %v7469_v58 }
 0x8f0   :  { %v6605_v20 = vpop.f32.mrf.mxu0  ;;  %v6607_v15 = vpop.f32.mrf.mxu1 }
 0x8f1   :  { %7467 = vst [vmem:[#allocation27_spill] sm:$0xff] %v6605_v20  ;;  %7468 = vst [vmem:[#allocation51_spill] sm:$0xff] %v6607_v15  ;;  %v2270_v15 = vadd.f32 %v2269_v21, %v6615_v60 }
 0x8f2   :  { %v2577_v10 = vpop.f32.mrf.mxu0  ;;  %v2648_v6 = vpop.f32.mrf.mxu1 }
 0x8f3   :  { %v2578_v45 = vadd.f32 %v2577_v10, %v6603_v42  ;;  %v7470_v42 = vld [vmem:[#allocation33_spill] sm:$0xff] }
 0x8f4   :  { %v2579_v11 = vpop.f32.mrf.mxu0  ;;  %v4685_v8 = vpop.f32.mrf.mxu1  ;;  %v6620_v51 = vrot.slane %v2443_v12, %v7470_v42 }
 0x8f5   :  { %v2652_v43 = vadd.f32 %v2578_v45, %v2268_v14  ;;  %v2580_v20 = vadd.f32 %v2579_v11, %v6612_v7  ;;  %v6624_v45 = vrot.slane %v2184_v9, %v7470_v42  ;;  %v7472_v42 = vld [vmem:[#allocation38_spill] sm:$0xff]  ;;  %v7473_v9 = vld [vmem:[#allocation31_spill] sm:$0xff] }
 0x8f6   :  { %v2649_v58 = vadd.f32 %v2648_v6, %v6620_v51  ;;  %v7474_v6 = vld [vmem:[#allocation24_spill] sm:$0xff] }
 0x8f7   :  { %v3974_v28 = vmul.f32 -1.442695, %v2652_v43  ;;  %v2659_v18 = vadd.f32 %v2580_v20, %v2270_v15  ;;  %v2381_v21 = vadd.f32 %v2380_v44, %v6624_v45  ;;  %v7475_v44 = vld [vmem:[#allocation32_spill] sm:$0xff] }
 0x8f9   :  { %5057 = vpow2.f32 %v3974_v28  ;;  %v3975_v0 = vmul.f32 -1.442695, %v2659_v18 }
 0x8fb   :  { %5059 = vpow2.f32 %v3975_v0 }
 0x906   :  { %v5058_v46 = vpop.eup %5057 }
 0x907   :  { %v2656_v10 = vadd.f32 1.0, %v5058_v46  ;;  %v7476_v46 = vld [vmem:[#allocation34_spill] sm:$0xff] }
 0x908   :  { %v5060_v8 = vpop.eup %5059 }
 0x909   :  { %5061 = vrcp.f32 %v2656_v10  ;;  %v2663_v56 = vadd.f32 1.0, %v5060_v8  ;;  %v7477_v10 = vld [vmem:[#allocation36_spill] sm:$0xff]  ;;  %v7478_v8 = vld [vmem:[#allocation29_spill] sm:$0xff] }
 0x90b   :  { %5063 = vrcp.f32 %v2663_v56  ;;  %v7471_v56 = vld [vmem:[#allocation35_spill] sm:$0xff] }
 0x916   :  { %v5062_v14 = vpop.eup %5061 }
 0x917   :  { %v2666_v28 = vmul.f32 %v5062_v14, %v2649_v58 }
 0x918   :  { %v5064_v0 = vpop.eup %5063 }
 0x919   :  { %v2667_v18 = vadd.f32 %v2666_v28, %v2381_v21  ;;  %v2669_v15 = vsub.f32 1.0, %v5064_v0  ;;  %v2671_v12 = vmul.f32 0.0, %v5064_v0  ;;  %v7479_v21 = vld [vmem:[#allocation45_spill] sm:$0xff]  ;;  %v7481_v0 = vld [vmem:[#allocation48_spill] sm:$0xff] }
 0x91a   :  { %v7480_v28 = vld [vmem:[#allocation37_spill] sm:$0xff] }
 0x91b   :  { %5065 = vtanh.f32 %v2667_v18  ;;  %v2274_v18 = vadd.f32 %v7480_v28, %v7479_v21 }
 0x928   :  { %v5066_v11 = vpop.eup %5065 }
 0x929   :  { %v2670_v20 = vmul.f32 %v5066_v11, %v2669_v15 }
 0x92b   :  { %v6627_v43 = vadd.f32 %v2671_v12, %v2670_v20 }
 0x92d   :  { %2741 = vmatmul.mubr.f32.vlgmr.msra.gmra.mxu0 %v6627_v43  ;;  %4719 = vmatmul.mubr.f32.vlgmr.msra.gmra.mxu1 %v6627_v43 }
 0x92e   :  { %2842 = vmatpush1.msra.mxu0 %v6318_v16  ;;  %4722 = vmatpush3.msra.mxu1 %v6410_v27 }
 0x92f   :  { %2843 = vmatprep.subr.mxu0 %v6321_v1  ;;  %4723 = vmatprep.subr.mxu1 %v7373_v13 }
 0x930   :  { %2844 = vmatpush1.msra.mxu0 %v6324_v22  ;;  %4724 = vmatpush3.msra.mxu1 %v6412_v5 }
 0x931   :  { %2845 = vmatprep.subr.mxu0 %v6327_v30  ;;  %4725 = vmatprep.subr.mxu1 %v7373_v13 }
 0x932   :  { %2846 = vmatpush1.msra.mxu0 %v6330_v17  ;;  %4726 = vmatpush3.msra.mxu1 %v6417_v29 }
 0x933   :  { %2847 = vmatprep.subr.mxu0 %v6333_v19  ;;  %4727 = vmatprep.subr.mxu1 %v7373_v13 }
 0x934   :  { %2848 = vmatpush1.msra.mxu0 %v6336_v25  ;;  %4728 = vmatpush3.msra.mxu1 %v6422_v35 }
 0x935   :  { %2849 = vmatprep.subr.mxu0 %v6339_v61  ;;  %4729 = vmatprep.subr.mxu1 %v7373_v13 }
 0x936   :  { %2850 = vmatpush1.msra.mxu0 %v6342_v57  ;;  %4730 = vmatpush3.msra.mxu1 %v6426_v41 }
 0x937   :  { %2851 = vmatprep.subr.mxu0 %v6345_v31  ;;  %4731 = vmatprep.subr.mxu1 %v7373_v13 }
 0x938   :  { %2852 = vmatpush1.msra.mxu0 %v6348_v32  ;;  %4732 = vmatpush3.msra.mxu1 %v6430_v47 }
 0x939   :  { %2853 = vmatprep.subr.mxu0 %v6351_v33  ;;  %4733 = vmatprep.subr.mxu1 %v7373_v13 }
 0x93a   :  { %2854 = vmatpush1.msra.mxu0 %v6354_v34  ;;  %4734 = vmatpush3.msra.mxu1 %v6434_v48 }
 0x93b   :  { %2855 = vmatprep.subr.mxu0 %v6357_v37  ;;  %4735 = vmatprep.subr.mxu1 %v7373_v13 }
 0x93c   :  { %2856 = vmatpush1.msra.mxu0 %v6360_v38  ;;  %4736 = vmatpush3.msra.mxu1 %v6438_v49 }
 0x93d   :  { %2857 = vmatprep.subr.mxu0 %v6363_v39  ;;  %4737 = vmatprep.subr.mxu1 %v7373_v13 }
 0x93e   :  { %2858 = vmatpush1.msra.mxu0 %v6366_v40  ;;  %4738 = vmatpush3.msra.mxu1 %v6442_v50 }
 0x93f   :  { %2859 = vmatprep.subr.mxu0 %v6369_v59  ;;  %4739 = vmatprep.subr.mxu1 %v7373_v13 }
 0x940   :  { %2860 = vmatpush1.msra.mxu0 %v6372_v63  ;;  %4740 = vmatpush3.msra.mxu1 %v6446_v52 }
 0x941   :  { %2861 = vmatprep.subr.mxu0 %v6375_v24  ;;  %4741 = vmatprep.subr.mxu1 %v7373_v13 }
 0x942   :  { %2862 = vmatpush1.msra.mxu0 %v6378_v3  ;;  %4742 = vmatpush3.msra.mxu1 %v6450_v53 }
 0x943   :  { %2863 = vmatprep.subr.mxu0 %v6381_v36  ;;  %4743 = vmatprep.subr.mxu1 %v7373_v13 }
 0x944   :  { %2864 = vmatpush1.msra.mxu0 %v6384_v23  ;;  %4744 = vmatpush3.msra.mxu1 %v6454_v54 }
 0x945   :  { %2865 = vmatprep.subr.mxu0 %v6387_v2  ;;  %4745 = vmatprep.subr.mxu1 %v7373_v13 }
 0x946   :  { %2866 = vmatpush1.msra.mxu0 %v6390_v62  ;;  %4746 = vmatpush3.msra.mxu1 %v6458_v55 }
 0x947   :  { %2867 = vmatprep.subr.mxu0 %v6393_v4  ;;  %4747 = vmatprep.subr.mxu1 %v7373_v13 }
 0x948   :  { %2868 = vmatpush1.msra.mxu0 %v6396_v26  ;;  %4748 = vmatpush3.msra.mxu1 %v7471_v56 }
 0x949   :  { %2869 = vmatprep.subr.mxu0 %v7472_v42  ;;  %4749 = vmatprep.subr.mxu1 %v7373_v13 }
 0x94a   :  { %2870 = vmatpush1.msra.mxu0 %v7473_v9  ;;  %4750 = vmatpush3.msra.mxu1 %v7474_v6 }
 0x94b   :  { %2871 = vmatprep.subr.mxu0 %v7475_v44  ;;  %4751 = vmatprep.subr.mxu1 %v7373_v13  ;;  %v7482_v44 = vld [vmem:[#allocation47_spill] sm:$0xff] }
 0x94c   :  { %2872 = vmatpush1.msra.mxu0 %v7476_v46  ;;  %2905 = vmatprep.mubr.f32.mxu0 %v7373_v13  ;;  %v2276_v6 = vadd.f32 %v7482_v44, %v6615_v60 }
 0x94d   :  { %4752 = vmatpush3.msra.mxu1 %v7477_v10  ;;  %4753 = vmatprep.mubr.msk.f32.mxu1 %vm5302_vm2, %v7373_v13 }
 0x94e   :  { %3006 = vmatprep.subr.mxu0 %v7478_v8  ;;  %4756 = vmatprep.subr.mxu1 %v7373_v13 }
 0x9ed   :  { %v2742_v58 = vpop.f32.mrf.mxu0  ;;  %v2813_v14 = vpop.f32.mrf.mxu1 }
 0x9ee   :  { %v2743_v15 = vadd.f32 %v2742_v58, %v7481_v0  ;;  %v2814_v58 = vadd.f32 %v2813_v14, %v6620_v51  ;;  %v7488_v14 = vld [vmem:[#allocation24_spill] sm:$0xff] }
 0x9ef   :  { %v2744_v11 = vpop.f32.mrf.mxu0  ;;  %v4720_v20 = vpop.f32.mrf.mxu1 }
 0x9f0   :  { %v2817_v12 = vadd.f32 %v2743_v15, %v2274_v18  ;;  %v2745_v10 = vadd.f32 %v2744_v11, %v6612_v7  ;;  %v7483_v18 = vld [vmem:[#allocation18_spill] sm:$0xff] }
 0x9f1   :  { %v2386_v15 = vadd.f32 %v7483_v18, %v6624_v45 }
 0x9f2   :  { %v3976_v46 = vmul.f32 -1.442695, %v2817_v12  ;;  %v2824_v8 = vadd.f32 %v2745_v10, %v2276_v6  ;;  %v7490_v12 = vld [vmem:[#allocation34_spill] sm:$0xff] }
 0x9f4   :  { %5067 = vpow2.f32 %v3976_v46  ;;  %v3977_v9 = vmul.f32 -1.442695, %v2824_v8  ;;  %v7487_v8 = vld [vmem:[#allocation31_spill] sm:$0xff] }
 0x9f6   :  { %5069 = vpow2.f32 %v3977_v9 }
 0xa01   :  { %v5068_v42 = vpop.eup %5067 }
 0xa02   :  { %v2821_v56 = vadd.f32 1.0, %v5068_v42 }
 0xa03   :  { %v5070_v26 = vpop.eup %5069 }
 0xa04   :  { %5071 = vrcp.f32 %v2821_v56  ;;  %v2828_v28 = vadd.f32 1.0, %v5070_v26  ;;  %v7484_v26 = vld [vmem:[#allocation30_spill] sm:$0xff] }
 0xa05   :  { %v7486_v56 = vld [vmem:[#allocation38_spill] sm:$0xff] }
 0xa06   :  { %5073 = vrcp.f32 %v2828_v28  ;;  %v7491_v28 = vld [vmem:[#allocation36_spill] sm:$0xff] }
 0xa11   :  { %v5072_v0 = vpop.eup %5071 }
 0xa12   :  { %v2831_v20 = vmul.f32 %v5072_v0, %v2814_v58  ;;  %v7489_v0 = vld [vmem:[#allocation32_spill] sm:$0xff]  ;;  %v7492_v58 = vld [vmem:[#allocation29_spill] sm:$0xff] }
 0xa13   :  { %v5074_v44 = vpop.eup %5073 }
 0xa14   :  { %v2832_v11 = vadd.f32 %v2831_v20, %v2386_v15  ;;  %v2834_v46 = vsub.f32 1.0, %v5074_v44  ;;  %v2836_v9 = vmul.f32 %v5074_v44, %v6627_v43  ;;  %v7485_v43 = vld [vmem:[#allocation35_spill] sm:$0xff]  ;;  %v7493_v20 = vld [vmem:[#allocation20_spill] sm:$0xff] }
 0xa15   :  { %v7494_v44 = vld [vmem:[#allocation48_spill] sm:$0xff] }
 0xa16   :  { %5075 = vtanh.f32 %v2832_v11  ;;  %v2280_v11 = vadd.f32 %v7493_v20, %v7479_v21 }
 0xa23   :  { %v5076_v6 = vpop.eup %5075 }
 0xa24   :  { %v2835_v10 = vmul.f32 %v5076_v6, %v2834_v46 }
 0xa26   :  { %v6708_v42 = vadd.f32 %v2836_v9, %v2835_v10 }
 0xa28   :  { %2906 = vmatmul.mubr.f32.vlgmr.msra.gmra.mxu0 %v6708_v42  ;;  %4754 = vmatmul.mubr.f32.vlgmr.msra.gmra.mxu1 %v6708_v42 }
 0xa29   :  { %3007 = vmatpush1.msra.mxu0 %v6318_v16  ;;  %4757 = vmatpush3.msra.mxu1 %v6410_v27 }
 0xa2a   :  { %3008 = vmatprep.subr.mxu0 %v6321_v1  ;;  %4758 = vmatprep.subr.mxu1 %v7373_v13 }
 0xa2b   :  { %3009 = vmatpush1.msra.mxu0 %v6324_v22  ;;  %4759 = vmatpush3.msra.mxu1 %v6412_v5 }
 0xa2c   :  { %3010 = vmatprep.subr.mxu0 %v6327_v30  ;;  %4760 = vmatprep.subr.mxu1 %v7373_v13 }
 0xa2d   :  { %3011 = vmatpush1.msra.mxu0 %v6330_v17  ;;  %4761 = vmatpush3.msra.mxu1 %v6417_v29 }
 0xa2e   :  { %3012 = vmatprep.subr.mxu0 %v6333_v19  ;;  %4762 = vmatprep.subr.mxu1 %v7373_v13 }
 0xa2f   :  { %3013 = vmatpush1.msra.mxu0 %v6336_v25  ;;  %4763 = vmatpush3.msra.mxu1 %v6422_v35 }
 0xa30   :  { %3014 = vmatprep.subr.mxu0 %v6339_v61  ;;  %4764 = vmatprep.subr.mxu1 %v7373_v13 }
 0xa31   :  { %3015 = vmatpush1.msra.mxu0 %v6342_v57  ;;  %4765 = vmatpush3.msra.mxu1 %v6426_v41 }
 0xa32   :  { %3016 = vmatprep.subr.mxu0 %v6345_v31  ;;  %4766 = vmatprep.subr.mxu1 %v7373_v13 }
 0xa33   :  { %3017 = vmatpush1.msra.mxu0 %v6348_v32  ;;  %4767 = vmatpush3.msra.mxu1 %v6430_v47 }
 0xa34   :  { %3018 = vmatprep.subr.mxu0 %v6351_v33  ;;  %4768 = vmatprep.subr.mxu1 %v7373_v13 }
 0xa35   :  { %3019 = vmatpush1.msra.mxu0 %v6354_v34  ;;  %4769 = vmatpush3.msra.mxu1 %v6434_v48 }
 0xa36   :  { %3020 = vmatprep.subr.mxu0 %v6357_v37  ;;  %4770 = vmatprep.subr.mxu1 %v7373_v13 }
 0xa37   :  { %3021 = vmatpush1.msra.mxu0 %v6360_v38  ;;  %4771 = vmatpush3.msra.mxu1 %v6438_v49 }
 0xa38   :  { %3022 = vmatprep.subr.mxu0 %v6363_v39  ;;  %4772 = vmatprep.subr.mxu1 %v7373_v13 }
 0xa39   :  { %3023 = vmatpush1.msra.mxu0 %v6366_v40  ;;  %4773 = vmatpush3.msra.mxu1 %v6442_v50 }
 0xa3a   :  { %3024 = vmatprep.subr.mxu0 %v6369_v59  ;;  %4774 = vmatprep.subr.mxu1 %v7373_v13 }
 0xa3b   :  { %3025 = vmatpush1.msra.mxu0 %v6372_v63  ;;  %4775 = vmatpush3.msra.mxu1 %v6446_v52 }
 0xa3c   :  { %3026 = vmatprep.subr.mxu0 %v6375_v24  ;;  %4776 = vmatprep.subr.mxu1 %v7373_v13 }
 0xa3d   :  { %3027 = vmatpush1.msra.mxu0 %v6378_v3  ;;  %4777 = vmatpush3.msra.mxu1 %v6450_v53 }
 0xa3e   :  { %3028 = vmatprep.subr.mxu0 %v6381_v36  ;;  %4778 = vmatprep.subr.mxu1 %v7373_v13 }
 0xa3f   :  { %3029 = vmatpush1.msra.mxu0 %v6384_v23  ;;  %4779 = vmatpush3.msra.mxu1 %v6454_v54 }
 0xa40   :  { %3030 = vmatprep.subr.mxu0 %v6387_v2  ;;  %4780 = vmatprep.subr.mxu1 %v7373_v13 }
 0xa41   :  { %3031 = vmatpush1.msra.mxu0 %v6390_v62  ;;  %4781 = vmatpush3.msra.mxu1 %v6458_v55 }
 0xa42   :  { %3032 = vmatprep.subr.mxu0 %v6393_v4  ;;  %4782 = vmatprep.subr.mxu1 %v7373_v13 }
 0xa43   :  { %3033 = vmatpush1.msra.mxu0 %v7484_v26  ;;  %4783 = vmatpush3.msra.mxu1 %v7485_v43 }
 0xa44   :  { %3034 = vmatprep.subr.mxu0 %v7486_v56  ;;  %4784 = vmatprep.subr.mxu1 %v7373_v13 }
 0xa45   :  { %3035 = vmatpush1.msra.mxu0 %v7487_v8  ;;  %4785 = vmatpush3.msra.mxu1 %v7488_v14 }
 0xa46   :  { %3036 = vmatprep.subr.mxu0 %v7489_v0  ;;  %4786 = vmatprep.subr.mxu1 %v7373_v13  ;;  %v7495_v0 = vld [vmem:[#allocation26_spill] sm:$0xff] }
 0xa47   :  { %3037 = vmatpush1.msra.mxu0 %v7490_v12  ;;  %3070 = vmatprep.mubr.f32.mxu0 %v7373_v13  ;;  %v2282_v14 = vadd.f32 %v7495_v0, %v6615_v60 }
 0xa48   :  { %4787 = vmatpush3.msra.mxu1 %v7491_v28  ;;  %4788 = vmatprep.mubr.msk.f32.mxu1 %vm5302_vm2, %v7373_v13 }
 0xa49   :  { %3171 = vmatprep.subr.mxu0 %v7492_v58  ;;  %4791 = vmatprep.subr.mxu1 %v7373_v13 }
 0xae8   :  { %v2907_v18 = vpop.f32.mrf.mxu0  ;;  %v2978_v15 = vpop.f32.mrf.mxu1 }
 0xae9   :  { %v2908_v46 = vadd.f32 %v2907_v18, %v7494_v44  ;;  %v2979_v18 = vadd.f32 %v2978_v15, %v6620_v51  ;;  %v6882_v15 = vld [vmem:[#allocation10 + $0x158] sm:$0xff] }
 0xaea   :  { %v2909_v6 = vpop.f32.mrf.mxu0  ;;  %v4755_v10 = vpop.f32.mrf.mxu1 }
 0xaeb   :  { %v2982_v9 = vadd.f32 %v2908_v46, %v2280_v11  ;;  %v2910_v28 = vadd.f32 %v2909_v6, %v6612_v7  ;;  %v7496_v11 = vld [vmem:[#allocation46_spill] sm:$0xff] }
 0xaec   :  { %v2391_v46 = vadd.f32 %v7496_v11, %v6624_v45  ;;  %v6902_v11 = vld [vmem:[#allocation10 + $0x128] sm:$0xff] }
 0xaed   :  { %v3978_v12 = vmul.f32 -1.442695, %v2982_v9  ;;  %v2989_v58 = vadd.f32 %v2910_v28, %v2282_v14  ;;  %v6889_v9 = vld [vmem:[#allocation10 + $0x160] sm:$0xff] }
 0xaef   :  { %5077 = vpow2.f32 %v3978_v12  ;;  %v3979_v8 = vmul.f32 -1.442695, %v2989_v58  ;;  %v6892_v58 = vld [vmem:[#allocation10 + $0x140] sm:$0xff] }
 0xaf1   :  { %5079 = vpow2.f32 %v3979_v8 }
 0xafc   :  { %v5078_v56 = vpop.eup %5077 }
 0xafd   :  { %v2986_v43 = vadd.f32 1.0, %v5078_v56 }
 0xafe   :  { %v5080_v26 = vpop.eup %5079 }
 0xaff   :  { %5081 = vrcp.f32 %v2986_v43  ;;  %v2993_v20 = vadd.f32 1.0, %v5080_v26  ;;  %v6876_v26 = vld [vmem:[#allocation10 + $0x168] sm:$0xff]  ;;  %v6879_v43 = vld [vmem:[#allocation10 + $0x178] sm:$0xff] }
 0xb01   :  { %5083 = vrcp.f32 %v2993_v20  ;;  %v6896_v20 = vld [vmem:[#allocation10 + $0x138] sm:$0xff] }
 0xb0c   :  { %v5082_v44 = vpop.eup %5081 }
 0xb0d   :  { %v2996_v10 = vmul.f32 %v5082_v44, %v2979_v18  ;;  %v6886_v44 = vld [vmem:[#allocation10 + $0x150] sm:$0xff]  ;;  %v6899_v18 = vld [vmem:[#allocation10 + $0x148] sm:$0xff] }
 0xb0e   :  { %v5084_v0 = vpop.eup %5083 }
 0xb0f   :  { %v2997_v6 = vadd.f32 %v2996_v10, %v2391_v46  ;;  %v2999_v12 = vsub.f32 1.0, %v5084_v0  ;;  %v3001_v8 = vmul.f32 %v5084_v0, %v6708_v42  ;;  %v6906_v46 = vld [vmem:[#allocation10 + $0x120] sm:$0xff]  ;;  %v6909_v10 = vld [vmem:[#allocation10 + $0x130] sm:$0xff]  ;;  %v6916_v0 = vld [vmem:[#allocation10 + $0x108] sm:$0xff] }
 0xb11   :  { %5085 = vtanh.f32 %v2997_v6  ;;  %v6912_v6 = vld [vmem:[#allocation10 + $0x110] sm:$0xff] }
 0xb1e   :  { %v5086_v14 = vpop.eup %5085 }
 0xb1f   :  { %v3000_v28 = vmul.f32 %v5086_v14, %v2999_v12  ;;  %v6919_v12 = vld [vmem:[#allocation10 + $0x118] sm:$0xff] }
 0xb20   :  { %v6922_v14 = vld [vmem:[#allocation10 + $0xf8] sm:$0xff] }
 0xb21   :  { %v6789_v56 = vadd.f32 %v3001_v8, %v3000_v28  ;;  %v6926_v28 = vld [vmem:[#allocation10 + $0xf0] sm:$0xff]  ;;  %v6929_v8 = vld [vmem:[#allocation10 + $0x100] sm:$0xff] }
 0xb23   :  { %3071 = vmatmul.mubr.f32.vlgmr.msra.gmra.mxu0 %v6789_v56  ;;  %4789 = vmatmul.mubr.f32.vlgmr.msra.gmra.mxu1 %v6789_v56 }
 0xb24   :  { %3172 = vmatpush1.msra.mxu0 %v6318_v16  ;;  %4792 = vmatpush3.msra.mxu1 %v6410_v27  ;;  %v7497_v16 = vld [vmem:[#allocation30_spill] sm:$0xff] }
 0xb25   :  { %3173 = vmatprep.subr.mxu0 %v6321_v1  ;;  %4793 = vmatprep.subr.mxu1 %v7373_v13  ;;  %v7498_v1 = vld [vmem:[#allocation35_spill] sm:$0xff] }
 0xb26   :  { %3174 = vmatpush1.msra.mxu0 %v6324_v22  ;;  %4794 = vmatpush3.msra.mxu1 %v6412_v5  ;;  %v7499_v22 = vld [vmem:[#allocation38_spill] sm:$0xff] }
 0xb27   :  { %3175 = vmatprep.subr.mxu0 %v6327_v30  ;;  %4795 = vmatprep.subr.mxu1 %v7373_v13  ;;  %v7500_v30 = vld [vmem:[#allocation31_spill] sm:$0xff] }
 0xb28   :  { %3176 = vmatpush1.msra.mxu0 %v6330_v17  ;;  %4796 = vmatpush3.msra.mxu1 %v6417_v29  ;;  %v7501_v17 = vld [vmem:[#allocation24_spill] sm:$0xff] }
 0xb29   :  { %3177 = vmatprep.subr.mxu0 %v6333_v19  ;;  %4797 = vmatprep.subr.mxu1 %v7373_v13  ;;  %v7502_v19 = vld [vmem:[#allocation32_spill] sm:$0xff] }
 0xb2a   :  { %3178 = vmatpush1.msra.mxu0 %v6336_v25  ;;  %4798 = vmatpush3.msra.mxu1 %v6422_v35  ;;  %v7503_v25 = vld [vmem:[#allocation34_spill] sm:$0xff] }
 0xb2b   :  { %3179 = vmatprep.subr.mxu0 %v6339_v61  ;;  %4799 = vmatprep.subr.mxu1 %v7373_v13  ;;  %v7504_v61 = vld [vmem:[#allocation36_spill] sm:$0xff] }
 0xb2c   :  { %3180 = vmatpush1.msra.mxu0 %v6342_v57  ;;  %4800 = vmatpush3.msra.mxu1 %v6426_v41  ;;  %v6858_v57 = vld [vmem:[#allocation10 + $0x170] sm:$0xff] }
 0xb2d   :  { %3181 = vmatprep.subr.mxu0 %v6345_v31  ;;  %4801 = vmatprep.subr.mxu1 %v7373_v13  ;;  %7505 = vst [vmem:[#allocation28_spill] sm:$0xff] %v6858_v57  ;;  %v7509_v41 = vld [vmem:[#allocation39_spill] sm:$0xff] }
 0xb2e   :  { %3182 = vmatpush1.msra.mxu0 %v6348_v32  ;;  %4802 = vmatpush3.msra.mxu1 %v6430_v47  ;;  %v2396_v47 = vadd.f32 %v7509_v41, %v6624_v45  ;;  %v7030_v41 = vld [vmem:[#allocation10 + $0x10] sm:$0xff] }
 0xb2f   :  { %3183 = vmatprep.subr.mxu0 %v6351_v33  ;;  %4803 = vmatprep.subr.mxu1 %v7373_v13  ;;  %v7506_v33 = vld [vmem:[#allocation21_spill] sm:$0xff]  ;;  %7517 = vst [vmem:[#allocation26_spill] sm:$0xff] %v7030_v41 }
 0xb30   :  { %3184 = vmatpush1.msra.mxu0 %v6354_v34  ;;  %4804 = vmatpush3.msra.mxu1 %v6434_v48  ;;  %v2286_v34 = vadd.f32 %v7506_v33, %v7479_v21  ;;  %v6969_v33 = vld [vmem:[#allocation10 + $0xa0] sm:$0xff] }
 0xb31   :  { %3185 = vmatprep.subr.mxu0 %v6357_v37  ;;  %4805 = vmatprep.subr.mxu1 %v7373_v13  ;;  %v7507_v37 = vld [vmem:[#allocation48_spill] sm:$0xff] }
 0xb32   :  { %3186 = vmatpush1.msra.mxu0 %v6360_v38  ;;  %4806 = vmatpush3.msra.mxu1 %v6438_v49 }
 0xb33   :  { %3187 = vmatprep.subr.mxu0 %v6363_v39  ;;  %4807 = vmatprep.subr.mxu1 %v7373_v13 }
 0xb34   :  { %3188 = vmatpush1.msra.mxu0 %v6366_v40  ;;  %4808 = vmatpush3.msra.mxu1 %v6442_v50 }
 0xb35   :  { %3189 = vmatprep.subr.mxu0 %v6369_v59  ;;  %4809 = vmatprep.subr.mxu1 %v7373_v13 }
 0xb36   :  { %3190 = vmatpush1.msra.mxu0 %v6372_v63  ;;  %4810 = vmatpush3.msra.mxu1 %v6446_v52 }
 0xb37   :  { %3191 = vmatprep.subr.mxu0 %v6375_v24  ;;  %4811 = vmatprep.subr.mxu1 %v7373_v13 }
 0xb38   :  { %3192 = vmatpush1.msra.mxu0 %v6378_v3  ;;  %4812 = vmatpush3.msra.mxu1 %v6450_v53  ;;  %v7508_v3 = vld [vmem:[#allocation25_spill] sm:$0xff] }
 0xb39   :  { %3193 = vmatprep.subr.mxu0 %v6381_v36  ;;  %4813 = vmatprep.subr.mxu1 %v7373_v13  ;;  %v2288_v36 = vadd.f32 %v7508_v3, %v6615_v60  ;;  %v6996_v3 = vld [vmem:[#allocation10 + $0x48] sm:$0xff] }
 0xb3a   :  { %3194 = vmatpush1.msra.mxu0 %v6384_v23  ;;  %4814 = vmatpush3.msra.mxu1 %v6454_v54 }
 0xb3b   :  { %3195 = vmatprep.subr.mxu0 %v6387_v2  ;;  %4815 = vmatprep.subr.mxu1 %v7373_v13 }
 0xb3c   :  { %3196 = vmatpush1.msra.mxu0 %v6390_v62  ;;  %4816 = vmatpush3.msra.mxu1 %v6458_v55 }
 0xb3d   :  { %3197 = vmatprep.subr.mxu0 %v6393_v4  ;;  %4817 = vmatprep.subr.mxu1 %v7373_v13 }
 0xb3e   :  { %3198 = vmatpush1.msra.mxu0 %v7497_v16  ;;  %4818 = vmatpush3.msra.mxu1 %v7498_v1  ;;  %v6936_v16 = vld [vmem:[#allocation10 + $0xd8] sm:$0xff]  ;;  %v6939_v1 = vld [vmem:[#allocation10 + $0xe8] sm:$0xff] }
 0xb3f   :  { %3199 = vmatprep.subr.mxu0 %v7499_v22  ;;  %4819 = vmatprep.subr.mxu1 %v7373_v13  ;;  %v6942_v22 = vld [vmem:[#allocation10 + $0xc8] sm:$0xff] }
 0xb40   :  { %3200 = vmatpush1.msra.mxu0 %v7500_v30  ;;  %4820 = vmatpush3.msra.mxu1 %v7501_v17  ;;  %v6946_v30 = vld [vmem:[#allocation10 + $0xc0] sm:$0xff]  ;;  %v6949_v17 = vld [vmem:[#allocation10 + $0xd0] sm:$0xff] }
 0xb41   :  { %3201 = vmatprep.subr.mxu0 %v7502_v19  ;;  %4821 = vmatprep.subr.mxu1 %v7373_v13  ;;  %v6952_v19 = vld [vmem:[#allocation10 + $0xb0] sm:$0xff] }
 0xb42   :  { %3202 = vmatpush1.msra.mxu0 %v7503_v25  ;;  %3235 = vmatprep.mubr.f32.mxu0 %v7373_v13  ;;  %v6956_v25 = vld [vmem:[#allocation10 + $0xa8] sm:$0xff] }
 0xb43   :  { %4822 = vmatpush3.msra.mxu1 %v7504_v61  ;;  %4823 = vmatprep.mubr.msk.f32.mxu1 %vm5302_vm2, %v7373_v13  ;;  %v6959_v61 = vld [vmem:[#allocation10 + $0xb8] sm:$0xff] }
 0xb44   :  { %3336 = vmatprep.subr.mxu0 %v6858_v57  ;;  %4826 = vmatprep.subr.mxu1 %v7373_v13 }
 0xbe3   :  { %v3072_v31 = vpop.f32.mrf.mxu0  ;;  %v3143_v32 = vpop.f32.mrf.mxu1 }
 0xbe4   :  { %v3073_v38 = vadd.f32 %v3072_v31, %v7507_v37  ;;  %v3144_v29 = vadd.f32 %v3143_v32, %v6620_v51  ;;  %v6962_v31 = vld [vmem:[#allocation10 + $0x98] sm:$0xff]  ;;  %v6966_v32 = vld [vmem:[#allocation10 + $0x90] sm:$0xff] }
 0xbe5   :  { %v3074_v39 = vpop.f32.mrf.mxu0  ;;  %v4790_v40 = vpop.f32.mrf.mxu1 }
 0xbe6   :  { %v3147_v59 = vadd.f32 %v3073_v38, %v2286_v34  ;;  %v3075_v24 = vadd.f32 %v3074_v39, %v6612_v7  ;;  %v6972_v34 = vld [vmem:[#allocation10 + $0x80] sm:$0xff]  ;;  %v6976_v38 = vld [vmem:[#allocation10 + $0x78] sm:$0xff]  ;;  %v6979_v39 = vld [vmem:[#allocation10 + $0x88] sm:$0xff] }
 0xbe7   :  { %v6982_v40 = vld [vmem:[#allocation10 + $0x68] sm:$0xff] }
 0xbe8   :  { %v3980_v63 = vmul.f32 -1.442695, %v3147_v59  ;;  %v3154_v23 = vadd.f32 %v3075_v24, %v2288_v36  ;;  %v6986_v59 = vld [vmem:[#allocation10 + $0x60] sm:$0xff]  ;;  %v6992_v24 = vld [vmem:[#allocation10 + $0x50] sm:$0xff]  ;;  %v6999_v36 = vld [vmem:[#allocation10 + $0x58] sm:$0xff] }
 0xbea   :  { %5087 = vpow2.f32 %v3980_v63  ;;  %v3981_v2 = vmul.f32 -1.442695, %v3154_v23  ;;  %v6989_v63 = vld [vmem:[#allocation10 + $0x70] sm:$0xff]  ;;  %v7002_v23 = vld [vmem:[#allocation10 + $0x38] sm:$0xff] }
 0xbec   :  { %5089 = vpow2.f32 %v3981_v2  ;;  %v7006_v2 = vld [vmem:[#allocation10 + $0x30] sm:$0xff] }
 0xbed   :  { %7510 = vst [vmem:[#allocation33_spill] sm:$0xff] %v7006_v2 }
 0xbf7   :  { %v5088_v62 = vpop.eup %5087 }
 0xbf8   :  { %v3151_v4 = vadd.f32 1.0, %v5088_v62  ;;  %v7009_v62 = vld [vmem:[#allocation10 + $0x40] sm:$0xff] }
 0xbf9   :  { %v5090_v27 = vpop.eup %5089  ;;  %7511 = vst [vmem:[#allocation45_spill] sm:$0xff] %v7009_v62 }
 0xbfa   :  { %5091 = vrcp.f32 %v3151_v4  ;;  %v3158_v5 = vadd.f32 1.0, %v5090_v27  ;;  %v7012_v4 = vld [vmem:[#allocation10 + $0x20] sm:$0xff]  ;;  %v7016_v27 = vld [vmem:[#allocation10 + $0x18] sm:$0xff] }
 0xbfb   :  { %7512 = vst [vmem:[#allocation37_spill] sm:$0xff] %v7012_v4  ;;  %7513 = vst [vmem:[#allocation47_spill] sm:$0xff] %v7016_v27 }
 0xbfc   :  { %5093 = vrcp.f32 %v3158_v5  ;;  %v7019_v5 = vld [vmem:[#allocation10 + $0x28] sm:$0xff] }
 0xbfd   :  { %7514 = vst [vmem:[#allocation18_spill] sm:$0xff] %v7019_v5 }
 0xc07   :  { %v5092_v35 = vpop.eup %5091 }
 0xc08   :  { %v3161_v48 = vmul.f32 %v5092_v35, %v3144_v29  ;;  %v7022_v29 = vld [vmem:[#allocation10 + $0x8] sm:$0xff]  ;;  %v7026_v35 = vld [vmem:[#allocation10] sm:$0xff] }
 0xc09   :  { %v5094_v50 = vpop.eup %5093  ;;  %7515 = vst [vmem:[#allocation29_spill] sm:$0xff] %v7022_v29  ;;  %7516 = vst [vmem:[#allocation20_spill] sm:$0xff] %v7026_v35 }
 0xc0a   :  { %v3162_v49 = vadd.f32 %v3161_v48, %v2396_v47  ;;  %v3164_v52 = vsub.f32 1.0, %v5094_v50  ;;  %v3166_v55 = vmul.f32 %v5094_v50, %v6789_v56  ;;  %v6932_v56 = vld [vmem:[#allocation10 + $0xe0] sm:$0xff] }
 0xc0c   :  { %5095 = vtanh.f32 %v3162_v49  ;;  %v7518_v49 = vld [vmem:[#allocation23_spill] sm:$0xff] }
 0xc0d   :  { %v2292_v50 = vadd.f32 %v7518_v49, %v7479_v21 }
 0xc19   :  { %v5096_v53 = vpop.eup %5095 }
 0xc1a   :  { %v3165_v54 = vmul.f32 %v5096_v53, %v3164_v52 }
 0xc1c   :  { %v6872_v42 = vadd.f32 %v3166_v55, %v3165_v54 }
 0xc1e   :  { %3236 = vmatmul.mubr.f32.vlgmr.msra.gmra.mxu0 %v6872_v42  ;;  %4824 = vmatmul.mubr.f32.vlgmr.msra.gmra.mxu1 %v6872_v42 }
 0xc1f   :  { %3337 = vmatpush1.msra.mxu0 %v6876_v26  ;;  %4827 = vmatpush3.msra.mxu1 %v6879_v43 }
 0xc20   :  { %3338 = vmatprep.subr.mxu0 %v6882_v15  ;;  %4828 = vmatprep.subr.mxu1 %v7373_v13 }
 0xc21   :  { %3339 = vmatpush1.msra.mxu0 %v6886_v44  ;;  %4829 = vmatpush3.msra.mxu1 %v6889_v9 }
 0xc22   :  { %3340 = vmatprep.subr.mxu0 %v6892_v58  ;;  %4830 = vmatprep.subr.mxu1 %v7373_v13 }
 0xc23   :  { %3341 = vmatpush1.msra.mxu0 %v6896_v20  ;;  %4831 = vmatpush3.msra.mxu1 %v6899_v18 }
 0xc24   :  { %3342 = vmatprep.subr.mxu0 %v6902_v11  ;;  %4832 = vmatprep.subr.mxu1 %v7373_v13 }
 0xc25   :  { %3343 = vmatpush1.msra.mxu0 %v6906_v46  ;;  %4833 = vmatpush3.msra.mxu1 %v6909_v10 }
 0xc26   :  { %3344 = vmatprep.subr.mxu0 %v6912_v6  ;;  %4834 = vmatprep.subr.mxu1 %v7373_v13 }
 0xc27   :  { %3345 = vmatpush1.msra.mxu0 %v6916_v0  ;;  %4835 = vmatpush3.msra.mxu1 %v6919_v12 }
 0xc28   :  { %3346 = vmatprep.subr.mxu0 %v6922_v14  ;;  %4836 = vmatprep.subr.mxu1 %v7373_v13 }
 0xc29   :  { %3347 = vmatpush1.msra.mxu0 %v6926_v28  ;;  %4837 = vmatpush3.msra.mxu1 %v6929_v8 }
 0xc2a   :  { %3348 = vmatprep.subr.mxu0 %v6932_v56  ;;  %4838 = vmatprep.subr.mxu1 %v7373_v13 }
 0xc2b   :  { %3349 = vmatpush1.msra.mxu0 %v6936_v16  ;;  %4839 = vmatpush3.msra.mxu1 %v6939_v1 }
 0xc2c   :  { %3350 = vmatprep.subr.mxu0 %v6942_v22  ;;  %4840 = vmatprep.subr.mxu1 %v7373_v13 }
 0xc2d   :  { %3351 = vmatpush1.msra.mxu0 %v6946_v30  ;;  %4841 = vmatpush3.msra.mxu1 %v6949_v17 }
 0xc2e   :  { %3352 = vmatprep.subr.mxu0 %v6952_v19  ;;  %4842 = vmatprep.subr.mxu1 %v7373_v13 }
 0xc2f   :  { %3353 = vmatpush1.msra.mxu0 %v6956_v25  ;;  %4843 = vmatpush3.msra.mxu1 %v6959_v61 }
 0xc30   :  { %3354 = vmatprep.subr.mxu0 %v6962_v31  ;;  %4844 = vmatprep.subr.mxu1 %v7373_v13 }
 0xc31   :  { %3355 = vmatpush1.msra.mxu0 %v6966_v32  ;;  %4845 = vmatpush3.msra.mxu1 %v6969_v33 }
 0xc32   :  { %3356 = vmatprep.subr.mxu0 %v6972_v34  ;;  %4846 = vmatprep.subr.mxu1 %v7373_v13 }
 0xc33   :  { %3357 = vmatpush1.msra.mxu0 %v6976_v38  ;;  %4847 = vmatpush3.msra.mxu1 %v6979_v39 }
 0xc34   :  { %3358 = vmatprep.subr.mxu0 %v6982_v40  ;;  %4848 = vmatprep.subr.mxu1 %v7373_v13 }
 0xc35   :  { %3359 = vmatpush1.msra.mxu0 %v6986_v59  ;;  %4849 = vmatpush3.msra.mxu1 %v6989_v63 }
 0xc36   :  { %3360 = vmatprep.subr.mxu0 %v6992_v24  ;;  %4850 = vmatprep.subr.mxu1 %v7373_v13 }
 0xc37   :  { %3361 = vmatpush1.msra.mxu0 %v6996_v3  ;;  %4851 = vmatpush3.msra.mxu1 %v6999_v36 }
 0xc38   :  { %3362 = vmatprep.subr.mxu0 %v7002_v23  ;;  %4852 = vmatprep.subr.mxu1 %v7373_v13 }
 0xc39   :  { %3363 = vmatpush1.msra.mxu0 %v7006_v2  ;;  %4853 = vmatpush3.msra.mxu1 %v7009_v62 }
 0xc3a   :  { %3364 = vmatprep.subr.mxu0 %v7012_v4  ;;  %4854 = vmatprep.subr.mxu1 %v7373_v13 }
 0xc3b   :  { %3365 = vmatpush1.msra.mxu0 %v7016_v27  ;;  %4855 = vmatpush3.msra.mxu1 %v7019_v5 }
 0xc3c   :  { %3366 = vmatprep.subr.mxu0 %v7022_v29  ;;  %4856 = vmatprep.subr.mxu1 %v7373_v13  ;;  %v7519_v29 = vld [vmem:[#allocation44_spill] sm:$0xff] }
 0xc3d   :  { %3367 = vmatpush1.msra.mxu0 %v7026_v35  ;;  %3400 = vmatprep.mubr.f32.mxu0 %v7373_v13  ;;  %v2294_v5 = vadd.f32 %v7519_v29, %v6615_v60 }
 0xc3e   :  { %4857 = vmatpush3.msra.mxu1 %v7030_v41  ;;  %4858 = vmatprep.mubr.msk.f32.mxu1 %vm5302_vm2, %v7373_v13 }
 0xc3f   :  { %3501 = vmatprep.subr.mxu0 %v6858_v57  ;;  %4861 = vmatprep.subr.mxu1 %v7373_v13 }
 0xcde   :  { %v3237_v47 = vpop.f32.mrf.mxu0  ;;  %v3308_v48 = vpop.f32.mrf.mxu1 }
 0xcdf   :  { %v3238_v52 = vadd.f32 %v3237_v47, %v7507_v37  ;;  %v3309_v47 = vadd.f32 %v3308_v48, %v6620_v51  ;;  %v7526_v48 = vld [vmem:[#allocation29_spill] sm:$0xff] }
 0xce0   :  { %v3239_v53 = vpop.f32.mrf.mxu0  ;;  %v4825_v54 = vpop.f32.mrf.mxu1 }
 0xce1   :  { %v3312_v55 = vadd.f32 %v3238_v52, %v2292_v50  ;;  %v3240_v41 = vadd.f32 %v3239_v53, %v6612_v7  ;;  %v7520_v50 = vld [vmem:[#allocation50_spill] sm:$0xff] }
 0xce2   :  { %v2401_v52 = vadd.f32 %v7520_v50, %v6624_v45 }
 0xce3   :  { %v3982_v35 = vmul.f32 -1.442695, %v3312_v55  ;;  %v3319_v57 = vadd.f32 %v3240_v41, %v2294_v5  ;;  %v7525_v41 = vld [vmem:[#allocation18_spill] sm:$0xff]  ;;  %v7527_v55 = vld [vmem:[#allocation20_spill] sm:$0xff] }
 0xce5   :  { %5097 = vpow2.f32 %v3982_v35  ;;  %v3983_v27 = vmul.f32 -1.442695, %v3319_v57 }
 0xce7   :  { %5099 = vpow2.f32 %v3983_v27 }
 0xcf2   :  { %v5098_v4 = vpop.eup %5097 }
 0xcf3   :  { %v3316_v62 = vadd.f32 1.0, %v5098_v4 }
 0xcf4   :  { %v5100_v2 = vpop.eup %5099 }
 0xcf5   :  { %5101 = vrcp.f32 %v3316_v62  ;;  %v3323_v49 = vadd.f32 1.0, %v5100_v2  ;;  %v7523_v2 = vld [vmem:[#allocation37_spill] sm:$0xff]  ;;  %v7524_v62 = vld [vmem:[#allocation47_spill] sm:$0xff] }
 0xcf7   :  { %5103 = vrcp.f32 %v3323_v49  ;;  %v7528_v49 = vld [vmem:[#allocation26_spill] sm:$0xff] }
 0xd02   :  { %v5102_v37 = vpop.eup %5101 }
 0xd03   :  { %v3326_v54 = vmul.f32 %v5102_v37, %v3309_v47  ;;  %v7521_v37 = vld [vmem:[#allocation33_spill] sm:$0xff]  ;;  %v7529_v47 = vld [vmem:[#allocation28_spill] sm:$0xff] }
 0xd04   :  { %v5104_v29 = vpop.eup %5103 }
 0xd05   :  { %v3327_v53 = vadd.f32 %v3326_v54, %v2401_v52  ;;  %v3329_v35 = vsub.f32 1.0, %v5104_v29  ;;  %v3331_v27 = vmul.f32 %v5104_v29, %v6872_v42  ;;  %v7522_v42 = vld [vmem:[#allocation45_spill] sm:$0xff]  ;;  %v7530_v54 = vld [vmem:[#allocation40_spill] sm:$0xff] }
 0xd06   :  { %v7531_v29 = vld [vmem:[#allocation48_spill] sm:$0xff] }
 0xd07   :  { %5105 = vtanh.f32 %v3327_v53  ;;  %v2298_v53 = vadd.f32 %v7530_v54, %v7479_v21 }
 0xd14   :  { %v5106_v5 = vpop.eup %5105 }
 0xd15   :  { %v3330_v57 = vmul.f32 %v5106_v5, %v3329_v35 }
 0xd17   :  { %v7047_v4 = vadd.f32 %v3331_v27, %v3330_v57 }
 0xd19   :  { %3401 = vmatmul.mubr.f32.vlgmr.msra.gmra.mxu0 %v7047_v4  ;;  %4859 = vmatmul.mubr.f32.vlgmr.msra.gmra.mxu1 %v7047_v4 }
 0xd1a   :  { %3502 = vmatpush1.msra.mxu0 %v6876_v26  ;;  %4862 = vmatpush3.msra.mxu1 %v6879_v43 }
 0xd1b   :  { %3503 = vmatprep.subr.mxu0 %v6882_v15  ;;  %4863 = vmatprep.subr.mxu1 %v7373_v13 }
 0xd1c   :  { %3504 = vmatpush1.msra.mxu0 %v6886_v44  ;;  %4864 = vmatpush3.msra.mxu1 %v6889_v9 }
 0xd1d   :  { %3505 = vmatprep.subr.mxu0 %v6892_v58  ;;  %4865 = vmatprep.subr.mxu1 %v7373_v13 }
 0xd1e   :  { %3506 = vmatpush1.msra.mxu0 %v6896_v20  ;;  %4866 = vmatpush3.msra.mxu1 %v6899_v18 }
 0xd1f   :  { %3507 = vmatprep.subr.mxu0 %v6902_v11  ;;  %4867 = vmatprep.subr.mxu1 %v7373_v13 }
 0xd20   :  { %3508 = vmatpush1.msra.mxu0 %v6906_v46  ;;  %4868 = vmatpush3.msra.mxu1 %v6909_v10 }
 0xd21   :  { %3509 = vmatprep.subr.mxu0 %v6912_v6  ;;  %4869 = vmatprep.subr.mxu1 %v7373_v13 }
 0xd22   :  { %3510 = vmatpush1.msra.mxu0 %v6916_v0  ;;  %4870 = vmatpush3.msra.mxu1 %v6919_v12 }
 0xd23   :  { %3511 = vmatprep.subr.mxu0 %v6922_v14  ;;  %4871 = vmatprep.subr.mxu1 %v7373_v13 }
 0xd24   :  { %3512 = vmatpush1.msra.mxu0 %v6926_v28  ;;  %4872 = vmatpush3.msra.mxu1 %v6929_v8 }
 0xd25   :  { %3513 = vmatprep.subr.mxu0 %v6932_v56  ;;  %4873 = vmatprep.subr.mxu1 %v7373_v13 }
 0xd26   :  { %3514 = vmatpush1.msra.mxu0 %v6936_v16  ;;  %4874 = vmatpush3.msra.mxu1 %v6939_v1 }
 0xd27   :  { %3515 = vmatprep.subr.mxu0 %v6942_v22  ;;  %4875 = vmatprep.subr.mxu1 %v7373_v13 }
 0xd28   :  { %3516 = vmatpush1.msra.mxu0 %v6946_v30  ;;  %4876 = vmatpush3.msra.mxu1 %v6949_v17 }
 0xd29   :  { %3517 = vmatprep.subr.mxu0 %v6952_v19  ;;  %4877 = vmatprep.subr.mxu1 %v7373_v13 }
 0xd2a   :  { %3518 = vmatpush1.msra.mxu0 %v6956_v25  ;;  %4878 = vmatpush3.msra.mxu1 %v6959_v61 }
 0xd2b   :  { %3519 = vmatprep.subr.mxu0 %v6962_v31  ;;  %4879 = vmatprep.subr.mxu1 %v7373_v13 }
 0xd2c   :  { %3520 = vmatpush1.msra.mxu0 %v6966_v32  ;;  %4880 = vmatpush3.msra.mxu1 %v6969_v33 }
 0xd2d   :  { %3521 = vmatprep.subr.mxu0 %v6972_v34  ;;  %4881 = vmatprep.subr.mxu1 %v7373_v13 }
 0xd2e   :  { %3522 = vmatpush1.msra.mxu0 %v6976_v38  ;;  %4882 = vmatpush3.msra.mxu1 %v6979_v39 }
 0xd2f   :  { %3523 = vmatprep.subr.mxu0 %v6982_v40  ;;  %4883 = vmatprep.subr.mxu1 %v7373_v13 }
 0xd30   :  { %3524 = vmatpush1.msra.mxu0 %v6986_v59  ;;  %4884 = vmatpush3.msra.mxu1 %v6989_v63 }
 0xd31   :  { %3525 = vmatprep.subr.mxu0 %v6992_v24  ;;  %4885 = vmatprep.subr.mxu1 %v7373_v13 }
 0xd32   :  { %3526 = vmatpush1.msra.mxu0 %v6996_v3  ;;  %4886 = vmatpush3.msra.mxu1 %v6999_v36 }
 0xd33   :  { %3527 = vmatprep.subr.mxu0 %v7002_v23  ;;  %4887 = vmatprep.subr.mxu1 %v7373_v13 }
 0xd34   :  { %3528 = vmatpush1.msra.mxu0 %v7521_v37  ;;  %4888 = vmatpush3.msra.mxu1 %v7522_v42 }
 0xd35   :  { %3529 = vmatprep.subr.mxu0 %v7523_v2  ;;  %4889 = vmatprep.subr.mxu1 %v7373_v13 }
 0xd36   :  { %3530 = vmatpush1.msra.mxu0 %v7524_v62  ;;  %4890 = vmatpush3.msra.mxu1 %v7525_v41 }
 0xd37   :  { %3531 = vmatprep.subr.mxu0 %v7526_v48  ;;  %4891 = vmatprep.subr.mxu1 %v7373_v13  ;;  %v7532_v48 = vld [vmem:[#allocation41_spill] sm:$0xff] }
 0xd38   :  { %3532 = vmatpush1.msra.mxu0 %v7527_v55  ;;  %3565 = vmatprep.mubr.f32.mxu0 %v7373_v13  ;;  %v2300_v41 = vadd.f32 %v7532_v48, %v6615_v60 }
 0xd39   :  { %4892 = vmatpush3.msra.mxu1 %v7528_v49  ;;  %4893 = vmatprep.mubr.msk.f32.mxu1 %vm5302_vm2, %v7373_v13 }
 0xd3a   :  { %3666 = vmatprep.subr.mxu0 %v7529_v47  ;;  %4896 = vmatprep.subr.mxu1 %v7373_v13 }
 0xdd9   :  { %v3402_v50 = vpop.f32.mrf.mxu0  ;;  %v3473_v52 = vpop.f32.mrf.mxu1 }
 0xdda   :  { %v3403_v35 = vadd.f32 %v3402_v50, %v7531_v29  ;;  %v3474_v50 = vadd.f32 %v3473_v52, %v6620_v51  ;;  %v3840_v52 = vld [vmem:[#allocation11 + $0x60] sm:$0xff] }
 0xddb   :  { %v3404_v5 = vpop.f32.mrf.mxu0  ;;  %v4860_v57 = vpop.f32.mrf.mxu1 }
 0xddc   :  { %v3477_v27 = vadd.f32 %v3403_v35, %v2298_v53  ;;  %v3405_v49 = vadd.f32 %v3404_v5, %v6612_v7  ;;  %v7533_v53 = vld [vmem:[#allocation42_spill] sm:$0xff] }
 0xddd   :  { %v2406_v35 = vadd.f32 %v7533_v53, %v6624_v45  ;;  %v3834_v53 = vld [vmem:[#allocation11 + $0x30] sm:$0xff] }
 0xdde   :  { %v3984_v55 = vmul.f32 -1.442695, %v3477_v27  ;;  %v3484_v47 = vadd.f32 %v3405_v49, %v2300_v41  ;;  %v3838_v27 = vld [vmem:[#allocation11 + $0x50] sm:$0xff] }
 0xde0   :  { %5107 = vpow2.f32 %v3984_v55  ;;  %v3985_v62 = vmul.f32 -1.442695, %v3484_v47  ;;  %v3837_v47 = vld [vmem:[#allocation11 + $0x48] sm:$0xff] }
 0xde2   :  { %5109 = vpow2.f32 %v3985_v62 }
 0xded   :  { %v5108_v2 = vpop.eup %5107 }
 0xdee   :  { %v3481_v42 = vadd.f32 1.0, %v5108_v2 }
 0xdef   :  { %v5110_v37 = vpop.eup %5109 }
 0xdf0   :  { %5111 = vrcp.f32 %v3481_v42  ;;  %v3488_v54 = vadd.f32 1.0, %v5110_v37  ;;  %v3842_v37 = vld [vmem:[#allocation11 + $0x70] sm:$0xff]  ;;  %v3841_v42 = vld [vmem:[#allocation11 + $0x68] sm:$0xff] }
 0xdf2   :  { %5113 = vrcp.f32 %v3488_v54  ;;  %v3836_v54 = vld [vmem:[#allocation11 + $0x40] sm:$0xff] }
 0xdfd   :  { %v5112_v29 = vpop.eup %5111 }
 0xdfe   :  { %v3491_v57 = vmul.f32 %v5112_v29, %v3474_v50  ;;  %v3839_v29 = vld [vmem:[#allocation11 + $0x58] sm:$0xff] }
 0xdff   :  { %v5114_v48 = vpop.eup %5113  ;;  %v3835_v50 = vld [vmem:[#allocation11 + $0x38] sm:$0xff] }
 0xe00   :  { %v3492_v5 = vadd.f32 %v3491_v57, %v2406_v35  ;;  %v3494_v55 = vsub.f32 1.0, %v5114_v48  ;;  %v3496_v62 = vmul.f32 %v5114_v48, %v7047_v4  ;;  %v3843_v4 = vld [vmem:[#allocation11 + $0x78] sm:$0xff]  ;;  %v3833_v35 = vld [vmem:[#allocation11 + $0x28] sm:$0xff]  ;;  %v3832_v57 = vld [vmem:[#allocation11 + $0x20] sm:$0xff] }
 0xe01   :  { %v3830_v48 = vld [vmem:[#allocation11 + $0x10] sm:$0xff] }
 0xe02   :  { %5115 = vtanh.f32 %v3492_v5  ;;  %v3831_v5 = vld [vmem:[#allocation11 + $0x18] sm:$0xff] }
 0xe0f   :  { %v5116_v41 = vpop.eup %5115 }
 0xe10   :  { %v3495_v49 = vmul.f32 %v5116_v41, %v3494_v55  ;;  %v3829_v55 = vld [vmem:[#allocation11 + $0x8] sm:$0xff]  ;;  %v3828_v41 = vld [vmem:[#allocation11] sm:$0xff] }
 0xe12   :  { %v7128_v2 = vadd.f32 %v3496_v62, %v3495_v49 }
 0xe14   :  { %3566 = vmatmul.mubr.f32.vlgmr.msra.gmra.mxu0 %v7128_v2  ;;  %4894 = vmatmul.mubr.f32.vlgmr.msra.gmra.mxu1 %v7128_v2 }
 0xe15   :  { %3667 = vmatpush1.msra.mxu0 %v6876_v26  ;;  %4897 = vmatpush3.msra.mxu1 %v6879_v43  ;;  %v7534_v26 = vld [vmem:[#allocation33_spill] sm:$0xff] }
 0xe16   :  { %3668 = vmatprep.subr.mxu0 %v6882_v15  ;;  %4898 = vmatprep.subr.mxu1 %v7373_v13  ;;  %v7535_v43 = vld [vmem:[#allocation45_spill] sm:$0xff] }
 0xe17   :  { %3669 = vmatpush1.msra.mxu0 %v6886_v44  ;;  %4899 = vmatpush3.msra.mxu1 %v6889_v9  ;;  %v7536_v15 = vld [vmem:[#allocation37_spill] sm:$0xff]  ;;  %v7537_v44 = vld [vmem:[#allocation47_spill] sm:$0xff]  ;;  %v7538_v9 = vld [vmem:[#allocation18_spill] sm:$0xff] }
 0xe18   :  { %3670 = vmatprep.subr.mxu0 %v6892_v58  ;;  %4900 = vmatprep.subr.mxu1 %v7373_v13  ;;  %v7539_v58 = vld [vmem:[#allocation29_spill] sm:$0xff] }
 0xe19   :  { %3671 = vmatpush1.msra.mxu0 %v6896_v20  ;;  %4901 = vmatpush3.msra.mxu1 %v6899_v18  ;;  %v7540_v20 = vld [vmem:[#allocation20_spill] sm:$0xff]  ;;  %v7541_v18 = vld [vmem:[#allocation26_spill] sm:$0xff] }
 0xe1a   :  { %3672 = vmatprep.subr.mxu0 %v6902_v11  ;;  %4902 = vmatprep.subr.mxu1 %v7373_v13 }
 0xe1b   :  { %3673 = vmatpush1.msra.mxu0 %v6906_v46  ;;  %4903 = vmatpush3.msra.mxu1 %v6909_v10  ;;  %v7542_v10 = vld [vmem:[#allocation49_spill] sm:$0xff] }
 0xe1c   :  { %3674 = vmatprep.subr.mxu0 %v6912_v6  ;;  %4904 = vmatprep.subr.mxu1 %v7373_v13  ;;  %v2304_v6 = vadd.f32 %v7542_v10, %v7479_v21 }
 0xe1d   :  { %3675 = vmatpush1.msra.mxu0 %v6916_v0  ;;  %4905 = vmatpush3.msra.mxu1 %v6919_v12  ;;  %v7543_v0 = vld [vmem:[#allocation48_spill] sm:$0xff] }
 0xe1e   :  { %3676 = vmatprep.subr.mxu0 %v6922_v14  ;;  %4906 = vmatprep.subr.mxu1 %v7373_v13 }
 0xe1f   :  { %3677 = vmatpush1.msra.mxu0 %v6926_v28  ;;  %4907 = vmatpush3.msra.mxu1 %v6929_v8 }
 0xe20   :  { %3678 = vmatprep.subr.mxu0 %v6932_v56  ;;  %4908 = vmatprep.subr.mxu1 %v7373_v13 }
 0xe21   :  { %3679 = vmatpush1.msra.mxu0 %v6936_v16  ;;  %4909 = vmatpush3.msra.mxu1 %v6939_v1  ;;  %v7544_v1 = vld [vmem:[#allocation19_spill] sm:$0xff] }
 0xe22   :  { %3680 = vmatprep.subr.mxu0 %v6942_v22  ;;  %4910 = vmatprep.subr.mxu1 %v7373_v13  ;;  %v2306_v22 = vadd.f32 %v7544_v1, %v6615_v60 }
 0xe23   :  { %3681 = vmatpush1.msra.mxu0 %v6946_v30  ;;  %4911 = vmatpush3.msra.mxu1 %v6949_v17 }
 0xe24   :  { %3682 = vmatprep.subr.mxu0 %v6952_v19  ;;  %4912 = vmatprep.subr.mxu1 %v7373_v13 }
 0xe25   :  { %3683 = vmatpush1.msra.mxu0 %v6956_v25  ;;  %4913 = vmatpush3.msra.mxu1 %v6959_v61 }
 0xe26   :  { %3684 = vmatprep.subr.mxu0 %v6962_v31  ;;  %4914 = vmatprep.subr.mxu1 %v7373_v13 }
 0xe27   :  { %3685 = vmatpush1.msra.mxu0 %v6966_v32  ;;  %4915 = vmatpush3.msra.mxu1 %v6969_v33 }
 0xe28   :  { %3686 = vmatprep.subr.mxu0 %v6972_v34  ;;  %4916 = vmatprep.subr.mxu1 %v7373_v13  ;;  %v7545_v34 = vld [vmem:[#allocation51_spill] sm:$0xff] }
 0xe29   :  { %3687 = vmatpush1.msra.mxu0 %v6976_v38  ;;  %4917 = vmatpush3.msra.mxu1 %v6979_v39  ;;  %v2411_v38 = vadd.f32 %v7545_v34, %v6624_v45 }
 0xe2a   :  { %3688 = vmatprep.subr.mxu0 %v6982_v40  ;;  %4918 = vmatprep.subr.mxu1 %v7373_v13 }
 0xe2b   :  { %3689 = vmatpush1.msra.mxu0 %v6986_v59  ;;  %4919 = vmatpush3.msra.mxu1 %v6989_v63 }
 0xe2c   :  { %3690 = vmatprep.subr.mxu0 %v6992_v24  ;;  %4920 = vmatprep.subr.mxu1 %v7373_v13 }
 0xe2d   :  { %3691 = vmatpush1.msra.mxu0 %v6996_v3  ;;  %4921 = vmatpush3.msra.mxu1 %v6999_v36 }
 0xe2e   :  { %3692 = vmatprep.subr.mxu0 %v7002_v23  ;;  %4922 = vmatprep.subr.mxu1 %v7373_v13 }
 0xe2f   :  { %3693 = vmatpush1.msra.mxu0 %v7534_v26  ;;  %4923 = vmatpush3.msra.mxu1 %v7535_v43 }
 0xe30   :  { %3694 = vmatprep.subr.mxu0 %v7536_v15  ;;  %4924 = vmatprep.subr.mxu1 %v7373_v13 }
 0xe31   :  { %3695 = vmatpush1.msra.mxu0 %v7537_v44  ;;  %4925 = vmatpush3.msra.mxu1 %v7538_v9 }
 0xe32   :  { %3696 = vmatprep.subr.mxu0 %v7539_v58  ;;  %4926 = vmatprep.subr.mxu1 %v7373_v13 }
 0xe33   :  { %3697 = vmatpush1.msra.mxu0 %v7540_v20  ;;  %3730 = vmatprep.mubr.f32.mxu0 %v7373_v13 }
 0xe34   :  { %4927 = vmatpush3.msra.mxu1 %v7541_v18  ;;  %4928 = vmatprep.mubr.msk.f32.mxu1 %vm5302_vm2, %v7373_v13  ;;  %v7547_v18 = vld [vmem:[#allocation27_spill] sm:$0xff] }
 0xe35   :  { %4931 = vmatprep.subr.mxu0 %v7373_v13 }
 0xed4   :  { %v3567_v11 = vpop.f32.mrf.mxu0  ;;  %v3638_v46 = vpop.f32.mrf.mxu1 }
 0xed5   :  { %v3568_v12 = vadd.f32 %v3567_v11, %v7543_v0  ;;  %v3639_v32 = vadd.f32 %v3638_v46, %v6620_v51  ;;  %v2312_v11 = vadd.f32 %v7547_v18, %v6615_v60 }
 0xed6   :  { %v3569_v14 = vpop.f32.mrf.mxu0  ;;  %v4895_v28 = vpop.f32.mrf.mxu1 }
 0xed7   :  { %v3642_v8 = vadd.f32 %v3568_v12, %v2304_v6  ;;  %v3570_v16 = vadd.f32 %v3569_v14, %v6612_v7  ;;  %v7548_v28 = vld [vmem:[#allocation43_spill] sm:$0xff] }
 0xed9   :  { %v3986_v56 = vmul.f32 -1.442695, %v3642_v8  ;;  %v3649_v30 = vadd.f32 %v3570_v16, %v2306_v22  ;;  %v2416_v8 = vadd.f32 %v7548_v28, %v6624_v45 }
 0xedb   :  { %5117 = vpow2.f32 %v3986_v56  ;;  %v3987_v17 = vmul.f32 -1.442695, %v3649_v30 }
 0xedd   :  { %5119 = vpow2.f32 %v3987_v17 }
 0xee8   :  { %v5118_v19 = vpop.eup %5117 }
 0xee9   :  { %v3646_v25 = vadd.f32 1.0, %v5118_v19 }
 0xeea   :  { %v5120_v61 = vpop.eup %5119 }
 0xeeb   :  { %5121 = vrcp.f32 %v3646_v25  ;;  %v3653_v31 = vadd.f32 1.0, %v5120_v61 }
 0xeed   :  { %5123 = vrcp.f32 %v3653_v31 }
 0xef8   :  { %v5122_v33 = vpop.eup %5121 }
 0xef9   :  { %v3656_v39 = vmul.f32 %v5122_v33, %v3639_v32 }
 0xefa   :  { %v5124_v59 = vpop.eup %5123 }
 0xefb   :  { %v3657_v40 = vadd.f32 %v3656_v39, %v2411_v38  ;;  %v3659_v63 = vsub.f32 1.0, %v5124_v59  ;;  %v3661_v36 = vmul.f32 %v5124_v59, %v7128_v2  ;;  %v7546_v2 = vld [vmem:[#allocation22_spill] sm:$0xff] }
 0xefc   :  { %v2310_v26 = vadd.f32 %v7546_v2, %v7479_v21 }
 0xefd   :  { %5125 = vtanh.f32 %v3657_v40 }
 0xf0a   :  { %v5126_v24 = vpop.eup %5125 }
 0xf0b   :  { %v3660_v3 = vmul.f32 %v5126_v24, %v3659_v63 }
 0xf0d   :  { %v7208_v23 = vadd.f32 %v3661_v36, %v3660_v3 }
 0xf0f   :  { %3731 = vmatmul.mubr.f32.vlgmr.msra.gmra.mxu0 %v7208_v23  ;;  %4929 = vmatmul.mubr.f32.vlgmr.msra.gmra.mxu1 %v7208_v23 }
 0xf10   :  { %4963 = vmatprep.mubr.msk.f32.mxu0 %vm5302_vm2, %v7373_v13  ;;  %4932 = vmatpush3.msra.mxu0 %v3843_v4 }
 0xf11   :  { %4933 = vmatprep.subr.mxu0 %v7373_v13 }
 0xf12   :  { %4934 = vmatpush3.msra.mxu0 %v3842_v37 }
 0xf13   :  { %4935 = vmatprep.subr.mxu0 %v7373_v13 }
 0xf14   :  { %4936 = vmatpush3.msra.mxu0 %v3841_v42 }
 0xf15   :  { %4937 = vmatprep.subr.mxu0 %v7373_v13 }
 0xf16   :  { %4938 = vmatpush3.msra.mxu0 %v3840_v52 }
 0xf17   :  { %4939 = vmatprep.subr.mxu0 %v7373_v13 }
 0xf18   :  { %4940 = vmatpush3.msra.mxu0 %v3839_v29 }
 0xf19   :  { %4941 = vmatprep.subr.mxu0 %v7373_v13 }
 0xf1a   :  { %4942 = vmatpush3.msra.mxu0 %v3838_v27 }
 0xf1b   :  { %4943 = vmatprep.subr.mxu0 %v7373_v13 }
 0xf1c   :  { %4944 = vmatpush3.msra.mxu0 %v3837_v47 }
 0xf1d   :  { %4945 = vmatprep.subr.mxu0 %v7373_v13 }
 0xf1e   :  { %4946 = vmatpush3.msra.mxu0 %v3836_v54 }
 0xf1f   :  { %4947 = vmatprep.subr.mxu0 %v7373_v13 }
 0xf20   :  { %4948 = vmatpush3.msra.mxu0 %v3835_v50 }
 0xf21   :  { %4949 = vmatprep.subr.mxu0 %v7373_v13 }
 0xf22   :  { %4950 = vmatpush3.msra.mxu0 %v3834_v53 }
 0xf23   :  { %4951 = vmatprep.subr.mxu0 %v7373_v13 }
 0xf24   :  { %4952 = vmatpush3.msra.mxu0 %v3833_v35 }
 0xf25   :  { %4953 = vmatprep.subr.mxu0 %v7373_v13 }
 0xf26   :  { %4954 = vmatpush3.msra.mxu0 %v3832_v57 }
 0xf27   :  { %4955 = vmatprep.subr.mxu0 %v7373_v13 }
 0xf28   :  { %4956 = vmatpush3.msra.mxu0 %v3831_v5 }
 0xf29   :  { %4957 = vmatprep.subr.mxu0 %v7373_v13 }
 0xf2a   :  { %4958 = vmatpush3.msra.mxu0 %v3830_v48 }
 0xf2b   :  { %4959 = vmatprep.subr.mxu0 %v7373_v13 }
 0xf2c   :  { %4960 = vmatpush3.msra.mxu0 %v3829_v55 }
 0xf2d   :  { %4961 = vmatprep.subr.mxu0 %v7373_v13 }
 0xf2e   :  { %4962 = vmatpush3.msra.mxu0 %v3828_v41 }
 0xfcf   :  { %v3732_v49 = vpop.f32.mrf.mxu0  ;;  %v3803_v62 = vpop.f32.mrf.mxu1 }
 0xfd0   :  { %v3733_v43 = vadd.f32 %v3732_v49, %v7543_v0  ;;  %v3804_v0 = vadd.f32 %v3803_v62, %v6620_v51  ;;  %v3990_v51 = vld [vmem:[%s7255_s10] ss:$0 sm:$0xff] }
 0xfd1   :  { %v3734_v15 = vpop.f32.mrf.mxu0  ;;  %v4930_v44 = vpop.f32.mrf.mxu1 }
 0xfd2   :  { %v3807_v9 = vadd.f32 %v3733_v43, %v2310_v26  ;;  %v3735_v20 = vadd.f32 %v3734_v15, %v6612_v7 }
 0xfd4   :  { %v3988_v58 = vmul.f32 -1.442695, %v3807_v9  ;;  %v3814_v46 = vadd.f32 %v3735_v20, %v2312_v11 }
 0xfd6   :  { %5127 = vpow2.f32 %v3988_v58  ;;  %v3989_v13 = vmul.f32 -1.442695, %v3814_v46 }
 0xfd8   :  { %5129 = vpow2.f32 %v3989_v13 }
 0xfe3   :  { %v5128_v10 = vpop.eup %5127 }
 0xfe4   :  { %v3811_v6 = vadd.f32 1.0, %v5128_v10 }
 0xfe5   :  { %v5130_v12 = vpop.eup %5129 }
 0xfe6   :  { %5131 = vrcp.f32 %v3811_v6  ;;  %v3818_v21 = vadd.f32 1.0, %v5130_v12 }
 0xfe8   :  { %5133 = vrcp.f32 %v3818_v21 }
 0xff3   :  { %v5132_v14 = vpop.eup %5131 }
 0xff4   :  { %v3821_v56 = vmul.f32 %v5132_v14, %v3804_v0 }
 0xff5   :  { %v5134_v60 = vpop.eup %5133 }
 0xff6   :  { %v3822_v7 = vadd.f32 %v3821_v56, %v2416_v8  ;;  %v3824_v16 = vsub.f32 1.0, %v5134_v60  ;;  %v3826_v30 = vmul.f32 %v5134_v60, %v7208_v23 }
 0xff8   :  { %5135 = vtanh.f32 %v3822_v7 }
0x1005   :  { %v5136_v1 = vpop.eup %5135 }
0x1006   :  { %v3825_v22 = vmul.f32 %v5136_v1, %v3824_v16 }
0x1008   :  { %v3827_v17 = vadd.f32 %v3826_v30, %v3825_v22 }
0x100a   :  { %4964 = vmatmul.mubr.f32.vlgmr.msra.gmra.mxu0 %v3827_v17 }
0x10ca   :  { %v3917_v19 = vpop.f32.mrf.mxu0 }
0x10cb   :  { %v3918_v45 = vadd.f32 %v3990_v51, %v3917_v19 }
0x10cc   :  { %v4965_v25 = vpop.f32.mrf.mxu0 }
0x10cd   :  { %3921 = vst [vmem:[#allocation13] sm:$0xff] %v3918_v45 }
0x10ce   :  { %5276 = shalt.err (!%p5273_p10)
}
0x10cf   :  { %3931 = dma.vmem_to_hbm [thread:$0]  %s3929_s23, 128, %s7256_s11, [#allocation7]  }
0x10d0   :  { %5291 = dma.done.wait [#allocation7], 128  }
0x10d1   :  { %5292 = vsyncadd [#allocation7], 4294967168 }
0x10d2   :  { %3935 = vsyncpa [#allocation6], 1 }
0x10d3   :  { %3936 = vsyncpa [#allocation9], 1 }
0x10d4   :  { %3937 = vsyncpa [#allocation12], 1 }
0x10d5   :  { %3938 = vsyncpa [#allocation7], 1 }

</bundles_post_ra>
